<compile_context>
chip_gen: v7x
topology: tpu7x:2x2x1
jax: 0.10.0
libtpu: 0.0.40
codegen_flags: <defaults>
</compile_context>

<pallas_src>
import functools
import math

import jax
import jax.numpy as jnp
from jax.experimental import pallas as pl
from jax.experimental.pallas import tpu as pltpu


# ----------------------------------------------------------------------------
# small helpers
# ----------------------------------------------------------------------------
def _round_up(x, m):
    return ((x + m - 1) // m) * m


def _largest_divisor_tile(m):
    """Largest row tile (multiple of 8) that divides m; falls back to m."""
    for cand in (512, 256, 128, 64, 32, 24, 16, 8):
        if cand <= m and m % cand == 0:
            return cand
    return m


def _ln(x, g, b):
    """LayerNorm over the last axis (espnet eps=1e-12); x:(tm,d) g,b:(1,d)."""
    mu = jnp.mean(x, axis=-1, keepdims=True)
    xc = x - mu
    var = jnp.mean(xc * xc, axis=-1, keepdims=True)
    return xc * jax.lax.rsqrt(var + 1e-12) * g + b


# ----------------------------------------------------------------------------
# Pallas kernels
# ----------------------------------------------------------------------------
def _linear_kernel(x_ref, w_ref, b_ref, o_ref, *, relu):
    acc = jnp.dot(x_ref[...], w_ref[...], preferred_element_type=jnp.float32)
    acc = acc + b_ref[...]
    if relu:
        acc = jnp.maximum(acc, 0.0)
    o_ref[...] = acc


def _embed_pe_kernel(z_ref, w_ref, b_ref, pe_ref, o_ref, *, scale):
    # (Linear -> *sqrt(d_model) -> +positional encoding) fused epilogue.
    acc = jnp.dot(z_ref[0], w_ref[...], preferred_element_type=jnp.float32)
    o_ref[0] = (acc + b_ref[...]) * scale + pe_ref[0]


def _ln_qkv_kernel(x_ref, g_ref, b_ref, w_ref, bias_ref, o_ref):
    # fused LayerNorm + concatenated QKV projection.
    xn = _ln(x_ref[...], g_ref[...], b_ref[...])
    o_ref[...] = (jnp.dot(xn, w_ref[...], preferred_element_type=jnp.float32)
                  + bias_ref[...])


def _ffn_kernel(x_ref, g_ref, b_ref, w1_ref, b1_ref, w2_ref, b2_ref, o_ref):
    # fused LayerNorm + FF1(+ReLU) + FF2 + residual; hidden stays in VMEM/vregs.
    x = x_ref[...]
    xn = _ln(x, g_ref[...], b_ref[...])
    h = jnp.dot(xn, w1_ref[...], preferred_element_type=jnp.float32) + b1_ref[...]
    h = jnp.maximum(h, 0.0)
    o_ref[...] = x + jnp.dot(h, w2_ref[...],
                             preferred_element_type=jnp.float32) + b2_ref[...]


def _ln_kernel(x_ref, g_ref, b_ref, o_ref):
    o_ref[...] = _ln(x_ref[...], g_ref[...], b_ref[...])


def _mha_kernel(qkv_ref, bias_ref, wo_ref, bo_ref, res_ref, o_ref,
                *, num_heads, dk, scale):
    """Per-batch MHA fused with output projection + residual.

    qkv_ref : (1, Tp, 3*d)   lane-dense block, heads folded in the lane dim
    bias_ref: (1, 1, Tp)     additive key mask (0 valid / -10000 pad)
    """
    d = num_heads * dk
    qkv = qkv_ref[0]                          # (Tp, 3d)
    bias = bias_ref[0]                        # (1, Tp) -> broadcasts over queries
    ctx_heads = []
    for h in range(num_heads):                # heads handled inside the kernel
        q_h = qkv[:, h * dk:(h + 1) * dk] * scale           # pre-scale q
        k_h = qkv[:, d + h * dk:d + (h + 1) * dk]
        v_h = qkv[:, 2 * d + h * dk:2 * d + (h + 1) * dk]
        s = jax.lax.dot_general(q_h, k_h, (((1,), (1,)), ((), ())),
                                preferred_element_type=jnp.float32)   # (Tp, Tp)
        s = s + bias
        s = s - jnp.max(s, axis=-1, keepdims=True)
        p = jnp.exp(s)
        p = p * pl.reciprocal(jnp.sum(p, axis=-1, keepdims=True), approx=True)
        ctx_heads.append(jnp.dot(p, v_h, preferred_element_type=jnp.float32))
    ctx = jnp.concatenate(ctx_heads, axis=-1)                         # (Tp, d)
    o_ref[0] = (res_ref[0]
                + jnp.dot(ctx, wo_ref[...], preferred_element_type=jnp.float32)
                + bo_ref[...])


# ----------------------------------------------------------------------------
# pallas_call wrappers
# ----------------------------------------------------------------------------
_PARALLEL = pltpu.CompilerParams(dimension_semantics=("parallel",))


def tiled_linear(x, w, b, *, relu=False):
    """y = relu?(x @ w + b) with an M-row grid (pads rows to a multiple of 8)."""
    m, k = x.shape
    n = w.shape[1]
    tm = 256 if m >= 256 else _round_up(m, 8)
    m_pad = _round_up(m, tm)
    xp = jnp.pad(x, ((0, m_pad - m), (0, 0))) if m_pad != m else x
    out = pl.pallas_call(
        functools.partial(_linear_kernel, relu=relu),
        out_shape=jax.ShapeDtypeStruct((m_pad, n), jnp.float32),
        grid=(m_pad // tm,),
        in_specs=[
            pl.BlockSpec((tm, k), lambda i: (i, 0)),
            pl.BlockSpec((k, n), lambda i: (0, 0)),
            pl.BlockSpec((1, n), lambda i: (0, 0)),
        ],
        out_specs=pl.BlockSpec((tm, n), lambda i: (i, 0)),
        compiler_params=_PARALLEL,
    )(xp, w, b.reshape(1, n))
    return out[:m] if m_pad != m else out


def fused_embed_pe(z, w, b, pe, *, scale):
    """(B, Tp, K) @ (K, d) + b, then *sqrt(d) + pe, gridded over batch."""
    B, Tp, K = z.shape
    d = w.shape[1]
    return pl.pallas_call(
        functools.partial(_embed_pe_kernel, scale=scale),
        out_shape=jax.ShapeDtypeStruct((B, Tp, d), jnp.float32),
        grid=(B,),
        in_specs=[
            pl.BlockSpec((1, Tp, K), lambda bi: (bi, 0, 0)),
            pl.BlockSpec((K, d), lambda bi: (0, 0)),
            pl.BlockSpec((1, d), lambda bi: (0, 0)),
            pl.BlockSpec((1, Tp, d), lambda bi: (0, 0, 0)),
        ],
        out_specs=pl.BlockSpec((1, Tp, d), lambda bi: (bi, 0, 0)),
        compiler_params=_PARALLEL,
    )(z, w, b.reshape(1, d), pe)


def fused_ln_qkv(x, g, beta, wqkv, bqkv):
    m, d = x.shape
    n = wqkv.shape[1]
    tm = _largest_divisor_tile(m)
    return pl.pallas_call(
        _ln_qkv_kernel,
        out_shape=jax.ShapeDtypeStruct((m, n), jnp.float32),
        grid=(m // tm,),
        in_specs=[
            pl.BlockSpec((tm, d), lambda i: (i, 0)),
            pl.BlockSpec((1, d), lambda i: (0, 0)),
            pl.BlockSpec((1, d), lambda i: (0, 0)),
            pl.BlockSpec((d, n), lambda i: (0, 0)),
            pl.BlockSpec((1, n), lambda i: (0, 0)),
        ],
        out_specs=pl.BlockSpec((tm, n), lambda i: (i, 0)),
        compiler_params=_PARALLEL,
    )(x, g.reshape(1, d), beta.reshape(1, d), wqkv, bqkv.reshape(1, n))


def fused_attention(qkv, bias, wo, bo, res, *, num_heads):
    B, Tp, three_d = qkv.shape
    d = three_d // 3
    dk = d // num_heads
    scale = 1.0 / math.sqrt(dk)
    return pl.pallas_call(
        functools.partial(_mha_kernel, num_heads=num_heads, dk=dk, scale=scale),
        out_shape=jax.ShapeDtypeStruct((B, Tp, d), jnp.float32),
        grid=(B,),
        in_specs=[
            pl.BlockSpec((1, Tp, three_d), lambda bi: (bi, 0, 0)),
            pl.BlockSpec((1, 1, Tp), lambda bi: (bi, 0, 0)),
            pl.BlockSpec((d, d), lambda bi: (0, 0)),
            pl.BlockSpec((1, d), lambda bi: (0, 0)),
            pl.BlockSpec((1, Tp, d), lambda bi: (bi, 0, 0)),
        ],
        out_specs=pl.BlockSpec((1, Tp, d), lambda bi: (bi, 0, 0)),
        input_output_aliases={4: 0},   # residual updated in place
        compiler_params=_PARALLEL,
    )(qkv, bias, wo, bo.reshape(1, d), res)


def fused_ffn(x, g, beta, w1, b1, w2, b2):
    m, d = x.shape
    dff = w1.shape[1]
    tm = _largest_divisor_tile(m)
    return pl.pallas_call(
        _ffn_kernel,
        out_shape=jax.ShapeDtypeStruct((m, d), jnp.float32),
        grid=(m // tm,),
        in_specs=[
            pl.BlockSpec((tm, d), lambda i: (i, 0)),
            pl.BlockSpec((1, d), lambda i: (0, 0)),
            pl.BlockSpec((1, d), lambda i: (0, 0)),
            pl.BlockSpec((d, dff), lambda i: (0, 0)),
            pl.BlockSpec((1, dff), lambda i: (0, 0)),
            pl.BlockSpec((dff, d), lambda i: (0, 0)),
            pl.BlockSpec((1, d), lambda i: (0, 0)),
        ],
        out_specs=pl.BlockSpec((tm, d), lambda i: (i, 0)),
        input_output_aliases={0: 0},   # residual input updated in place
        compiler_params=_PARALLEL,
    )(x, g.reshape(1, d), beta.reshape(1, d), w1, b1.reshape(1, dff),
      w2, b2.reshape(1, d))


def tiled_layernorm(x, g, b):
    m, d = x.shape
    tm = _largest_divisor_tile(m)
    return pl.pallas_call(
        _ln_kernel,
        out_shape=jax.ShapeDtypeStruct((m, d), jnp.float32),
        grid=(m // tm,),
        in_specs=[
            pl.BlockSpec((tm, d), lambda i: (i, 0)),
            pl.BlockSpec((1, d), lambda i: (0, 0)),
            pl.BlockSpec((1, d), lambda i: (0, 0)),
        ],
        out_specs=pl.BlockSpec((tm, d), lambda i: (i, 0)),
        compiler_params=_PARALLEL,
    )(x, g.reshape(1, d), b.reshape(1, d))


# ----------------------------------------------------------------------------
# Glue: channel-last im2col, positional encoding, parameters
# ----------------------------------------------------------------------------
def _im2col_nhwc(x, kh, kw, stride):
    """x: (B, H, W, C) -> (B, Ho, Wo, kh*kw*C), patch feature order (kh, kw, C)."""
    B, H, W, C = x.shape
    Ho = (H - kh) // stride + 1
    Wo = (W - kw) // stride + 1
    cols = []
    for i in range(kh):
        for j in range(kw):
            cols.append(x[:, i:i + stride * (Ho - 1) + 1:stride,
                          j:j + stride * (Wo - 1) + 1:stride, :])
    p = jnp.stack(cols, axis=3)                      # (B, Ho, Wo, kh*kw, C)
    return p.reshape(B, Ho, Wo, kh * kw * C)


def _positional_encoding(length, d_model):
    pos = jnp.arange(length, dtype=jnp.float32)[:, None]
    div = jnp.exp(jnp.arange(0, d_model, 2, dtype=jnp.float32)
                  * -(math.log(10000.0) / d_model))
    pe = jnp.zeros((length, d_model), jnp.float32)
    pe = pe.at[:, 0::2].set(jnp.sin(pos * div))
    pe = pe.at[:, 1::2].set(jnp.cos(pos * div))
    return pe


def init_params(key, *, feats_dim, d_model, num_heads, d_ff, num_layers):
    del num_heads
    f1 = (feats_dim - 1) // 2
    f2 = (f1 - 1) // 2
    keys = iter(jax.random.split(key, 8 + 8 * num_layers))

    def dense(shape):
        return 0.02 * jax.random.normal(next(keys), shape, dtype=jnp.float32)

    zeros = lambda n: jnp.zeros((n,), jnp.float32)
    ones = lambda n: jnp.ones((n,), jnp.float32)

    params = {
        # Conv2dSubsampling: Conv2d(1,d,3,2)+ReLU -> Conv2d(d,d,3,2)+ReLU (im2col).
        "conv1_w": dense((1 * 3 * 3, d_model)), "conv1_b": zeros(d_model),
        # TODO(synk): conv2_w rows are (kh, kw, cin)-ordered (channel-last im2col);
        # permute from torch's (cin, kh, kw) layout when importing real weights.
        "conv2_w": dense((d_model * 3 * 3, d_model)), "conv2_b": zeros(d_model),
        # TODO(synk): embed_w rows are (freq, channel)-ordered (channel-last conv);
        # permute from torch's (channel, freq) layout when importing real weights.
        "embed_w": dense((d_model * f2, d_model)), "embed_b": zeros(d_model),
        "after_g": ones(d_model), "after_b": zeros(d_model),
        "layers": [],
    }
    for _ in range(num_layers):
        params["layers"].append({
            "ln1_g": ones(d_model), "ln1_b": zeros(d_model),
            # fused QKV: concat of (wq | wk | wv) along the output dim.
            "wqkv": dense((d_model, 3 * d_model)), "bqkv": zeros(3 * d_model),
            "wo": dense((d_model, d_model)), "bo": zeros(d_model),
            "ln2_g": ones(d_model), "ln2_b": zeros(d_model),
            "w_ff1": dense((d_model, d_ff)), "b_ff1": zeros(d_ff),
            "w_ff2": dense((d_ff, d_model)), "b_ff2": zeros(d_model),
        })
    return params


# ----------------------------------------------------------------------------
# Forward pass (== TransformerEncoder.forward, export/inference mode)
# ----------------------------------------------------------------------------
@functools.partial(jax.jit, static_argnames=("num_heads",))
def transformer_encoder_forward(params, feats, feats_length, *, num_heads):
    B, T, _ = feats.shape
    d_model = params["embed_w"].shape[1]

    # make_pad_mask (flip=False): 1 for valid frames, 0 for padding
    mask = (jnp.arange(T)[None, :] < feats_length[:, None]).astype(jnp.float32)

    # --- Conv2dSubsampling, channel-last im2col + Pallas matmul(+ReLU), no transposes
    x = feats[:, :, :, None]                                   # (B, T, F, 1) NHWC
    p1 = _im2col_nhwc(x, 3, 3, 2)                              # (B, T1, F1, 9)
    _, T1, F1, K1 = p1.shape
    y1 = tiled_linear(p1.reshape(-1, K1), params["conv1_w"], params["conv1_b"],
                      relu=True)
    y1 = y1.reshape(B, T1, F1, d_model)                        # stays channel-last
    p2 = _im2col_nhwc(y1, 3, 3, 2)                             # (B, T2, F2, 9*d)
    _, T2, F2, K2 = p2.shape
    y2 = tiled_linear(p2.reshape(-1, K2), params["conv2_w"], params["conv2_b"],
                      relu=True)
    y2 = y2.reshape(B, T2, F2, d_model)

    # pad time to a multiple of 8 so all row-tiled blocks are (8, .)-aligned
    T2p = _round_up(max(T2, 8), 8)
    z = y2.reshape(B, T2, F2 * d_model)
    z = jnp.pad(z, ((0, 0), (0, T2p - T2), (0, 0)))

    # embed Linear fused with PositionalEncoding (x*sqrt(d) + pe) epilogue
    pe = _positional_encoding(T2p, d_model)[None]              # (1, T2p, d)
    xs = fused_embed_pe(z, params["embed_w"], params["embed_b"], pe,
                        scale=math.sqrt(d_model))              # (B, T2p, d)

    # mask subsampled like Conv2dSubsampling ([:, :-2:2][:, :-2:2]); prepare_mask
    mask2 = mask[:, :-2:2][:, :-2:2]                           # (B, T2)
    mask2p = jnp.pad(mask2, ((0, 0), (0, T2p - T2)))           # padded rows invalid
    att_bias = ((1.0 - mask2p) * -10000.0)[:, None, :]         # (B, 1, T2p)

    M = B * T2p
    x2d = xs.reshape(M, d_model)
    for layer in params["layers"]:
        # self-attention block (normalize_before=True): LN1 + QKV in one kernel
        qkv = fused_ln_qkv(x2d, layer["ln1_g"], layer["ln1_b"],
                           layer["wqkv"], layer["bqkv"])       # (M, 3d)
        # per-batch MHA + output projection + residual in one kernel
        x3 = fused_attention(qkv.reshape(B, T2p, 3 * d_model), att_bias,
                             layer["wo"], layer["bo"],
                             x2d.reshape(B, T2p, d_model), num_heads=num_heads)
        x2d = x3.reshape(M, d_model)
        # feed-forward block: LN2 + FF1(+ReLU) + FF2 + residual in one kernel
        x2d = fused_ffn(x2d, layer["ln2_g"], layer["ln2_b"],
                        layer["w_ff1"], layer["b_ff1"],
                        layer["w_ff2"], layer["b_ff2"])

    # after_norm (normalize_before=True)
    xs_out = tiled_layernorm(x2d, params["after_g"], params["after_b"])
    xs_out = xs_out.reshape(B, T2p, d_model)[:, :T2, :]

    # TODO(synk): the PyTorch module computes olens as masks.squeeze(1).sum(1) on the
    # encoder-returned additive mask; here we return the subsampled valid lengths.
    olens = jnp.sum(mask2, axis=1).astype(jnp.int32)
    return xs_out, olens, None


# ----------------------------------------------------------------------------
if __name__ == "__main__":
    key = jax.random.PRNGKey(0)
    k_param, k_feats = jax.random.split(key)

    B, T, F = 2, 30, 80          # batch, input frames, mel features
    D_MODEL, HEADS, D_FF, LAYERS = 32, 4, 64, 2

    feats = jax.random.normal(k_feats, (B, T, F), dtype=jnp.float32)
    feats_length = jnp.array([30, 24], dtype=jnp.int32)

    params = init_params(k_param, feats_dim=F, d_model=D_MODEL, num_heads=HEADS,
                         d_ff=D_FF, num_layers=LAYERS)

    xs_pad, olens, _ = transformer_encoder_forward(params, feats, feats_length,
                                                   num_heads=HEADS)
    jax.block_until_ready((xs_pad, olens))

    T2 = ((T - 1) // 2 - 1) // 2
    assert xs_pad.shape == (B, T2, D_MODEL)
    assert olens.shape == (B,)
    assert bool(jnp.all(jnp.isfinite(xs_pad)))
    print("KERNEL_OK")
</pallas_src>

<mosaic_0001>
module attributes {stable_mosaic.version = 11 : i64} {
  func.func @_linear_kernel(%arg0: i32, %arg1: memref<256x9xf32, #tpu.memory_space<vmem>>, %arg2: memref<9x32xf32, #tpu.memory_space<vmem>>, %arg3: memref<1x32xf32, #tpu.memory_space<vmem>>, %arg4: memref<256x32xf32, #tpu.memory_space<vmem>>) attributes {dimension_semantics = [#tpu.dimension_semantics<parallel>], iteration_bounds = array<i64: 5>, scalar_prefetch = 0 : i64, scratch_operands = 0 : i64, tpu.core_type = #tpu.core_type<tc>, window_params = [{transform_indices = @transform_0, window_bounds = array<i64: 256, 9>}, {pipeline_mode = #tpu.pipeline_mode<synchronous>, transform_indices = @transform_1, window_bounds = array<i64: 9, 32>}, {pipeline_mode = #tpu.pipeline_mode<synchronous>, transform_indices = @transform_2, window_bounds = array<i64: 1, 32>}, {transform_indices = @transform_3, window_bounds = array<i64: 256, 32>}]} {
    %c0 = arith.constant 0 : index
    %c0_0 = arith.constant 0 : index
    %0 = vector.load %arg1[%c0, %c0_0] : memref<256x9xf32, #tpu.memory_space<vmem>>, vector<256x9xf32>
    %c0_1 = arith.constant 0 : index
    %c0_2 = arith.constant 0 : index
    %1 = vector.load %arg2[%c0_1, %c0_2] : memref<9x32xf32, #tpu.memory_space<vmem>>, vector<9x32xf32>
    %cst = arith.constant dense<0.000000e+00> : vector<256x32xf32>
    %2 = tpu.matmul %0, %1, %cst {dimension_numbers = #tpu.dot_dimension_numbers<[1], [0], [0], [1], [0, 0, 1, 1], [], []>} : vector<256x9xf32>, vector<9x32xf32>, vector<256x32xf32> -> vector<256x32xf32>
    %c0_3 = arith.constant 0 : index
    %c0_4 = arith.constant 0 : index
    %3 = vector.load %arg3[%c0_3, %c0_4] : memref<1x32xf32, #tpu.memory_space<vmem>>, vector<1x32xf32>
    %4 = vector.broadcast %3 : vector<1x32xf32> to vector<256x32xf32>
    %5 = arith.addf %2, %4 : vector<256x32xf32>
    %cst_5 = arith.constant 0.000000e+00 : f32
    %6 = vector.broadcast %cst_5 : f32 to vector<256x32xf32>
    %7 = arith.maximumf %5, %6 : vector<256x32xf32>
    %c0_6 = arith.constant 0 : index
    %c0_7 = arith.constant 0 : index
    %8 = vector.load %arg4[%c0_6, %c0_7] : memref<256x32xf32, #tpu.memory_space<vmem>>, vector<256x32xf32>
    tpu.vector_store %arg4[%c0_6, %c0_7], %7 {strides = array<i32>} : memref<256x32xf32, #tpu.memory_space<vmem>>, vector<256x32xf32>,
    return
  }
  func.func @transform_0(%arg0: i32) -> (i32, i32) {
    %c0_i32 = arith.constant 0 : i32
    %c0_i32_0 = arith.constant 0 : i32
    return %arg0, %c0_i32 : i32, i32
  }
  func.func @transform_1(%arg0: i32) -> (i32, i32) {
    %c0_i32 = arith.constant 0 : i32
    %c0_i32_0 = arith.constant 0 : i32
    %c0_i32_1 = arith.constant 0 : i32
    return %c0_i32, %c0_i32_0 : i32, i32
  }
  func.func @transform_2(%arg0: i32) -> (i32, i32) {
    %c0_i32 = arith.constant 0 : i32
    %c0_i32_0 = arith.constant 0 : i32
    %c0_i32_1 = arith.constant 0 : i32
    return %c0_i32, %c0_i32_0 : i32, i32
  }
  func.func @transform_3(%arg0: i32) -> (i32, i32) {
    %c0_i32 = arith.constant 0 : i32
    %c0_i32_0 = arith.constant 0 : i32
    return %arg0, %c0_i32 : i32, i32
  }
}

module attributes {stable_mosaic.version = 11 : i64} {
  func.func @_linear_kernel(%arg0: i32, %arg1: memref<232x288xf32, #tpu.memory_space<vmem>>, %arg2: memref<288x32xf32, #tpu.memory_space<vmem>>, %arg3: memref<1x32xf32, #tpu.memory_space<vmem>>, %arg4: memref<232x32xf32, #tpu.memory_space<vmem>>) attributes {dimension_semantics = [#tpu.dimension_semantics<parallel>], iteration_bounds = array<i64: 1>, scalar_prefetch = 0 : i64, scratch_operands = 0 : i64, tpu.core_type = #tpu.core_type<tc>, window_params = [{transform_indices = @transform_0, window_bounds = array<i64: 232, 288>}, {pipeline_mode = #tpu.pipeline_mode<synchronous>, transform_indices = @transform_1, window_bounds = array<i64: 288, 32>}, {pipeline_mode = #tpu.pipeline_mode<synchronous>, transform_indices = @transform_2, window_bounds = array<i64: 1, 32>}, {transform_indices = @transform_3, window_bounds = array<i64: 232, 32>}]} {
    %c0 = arith.constant 0 : index
    %c0_0 = arith.constant 0 : index
    %0 = vector.load %arg1[%c0, %c0_0] : memref<232x288xf32, #tpu.memory_space<vmem>>, vector<232x288xf32>
    %c0_1 = arith.constant 0 : index
    %c0_2 = arith.constant 0 : index
    %1 = vector.load %arg2[%c0_1, %c0_2] : memref<288x32xf32, #tpu.memory_space<vmem>>, vector<288x32xf32>
    %cst = arith.constant dense<0.000000e+00> : vector<232x32xf32>
    %2 = tpu.matmul %0, %1, %cst {dimension_numbers = #tpu.dot_dimension_numbers<[1], [0], [0], [1], [0, 0, 1, 1], [], []>} : vector<232x288xf32>, vector<288x32xf32>, vector<232x32xf32> -> vector<232x32xf32>
    %c0_3 = arith.constant 0 : index
    %c0_4 = arith.constant 0 : index
    %3 = vector.load %arg3[%c0_3, %c0_4] : memref<1x32xf32, #tpu.memory_space<vmem>>, vector<1x32xf32>
    %4 = vector.broadcast %3 : vector<1x32xf32> to vector<232x32xf32>
    %5 = arith.addf %2, %4 : vector<232x32xf32>
    %cst_5 = arith.constant 0.000000e+00 : f32
    %6 = vector.broadcast %cst_5 : f32 to vector<232x32xf32>
    %7 = arith.maximumf %5, %6 : vector<232x32xf32>
    %c0_6 = arith.constant 0 : index
    %c0_7 = arith.constant 0 : index
    %8 = vector.load %arg4[%c0_6, %c0_7] : memref<232x32xf32, #tpu.memory_space<vmem>>, vector<232x32xf32>
    tpu.vector_store %arg4[%c0_6, %c0_7], %7 {strides = array<i32>} : memref<232x32xf32, #tpu.memory_space<vmem>>, vector<232x32xf32>,
    return
  }
  func.func @transform_0(%arg0: i32) -> (i32, i32) {
    %c0_i32 = arith.constant 0 : i32
    %c0_i32_0 = arith.constant 0 : i32
    return %arg0, %c0_i32 : i32, i32
  }
  func.func @transform_1(%arg0: i32) -> (i32, i32) {
    %c0_i32 = arith.constant 0 : i32
    %c0_i32_0 = arith.constant 0 : i32
    %c0_i32_1 = arith.constant 0 : i32
    return %c0_i32, %c0_i32_0 : i32, i32
  }
  func.func @transform_2(%arg0: i32) -> (i32, i32) {
    %c0_i32 = arith.constant 0 : i32
    %c0_i32_0 = arith.constant 0 : i32
    %c0_i32_1 = arith.constant 0 : i32
    return %c0_i32, %c0_i32_0 : i32, i32
  }
  func.func @transform_3(%arg0: i32) -> (i32, i32) {
    %c0_i32 = arith.constant 0 : i32
    %c0_i32_0 = arith.constant 0 : i32
    return %arg0, %c0_i32 : i32, i32
  }
}

module attributes {stable_mosaic.version = 11 : i64} {
  func.func @_embed_pe_kernel(%arg0: i32, %arg1: memref<1x8x608xf32, #tpu.memory_space<vmem>>, %arg2: memref<608x32xf32, #tpu.memory_space<vmem>>, %arg3: memref<1x32xf32, #tpu.memory_space<vmem>>, %arg4: memref<1x8x32xf32, #tpu.memory_space<vmem>>, %arg5: memref<1x8x32xf32, #tpu.memory_space<vmem>>) attributes {dimension_semantics = [#tpu.dimension_semantics<parallel>], iteration_bounds = array<i64: 2>, scalar_prefetch = 0 : i64, scratch_operands = 0 : i64, tpu.core_type = #tpu.core_type<tc>, window_params = [{transform_indices = @transform_0, window_bounds = array<i64: 1, 8, 608>}, {pipeline_mode = #tpu.pipeline_mode<synchronous>, transform_indices = @transform_1, window_bounds = array<i64: 608, 32>}, {pipeline_mode = #tpu.pipeline_mode<synchronous>, transform_indices = @transform_2, window_bounds = array<i64: 1, 32>}, {pipeline_mode = #tpu.pipeline_mode<synchronous>, transform_indices = @transform_3, window_bounds = array<i64: 1, 8, 32>}, {transform_indices = @transform_4, window_bounds = array<i64: 1, 8, 32>}]} {
    %c0 = arith.constant 0 : index
    %c0_0 = arith.constant 0 : index
    %c0_1 = arith.constant 0 : index
    %0 = vector.load %arg1[%c0, %c0_0, %c0_1] : memref<1x8x608xf32, #tpu.memory_space<vmem>>, vector<1x8x608xf32>
    %1 = vector.shape_cast %0 : vector<1x8x608xf32> to vector<8x608xf32>
    %c0_2 = arith.constant 0 : index
    %c0_3 = arith.constant 0 : index
    %2 = vector.load %arg2[%c0_2, %c0_3] : memref<608x32xf32, #tpu.memory_space<vmem>>, vector<608x32xf32>
    %cst = arith.constant dense<0.000000e+00> : vector<8x32xf32>
    %3 = tpu.matmul %1, %2, %cst {dimension_numbers = #tpu.dot_dimension_numbers<[1], [0], [0], [1], [0, 0, 1, 1], [], []>} : vector<8x608xf32>, vector<608x32xf32>, vector<8x32xf32> -> vector<8x32xf32>
    %c0_4 = arith.constant 0 : index
    %c0_5 = arith.constant 0 : index
    %4 = vector.load %arg3[%c0_4, %c0_5] : memref<1x32xf32, #tpu.memory_space<vmem>>, vector<1x32xf32>
    %5 = vector.broadcast %4 : vector<1x32xf32> to vector<8x32xf32>
    %6 = arith.addf %3, %5 : vector<8x32xf32>
    %cst_6 = arith.constant 5.65685415 : f32
    %7 = vector.broadcast %cst_6 : f32 to vector<8x32xf32>
    %8 = arith.mulf %6, %7 : vector<8x32xf32>
    %c0_7 = arith.constant 0 : index
    %c0_8 = arith.constant 0 : index
    %c0_9 = arith.constant 0 : index
    %9 = vector.load %arg4[%c0_7, %c0_8, %c0_9] : memref<1x8x32xf32, #tpu.memory_space<vmem>>, vector<1x8x32xf32>
    %10 = vector.shape_cast %9 : vector<1x8x32xf32> to vector<8x32xf32>
    %11 = arith.addf %8, %10 : vector<8x32xf32>
    %c0_10 = arith.constant 0 : index
    %c0_11 = arith.constant 0 : index
    %c0_12 = arith.constant 0 : index
    %12 = vector.load %arg5[%c0_10, %c0_11, %c0_12] : memref<1x8x32xf32, #tpu.memory_space<vmem>>, vector<1x8x32xf32>
    %13 = vector.shape_cast %12 : vector<1x8x32xf32> to vector<8x32xf32>
    %14 = vector.shape_cast %11 : vector<8x32xf32> to vector<1x8x32xf32>
    tpu.vector_store %arg5[%c0_10, %c0_11, %c0_12], %14 {strides = array<i32>} : memref<1x8x32xf32, #tpu.memory_space<vmem>>, vector<1x8x32xf32>,
    return
  }
  func.func @transform_0(%arg0: i32) -> (i32, i32, i32) {
    %c0_i32 = arith.constant 0 : i32
    %c0_i32_0 = arith.constant 0 : i32
    %c0_i32_1 = arith.constant 0 : i32
    return %arg0, %c0_i32, %c0_i32_0 : i32, i32, i32
  }
  func.func @transform_1(%arg0: i32) -> (i32, i32) {
    %c0_i32 = arith.constant 0 : i32
    %c0_i32_0 = arith.constant 0 : i32
    %c0_i32_1 = arith.constant 0 : i32
    return %c0_i32, %c0_i32_0 : i32, i32
  }
  func.func @transform_2(%arg0: i32) -> (i32, i32) {
    %c0_i32 = arith.constant 0 : i32
    %c0_i32_0 = arith.constant 0 : i32
    %c0_i32_1 = arith.constant 0 : i32
    return %c0_i32, %c0_i32_0 : i32, i32
  }
  func.func @transform_3(%arg0: i32) -> (i32, i32, i32) {
    %c0_i32 = arith.constant 0 : i32
    %c0_i32_0 = arith.constant 0 : i32
    %c0_i32_1 = arith.constant 0 : i32
    %c0_i32_2 = arith.constant 0 : i32
    return %c0_i32, %c0_i32_0, %c0_i32_1 : i32, i32, i32
  }
  func.func @transform_4(%arg0: i32) -> (i32, i32, i32) {
    %c0_i32 = arith.constant 0 : i32
    %c0_i32_0 = arith.constant 0 : i32
    %c0_i32_1 = arith.constant 0 : i32
    return %arg0, %c0_i32, %c0_i32_0 : i32, i32, i32
  }
}

module attributes {stable_mosaic.version = 11 : i64} {
  func.func @_ln_qkv_kernel(%arg0: i32, %arg1: memref<16x32xf32, #tpu.memory_space<vmem>>, %arg2: memref<1x32xf32, #tpu.memory_space<vmem>>, %arg3: memref<1x32xf32, #tpu.memory_space<vmem>>, %arg4: memref<32x96xf32, #tpu.memory_space<vmem>>, %arg5: memref<1x96xf32, #tpu.memory_space<vmem>>, %arg6: memref<16x96xf32, #tpu.memory_space<vmem>>) attributes {dimension_semantics = [#tpu.dimension_semantics<parallel>], iteration_bounds = array<i64: 1>, scalar_prefetch = 0 : i64, scratch_operands = 0 : i64, tpu.core_type = #tpu.core_type<tc>, window_params = [{transform_indices = @transform_0, window_bounds = array<i64: 16, 32>}, {pipeline_mode = #tpu.pipeline_mode<synchronous>, transform_indices = @transform_1, window_bounds = array<i64: 1, 32>}, {pipeline_mode = #tpu.pipeline_mode<synchronous>, transform_indices = @transform_2, window_bounds = array<i64: 1, 32>}, {pipeline_mode = #tpu.pipeline_mode<synchronous>, transform_indices = @transform_3, window_bounds = array<i64: 32, 96>}, {pipeline_mode = #tpu.pipeline_mode<synchronous>, transform_indices = @transform_4, window_bounds = array<i64: 1, 96>}, {transform_indices = @transform_5, window_bounds = array<i64: 16, 96>}]} {
    %c0 = arith.constant 0 : index
    %c0_0 = arith.constant 0 : index
    %0 = vector.load %arg1[%c0, %c0_0] : memref<16x32xf32, #tpu.memory_space<vmem>>, vector<16x32xf32>
    %c0_1 = arith.constant 0 : index
    %c0_2 = arith.constant 0 : index
    %1 = vector.load %arg2[%c0_1, %c0_2] : memref<1x32xf32, #tpu.memory_space<vmem>>, vector<1x32xf32>
    %c0_3 = arith.constant 0 : index
    %c0_4 = arith.constant 0 : index
    %2 = vector.load %arg3[%c0_3, %c0_4] : memref<1x32xf32, #tpu.memory_space<vmem>>, vector<1x32xf32>
    %cst = arith.constant dense<0.000000e+00> : vector<16xf32>
    %3 = vector.multi_reduction <add>, %0, %cst [1] : vector<16x32xf32> to vector<16xf32>
    %4 = vector.shape_cast %3 : vector<16xf32> to vector<16x1xf32>
    %cst_5 = arith.constant 3.200000e+01 : f32
    %5 = vector.broadcast %cst_5 : f32 to vector<16x1xf32>
    %6 = arith.divf %4, %5 : vector<16x1xf32>
    %7 = vector.broadcast %6 : vector<16x1xf32> to vector<16x32xf32>
    %8 = arith.subf %0, %7 : vector<16x32xf32>
    %9 = arith.mulf %8, %8 : vector<16x32xf32>
    %cst_6 = arith.constant dense<0.000000e+00> : vector<16xf32>
    %10 = vector.multi_reduction <add>, %9, %cst_6 [1] : vector<16x32xf32> to vector<16xf32>
    %11 = vector.shape_cast %10 : vector<16xf32> to vector<16x1xf32>
    %cst_7 = arith.constant 3.200000e+01 : f32
    %12 = vector.broadcast %cst_7 : f32 to vector<16x1xf32>
    %13 = arith.divf %11, %12 : vector<16x1xf32>
    %cst_8 = arith.constant 9.99999996E-13 : f32
    %14 = vector.broadcast %cst_8 : f32 to vector<16x1xf32>
    %15 = arith.addf %13, %14 : vector<16x1xf32>
    %16 = math.rsqrt %15 : vector<16x1xf32>
    %17 = vector.broadcast %16 : vector<16x1xf32> to vector<16x32xf32>
    %18 = arith.mulf %8, %17 : vector<16x32xf32>
    %19 = vector.broadcast %1 : vector<1x32xf32> to vector<16x32xf32>
    %20 = arith.mulf %18, %19 : vector<16x32xf32>
    %21 = vector.broadcast %2 : vector<1x32xf32> to vector<16x32xf32>
    %22 = arith.addf %20, %21 : vector<16x32xf32>
    %c0_9 = arith.constant 0 : index
    %c0_10 = arith.constant 0 : index
    %23 = vector.load %arg4[%c0_9, %c0_10] : memref<32x96xf32, #tpu.memory_space<vmem>>, vector<32x96xf32>
    %cst_11 = arith.constant dense<0.000000e+00> : vector<16x96xf32>
    %24 = tpu.matmul %22, %23, %cst_11 {dimension_numbers = #tpu.dot_dimension_numbers<[1], [0], [0], [1], [0, 0, 1, 1], [], []>} : vector<16x32xf32>, vector<32x96xf32>, vector<16x96xf32> -> vector<16x96xf32>
    %c0_12 = arith.constant 0 : index
    %c0_13 = arith.constant 0 : index
    %25 = vector.load %arg5[%c0_12, %c0_13] : memref<1x96xf32, #tpu.memory_space<vmem>>, vector<1x96xf32>
    %26 = vector.broadcast %25 : vector<1x96xf32> to vector<16x96xf32>
    %27 = arith.addf %24, %26 : vector<16x96xf32>
    %c0_14 = arith.constant 0 : index
    %c0_15 = arith.constant 0 : index
    %28 = vector.load %arg6[%c0_14, %c0_15] : memref<16x96xf32, #tpu.memory_space<vmem>>, vector<16x96xf32>
    tpu.vector_store %arg6[%c0_14, %c0_15], %27 {strides = array<i32>} : memref<16x96xf32, #tpu.memory_space<vmem>>, vector<16x96xf32>,
    return
  }
  func.func @transform_0(%arg0: i32) -> (i32, i32) {
    %c0_i32 = arith.constant 0 : i32
    %c0_i32_0 = arith.constant 0 : i32
    return %arg0, %c0_i32 : i32, i32
  }
  func.func @transform_1(%arg0: i32) -> (i32, i32) {
    %c0_i32 = arith.constant 0 : i32
    %c0_i32_0 = arith.constant 0 : i32
    %c0_i32_1 = arith.constant 0 : i32
    return %c0_i32, %c0_i32_0 : i32, i32
  }
  func.func @transform_2(%arg0: i32) -> (i32, i32) {
    %c0_i32 = arith.constant 0 : i32
    %c0_i32_0 = arith.constant 0 : i32
    %c0_i32_1 = arith.constant 0 : i32
    return %c0_i32, %c0_i32_0 : i32, i32
  }
  func.func @transform_3(%arg0: i32) -> (i32, i32) {
    %c0_i32 = arith.constant 0 : i32
    %c0_i32_0 = arith.constant 0 : i32
    %c0_i32_1 = arith.constant 0 : i32
    return %c0_i32, %c0_i32_0 : i32, i32
  }
  func.func @transform_4(%arg0: i32) -> (i32, i32) {
    %c0_i32 = arith.constant 0 : i32
    %c0_i32_0 = arith.constant 0 : i32
    %c0_i32_1 = arith.constant 0 : i32
    return %c0_i32, %c0_i32_0 : i32, i32
  }
  func.func @transform_5(%arg0: i32) -> (i32, i32) {
    %c0_i32 = arith.constant 0 : i32
    %c0_i32_0 = arith.constant 0 : i32
    return %arg0, %c0_i32 : i32, i32
  }
}

module attributes {stable_mosaic.version = 11 : i64} {
  func.func @_mha_kernel(%arg0: i32, %arg1: memref<1x8x96xf32, #tpu.memory_space<vmem>>, %arg2: memref<1x1x8xf32, #tpu.memory_space<vmem>>, %arg3: memref<32x32xf32, #tpu.memory_space<vmem>>, %arg4: memref<1x32xf32, #tpu.memory_space<vmem>>, %arg5: memref<1x8x32xf32, #tpu.memory_space<vmem>>, %arg6: memref<1x8x32xf32, #tpu.memory_space<vmem>>) attributes {dimension_semantics = [#tpu.dimension_semantics<parallel>], iteration_bounds = array<i64: 2>, scalar_prefetch = 0 : i64, scratch_operands = 0 : i64, tpu.core_type = #tpu.core_type<tc>, window_params = [{transform_indices = @transform_0, window_bounds = array<i64: 1, 8, 96>}, {transform_indices = @transform_1, window_bounds = array<i64: 1, 1, 8>}, {pipeline_mode = #tpu.pipeline_mode<synchronous>, transform_indices = @transform_2, window_bounds = array<i64: 32, 32>}, {pipeline_mode = #tpu.pipeline_mode<synchronous>, transform_indices = @transform_3, window_bounds = array<i64: 1, 32>}, {transform_indices = @transform_4, window_bounds = array<i64: 1, 8, 32>}, {transform_indices = @transform_5, window_bounds = array<i64: 1, 8, 32>}]} {
    %c0 = arith.constant 0 : index
    %c0_0 = arith.constant 0 : index
    %c0_1 = arith.constant 0 : index
    %0 = vector.load %arg1[%c0, %c0_0, %c0_1] : memref<1x8x96xf32, #tpu.memory_space<vmem>>, vector<1x8x96xf32>
    %1 = vector.shape_cast %0 : vector<1x8x96xf32> to vector<8x96xf32>
    %c0_2 = arith.constant 0 : index
    %c0_3 = arith.constant 0 : index
    %c0_4 = arith.constant 0 : index
    %2 = vector.load %arg2[%c0_2, %c0_3, %c0_4] : memref<1x1x8xf32, #tpu.memory_space<vmem>>, vector<1x1x8xf32>
    %3 = vector.shape_cast %2 : vector<1x1x8xf32> to vector<1x8xf32>
    %4 = vector.extract_strided_slice %1 {offsets = [0, 0], sizes = [8, 8], strides = [1, 1]} : vector<8x96xf32> to vector<8x8xf32>
    %cst = arith.constant 0.353553385 : f32
    %5 = vector.broadcast %cst : f32 to vector<8x8xf32>
    %6 = arith.mulf %4, %5 : vector<8x8xf32>
    %7 = vector.extract_strided_slice %1 {offsets = [0, 32], sizes = [8, 8], strides = [1, 1]} : vector<8x96xf32> to vector<8x8xf32>
    %8 = vector.extract_strided_slice %1 {offsets = [0, 64], sizes = [8, 8], strides = [1, 1]} : vector<8x96xf32> to vector<8x8xf32>
    %cst_5 = arith.constant dense<0.000000e+00> : vector<8x8xf32>
    %9 = tpu.matmul %6, %7, %cst_5 {dimension_numbers = #tpu.dot_dimension_numbers<[1], [1], [0], [0], [0, 0, 1, 0], [], []>} : vector<8x8xf32>, vector<8x8xf32>, vector<8x8xf32> -> vector<8x8xf32>
    %10 = vector.broadcast %3 : vector<1x8xf32> to vector<8x8xf32>
    %11 = arith.addf %9, %10 : vector<8x8xf32>
    %cst_6 = arith.constant dense<0xFF800000> : vector<8xf32>
    %12 = vector.multi_reduction <maximumf>, %11, %cst_6 [1] : vector<8x8xf32> to vector<8xf32>
    %13 = vector.shape_cast %12 : vector<8xf32> to vector<8x1xf32>
    %14 = vector.broadcast %13 : vector<8x1xf32> to vector<8x8xf32>
    %15 = arith.subf %11, %14 : vector<8x8xf32>
    %16 = math.exp %15 : vector<8x8xf32>
    %cst_7 = arith.constant dense<0.000000e+00> : vector<8xf32>
    %17 = vector.multi_reduction <add>, %16, %cst_7 [1] : vector<8x8xf32> to vector<8xf32>
    %18 = vector.shape_cast %17 : vector<8xf32> to vector<8x1xf32>
    %19 = tpu.reciprocal %18 {approx = true} : vector<8x1xf32> -> vector<8x1xf32>
    %20 = vector.broadcast %19 : vector<8x1xf32> to vector<8x8xf32>
    %21 = arith.mulf %16, %20 : vector<8x8xf32>
    %cst_8 = arith.constant dense<0.000000e+00> : vector<8x8xf32>
    %22 = tpu.matmul %21, %8, %cst_8 {dimension_numbers = #tpu.dot_dimension_numbers<[1], [0], [0], [1], [0, 0, 1, 1], [], []>} : vector<8x8xf32>, vector<8x8xf32>, vector<8x8xf32> -> vector<8x8xf32>
    %23 = vector.extract_strided_slice %1 {offsets = [0, 8], sizes = [8, 8], strides = [1, 1]} : vector<8x96xf32> to vector<8x8xf32>
    %cst_9 = arith.constant 0.353553385 : f32
    %24 = vector.broadcast %cst_9 : f32 to vector<8x8xf32>
    %25 = arith.mulf %23, %24 : vector<8x8xf32>
    %26 = vector.extract_strided_slice %1 {offsets = [0, 40], sizes = [8, 8], strides = [1, 1]} : vector<8x96xf32> to vector<8x8xf32>
    %27 = vector.extract_strided_slice %1 {offsets = [0, 72], sizes = [8, 8], strides = [1, 1]} : vector<8x96xf32> to vector<8x8xf32>
    %cst_10 = arith.constant dense<0.000000e+00> : vector<8x8xf32>
    %28 = tpu.matmul %25, %26, %cst_10 {dimension_numbers = #tpu.dot_dimension_numbers<[1], [1], [0], [0], [0, 0, 1, 0], [], []>} : vector<8x8xf32>, vector<8x8xf32>, vector<8x8xf32> -> vector<8x8xf32>
    %29 = vector.broadcast %3 : vector<1x8xf32> to vector<8x8xf32>
    %30 = arith.addf %28, %29 : vector<8x8xf32>
    %cst_11 = arith.constant dense<0xFF800000> : vector<8xf32>
    %31 = vector.multi_reduction <maximumf>, %30, %cst_11 [1] : vector<8x8xf32> to vector<8xf32>
    %32 = vector.shape_cast %31 : vector<8xf32> to vector<8x1xf32>
    %33 = vector.broadcast %32 : vector<8x1xf32> to vector<8x8xf32>
    %34 = arith.subf %30, %33 : vector<8x8xf32>
    %35 = math.exp %34 : vector<8x8xf32>
    %cst_12 = arith.constant dense<0.000000e+00> : vector<8xf32>
    %36 = vector.multi_reduction <add>, %35, %cst_12 [1] : vector<8x8xf32> to vector<8xf32>
    %37 = vector.shape_cast %36 : vector<8xf32> to vector<8x1xf32>
    %38 = tpu.reciprocal %37 {approx = true} : vector<8x1xf32> -> vector<8x1xf32>
    %39 = vector.broadcast %38 : vector<8x1xf32> to vector<8x8xf32>
    %40 = arith.mulf %35, %39 : vector<8x8xf32>
    %cst_13 = arith.constant dense<0.000000e+00> : vector<8x8xf32>
    %41 = tpu.matmul %40, %27, %cst_13 {dimension_numbers = #tpu.dot_dimension_numbers<[1], [0], [0], [1], [0, 0, 1, 1], [], []>} : vector<8x8xf32>, vector<8x8xf32>, vector<8x8xf32> -> vector<8x8xf32>
    %42 = vector.extract_strided_slice %1 {offsets = [0, 16], sizes = [8, 8], strides = [1, 1]} : vector<8x96xf32> to vector<8x8xf32>
    %cst_14 = arith.constant 0.353553385 : f32
    %43 = vector.broadcast %cst_14 : f32 to vector<8x8xf32>
    %44 = arith.mulf %42, %43 : vector<8x8xf32>
    %45 = vector.extract_strided_slice %1 {offsets = [0, 48], sizes = [8, 8], strides = [1, 1]} : vector<8x96xf32> to vector<8x8xf32>
    %46 = vector.extract_strided_slice %1 {offsets = [0, 80], sizes = [8, 8], strides = [1, 1]} : vector<8x96xf32> to vector<8x8xf32>
    %cst_15 = arith.constant dense<0.000000e+00> : vector<8x8xf32>
    %47 = tpu.matmul %44, %45, %cst_15 {dimension_numbers = #tpu.dot_dimension_numbers<[1], [1], [0], [0], [0, 0, 1, 0], [], []>} : vector<8x8xf32>, vector<8x8xf32>, vector<8x8xf32> -> vector<8x8xf32>
    %48 = vector.broadcast %3 : vector<1x8xf32> to vector<8x8xf32>
    %49 = arith.addf %47, %48 : vector<8x8xf32>
    %cst_16 = arith.constant dense<0xFF800000> : vector<8xf32>
    %50 = vector.multi_reduction <maximumf>, %49, %cst_16 [1] : vector<8x8xf32> to vector<8xf32>
    %51 = vector.shape_cast %50 : vector<8xf32> to vector<8x1xf32>
    %52 = vector.broadcast %51 : vector<8x1xf32> to vector<8x8xf32>
    %53 = arith.subf %49, %52 : vector<8x8xf32>
    %54 = math.exp %53 : vector<8x8xf32>
    %cst_17 = arith.constant dense<0.000000e+00> : vector<8xf32>
    %55 = vector.multi_reduction <add>, %54, %cst_17 [1] : vector<8x8xf32> to vector<8xf32>
    %56 = vector.shape_cast %55 : vector<8xf32> to vector<8x1xf32>
    %57 = tpu.reciprocal %56 {approx = true} : vector<8x1xf32> -> vector<8x1xf32>
    %58 = vector.broadcast %57 : vector<8x1xf32> to vector<8x8xf32>
    %59 = arith.mulf %54, %58 : vector<8x8xf32>
    %cst_18 = arith.constant dense<0.000000e+00> : vector<8x8xf32>
    %60 = tpu.matmul %59, %46, %cst_18 {dimension_numbers = #tpu.dot_dimension_numbers<[1], [0], [0], [1], [0, 0, 1, 1], [], []>} : vector<8x8xf32>, vector<8x8xf32>, vector<8x8xf32> -> vector<8x8xf32>
    %61 = vector.extract_strided_slice %1 {offsets = [0, 24], sizes = [8, 8], strides = [1, 1]} : vector<8x96xf32> to vector<8x8xf32>
    %cst_19 = arith.constant 0.353553385 : f32
    %62 = vector.broadcast %cst_19 : f32 to vector<8x8xf32>
    %63 = arith.mulf %61, %62 : vector<8x8xf32>
    %64 = vector.extract_strided_slice %1 {offsets = [0, 56], sizes = [8, 8], strides = [1, 1]} : vector<8x96xf32> to vector<8x8xf32>
    %65 = vector.extract_strided_slice %1 {offsets = [0, 88], sizes = [8, 8], strides = [1, 1]} : vector<8x96xf32> to vector<8x8xf32>
    %cst_20 = arith.constant dense<0.000000e+00> : vector<8x8xf32>
    %66 = tpu.matmul %63, %64, %cst_20 {dimension_numbers = #tpu.dot_dimension_numbers<[1], [1], [0], [0], [0, 0, 1, 0], [], []>} : vector<8x8xf32>, vector<8x8xf32>, vector<8x8xf32> -> vector<8x8xf32>
    %67 = vector.broadcast %3 : vector<1x8xf32> to vector<8x8xf32>
    %68 = arith.addf %66, %67 : vector<8x8xf32>
    %cst_21 = arith.constant dense<0xFF800000> : vector<8xf32>
    %69 = vector.multi_reduction <maximumf>, %68, %cst_21 [1] : vector<8x8xf32> to vector<8xf32>
    %70 = vector.shape_cast %69 : vector<8xf32> to vector<8x1xf32>
    %71 = vector.broadcast %70 : vector<8x1xf32> to vector<8x8xf32>
    %72 = arith.subf %68, %71 : vector<8x8xf32>
    %73 = math.exp %72 : vector<8x8xf32>
    %cst_22 = arith.constant dense<0.000000e+00> : vector<8xf32>
    %74 = vector.multi_reduction <add>, %73, %cst_22 [1] : vector<8x8xf32> to vector<8xf32>
    %75 = vector.shape_cast %74 : vector<8xf32> to vector<8x1xf32>
    %76 = tpu.reciprocal %75 {approx = true} : vector<8x1xf32> -> vector<8x1xf32>
    %77 = vector.broadcast %76 : vector<8x1xf32> to vector<8x8xf32>
    %78 = arith.mulf %73, %77 : vector<8x8xf32>
    %cst_23 = arith.constant dense<0.000000e+00> : vector<8x8xf32>
    %79 = tpu.matmul %78, %65, %cst_23 {dimension_numbers = #tpu.dot_dimension_numbers<[1], [0], [0], [1], [0, 0, 1, 1], [], []>} : vector<8x8xf32>, vector<8x8xf32>, vector<8x8xf32> -> vector<8x8xf32>
    %80 = tpu.concatenate %22, %41, %60, %79 in 1 : vector<8x8xf32>, vector<8x8xf32>, vector<8x8xf32>, vector<8x8xf32> -> vector<8x32xf32>
    %c0_24 = arith.constant 0 : index
    %c0_25 = arith.constant 0 : index
    %c0_26 = arith.constant 0 : index
    %81 = vector.load %arg5[%c0_24, %c0_25, %c0_26] : memref<1x8x32xf32, #tpu.memory_space<vmem>>, vector<1x8x32xf32>
    %82 = vector.shape_cast %81 : vector<1x8x32xf32> to vector<8x32xf32>
    %c0_27 = arith.constant 0 : index
    %c0_28 = arith.constant 0 : index
    %83 = vector.load %arg3[%c0_27, %c0_28] : memref<32x32xf32, #tpu.memory_space<vmem>>, vector<32x32xf32>
    %cst_29 = arith.constant dense<0.000000e+00> : vector<8x32xf32>
    %84 = tpu.matmul %80, %83, %cst_29 {dimension_numbers = #tpu.dot_dimension_numbers<[1], [0], [0], [1], [0, 0, 1, 1], [], []>} : vector<8x32xf32>, vector<32x32xf32>, vector<8x32xf32> -> vector<8x32xf32>
    %85 = arith.addf %82, %84 : vector<8x32xf32>
    %c0_30 = arith.constant 0 : index
    %c0_31 = arith.constant 0 : index
    %86 = vector.load %arg4[%c0_30, %c0_31] : memref<1x32xf32, #tpu.memory_space<vmem>>, vector<1x32xf32>
    %87 = vector.broadcast %86 : vector<1x32xf32> to vector<8x32xf32>
    %88 = arith.addf %85, %87 : vector<8x32xf32>
    %c0_32 = arith.constant 0 : index
    %c0_33 = arith.constant 0 : index
    %c0_34 = arith.constant 0 : index
    %89 = vector.load %arg6[%c0_32, %c0_33, %c0_34] : memref<1x8x32xf32, #tpu.memory_space<vmem>>, vector<1x8x32xf32>
    %90 = vector.shape_cast %89 : vector<1x8x32xf32> to vector<8x32xf32>
    %91 = vector.shape_cast %88 : vector<8x32xf32> to vector<1x8x32xf32>
    tpu.vector_store %arg6[%c0_32, %c0_33, %c0_34], %91 {strides = array<i32>} : memref<1x8x32xf32, #tpu.memory_space<vmem>>, vector<1x8x32xf32>,
    return
  }
  func.func @transform_0(%arg0: i32) -> (i32, i32, i32) {
    %c0_i32 = arith.constant 0 : i32
    %c0_i32_0 = arith.constant 0 : i32
    %c0_i32_1 = arith.constant 0 : i32
    return %arg0, %c0_i32, %c0_i32_0 : i32, i32, i32
  }
  func.func @transform_1(%arg0: i32) -> (i32, i32, i32) {
    %c0_i32 = arith.constant 0 : i32
    %c0_i32_0 = arith.constant 0 : i32
    %c0_i32_1 = arith.constant 0 : i32
    return %arg0, %c0_i32, %c0_i32_0 : i32, i32, i32
  }
  func.func @transform_2(%arg0: i32) -> (i32, i32) {
    %c0_i32 = arith.constant 0 : i32
    %c0_i32_0 = arith.constant 0 : i32
    %c0_i32_1 = arith.constant 0 : i32
    return %c0_i32, %c0_i32_0 : i32, i32
  }
  func.func @transform_3(%arg0: i32) -> (i32, i32) {
    %c0_i32 = arith.constant 0 : i32
    %c0_i32_0 = arith.constant 0 : i32
    %c0_i32_1 = arith.constant 0 : i32
    return %c0_i32, %c0_i32_0 : i32, i32
  }
  func.func @transform_4(%arg0: i32) -> (i32, i32, i32) {
    %c0_i32 = arith.constant 0 : i32
    %c0_i32_0 = arith.constant 0 : i32
    %c0_i32_1 = arith.constant 0 : i32
    return %arg0, %c0_i32, %c0_i32_0 : i32, i32, i32
  }
  func.func @transform_5(%arg0: i32) -> (i32, i32, i32) {
    %c0_i32 = arith.constant 0 : i32
    %c0_i32_0 = arith.constant 0 : i32
    %c0_i32_1 = arith.constant 0 : i32
    return %arg0, %c0_i32, %c0_i32_0 : i32, i32, i32
  }
}

module attributes {stable_mosaic.version = 11 : i64} {
  func.func @_ln_kernel(%arg0: i32, %arg1: memref<16x32xf32, #tpu.memory_space<vmem>>, %arg2: memref<1x32xf32, #tpu.memory_space<vmem>>, %arg3: memref<1x32xf32, #tpu.memory_space<vmem>>, %arg4: memref<16x32xf32, #tpu.memory_space<vmem>>) attributes {dimension_semantics = [#tpu.dimension_semantics<parallel>], iteration_bounds = array<i64: 1>, scalar_prefetch = 0 : i64, scratch_operands = 0 : i64, tpu.core_type = #tpu.core_type<tc>, window_params = [{transform_indices = @transform_0, window_bounds = array<i64: 16, 32>}, {pipeline_mode = #tpu.pipeline_mode<synchronous>, transform_indices = @transform_1, window_bounds = array<i64: 1, 32>}, {pipeline_mode = #tpu.pipeline_mode<synchronous>, transform_indices = @transform_2, window_bounds = array<i64: 1, 32>}, {transform_indices = @transform_3, window_bounds = array<i64: 16, 32>}]} {
    %c0 = arith.constant 0 : index
    %c0_0 = arith.constant 0 : index
    %0 = vector.load %arg1[%c0, %c0_0] : memref<16x32xf32, #tpu.memory_space<vmem>>, vector<16x32xf32>
    %c0_1 = arith.constant 0 : index
    %c0_2 = arith.constant 0 : index
    %1 = vector.load %arg2[%c0_1, %c0_2] : memref<1x32xf32, #tpu.memory_space<vmem>>, vector<1x32xf32>
    %c0_3 = arith.constant 0 : index
    %c0_4 = arith.constant 0 : index
    %2 = vector.load %arg3[%c0_3, %c0_4] : memref<1x32xf32, #tpu.memory_space<vmem>>, vector<1x32xf32>
    %cst = arith.constant dense<0.000000e+00> : vector<16xf32>
    %3 = vector.multi_reduction <add>, %0, %cst [1] : vector<16x32xf32> to vector<16xf32>
    %4 = vector.shape_cast %3 : vector<16xf32> to vector<16x1xf32>
    %cst_5 = arith.constant 3.200000e+01 : f32
    %5 = vector.broadcast %cst_5 : f32 to vector<16x1xf32>
    %6 = arith.divf %4, %5 : vector<16x1xf32>
    %7 = vector.broadcast %6 : vector<16x1xf32> to vector<16x32xf32>
    %8 = arith.subf %0, %7 : vector<16x32xf32>
    %9 = arith.mulf %8, %8 : vector<16x32xf32>
    %cst_6 = arith.constant dense<0.000000e+00> : vector<16xf32>
    %10 = vector.multi_reduction <add>, %9, %cst_6 [1] : vector<16x32xf32> to vector<16xf32>
    %11 = vector.shape_cast %10 : vector<16xf32> to vector<16x1xf32>
    %cst_7 = arith.constant 3.200000e+01 : f32
    %12 = vector.broadcast %cst_7 : f32 to vector<16x1xf32>
    %13 = arith.divf %11, %12 : vector<16x1xf32>
    %cst_8 = arith.constant 9.99999996E-13 : f32
    %14 = vector.broadcast %cst_8 : f32 to vector<16x1xf32>
    %15 = arith.addf %13, %14 : vector<16x1xf32>
    %16 = math.rsqrt %15 : vector<16x1xf32>
    %17 = vector.broadcast %16 : vector<16x1xf32> to vector<16x32xf32>
    %18 = arith.mulf %8, %17 : vector<16x32xf32>
    %19 = vector.broadcast %1 : vector<1x32xf32> to vector<16x32xf32>
    %20 = arith.mulf %18, %19 : vector<16x32xf32>
    %21 = vector.broadcast %2 : vector<1x32xf32> to vector<16x32xf32>
    %22 = arith.addf %20, %21 : vector<16x32xf32>
    %c0_9 = arith.constant 0 : index
    %c0_10 = arith.constant 0 : index
    %23 = vector.load %arg4[%c0_9, %c0_10] : memref<16x32xf32, #tpu.memory_space<vmem>>, vector<16x32xf32>
    tpu.vector_store %arg4[%c0_9, %c0_10], %22 {strides = array<i32>} : memref<16x32xf32, #tpu.memory_space<vmem>>, vector<16x32xf32>,
    return
  }
  func.func @transform_0(%arg0: i32) -> (i32, i32) {
    %c0_i32 = arith.constant 0 : i32
    %c0_i32_0 = arith.constant 0 : i32
    return %arg0, %c0_i32 : i32, i32
  }
  func.func @transform_1(%arg0: i32) -> (i32, i32) {
    %c0_i32 = arith.constant 0 : i32
    %c0_i32_0 = arith.constant 0 : i32
    %c0_i32_1 = arith.constant 0 : i32
    return %c0_i32, %c0_i32_0 : i32, i32
  }
  func.func @transform_2(%arg0: i32) -> (i32, i32) {
    %c0_i32 = arith.constant 0 : i32
    %c0_i32_0 = arith.constant 0 : i32
    %c0_i32_1 = arith.constant 0 : i32
    return %c0_i32, %c0_i32_0 : i32, i32
  }
  func.func @transform_3(%arg0: i32) -> (i32, i32) {
    %c0_i32 = arith.constant 0 : i32
    %c0_i32_0 = arith.constant 0 : i32
    return %arg0, %c0_i32 : i32, i32
  }
}

module attributes {stable_mosaic.version = 11 : i64} {
  func.func @_ffn_kernel(%arg0: i32, %arg1: memref<16x32xf32, #tpu.memory_space<vmem>>, %arg2: memref<1x32xf32, #tpu.memory_space<vmem>>, %arg3: memref<1x32xf32, #tpu.memory_space<vmem>>, %arg4: memref<32x64xf32, #tpu.memory_space<vmem>>, %arg5: memref<1x64xf32, #tpu.memory_space<vmem>>, %arg6: memref<64x32xf32, #tpu.memory_space<vmem>>, %arg7: memref<1x32xf32, #tpu.memory_space<vmem>>, %arg8: memref<16x32xf32, #tpu.memory_space<vmem>>) attributes {dimension_semantics = [#tpu.dimension_semantics<parallel>], iteration_bounds = array<i64: 1>, scalar_prefetch = 0 : i64, scratch_operands = 0 : i64, tpu.core_type = #tpu.core_type<tc>, window_params = [{transform_indices = @transform_0, window_bounds = array<i64: 16, 32>}, {pipeline_mode = #tpu.pipeline_mode<synchronous>, transform_indices = @transform_1, window_bounds = array<i64: 1, 32>}, {pipeline_mode = #tpu.pipeline_mode<synchronous>, transform_indices = @transform_2, window_bounds = array<i64: 1, 32>}, {pipeline_mode = #tpu.pipeline_mode<synchronous>, transform_indices = @transform_3, window_bounds = array<i64: 32, 64>}, {pipeline_mode = #tpu.pipeline_mode<synchronous>, transform_indices = @transform_4, window_bounds = array<i64: 1, 64>}, {pipeline_mode = #tpu.pipeline_mode<synchronous>, transform_indices = @transform_5, window_bounds = array<i64: 64, 32>}, {pipeline_mode = #tpu.pipeline_mode<synchronous>, transform_indices = @transform_6, window_bounds = array<i64: 1, 32>}, {transform_indices = @transform_7, window_bounds = array<i64: 16, 32>}]} {
    %c0 = arith.constant 0 : index
    %c0_0 = arith.constant 0 : index
    %0 = vector.load %arg1[%c0, %c0_0] : memref<16x32xf32, #tpu.memory_space<vmem>>, vector<16x32xf32>
    %c0_1 = arith.constant 0 : index
    %c0_2 = arith.constant 0 : index
    %1 = vector.load %arg2[%c0_1, %c0_2] : memref<1x32xf32, #tpu.memory_space<vmem>>, vector<1x32xf32>
    %c0_3 = arith.constant 0 : index
    %c0_4 = arith.constant 0 : index
    %2 = vector.load %arg3[%c0_3, %c0_4] : memref<1x32xf32, #tpu.memory_space<vmem>>, vector<1x32xf32>
    %cst = arith.constant dense<0.000000e+00> : vector<16xf32>
    %3 = vector.multi_reduction <add>, %0, %cst [1] : vector<16x32xf32> to vector<16xf32>
    %4 = vector.shape_cast %3 : vector<16xf32> to vector<16x1xf32>
    %cst_5 = arith.constant 3.200000e+01 : f32
    %5 = vector.broadcast %cst_5 : f32 to vector<16x1xf32>
    %6 = arith.divf %4, %5 : vector<16x1xf32>
    %7 = vector.broadcast %6 : vector<16x1xf32> to vector<16x32xf32>
    %8 = arith.subf %0, %7 : vector<16x32xf32>
    %9 = arith.mulf %8, %8 : vector<16x32xf32>
    %cst_6 = arith.constant dense<0.000000e+00> : vector<16xf32>
    %10 = vector.multi_reduction <add>, %9, %cst_6 [1] : vector<16x32xf32> to vector<16xf32>
    %11 = vector.shape_cast %10 : vector<16xf32> to vector<16x1xf32>
    %cst_7 = arith.constant 3.200000e+01 : f32
    %12 = vector.broadcast %cst_7 : f32 to vector<16x1xf32>
    %13 = arith.divf %11, %12 : vector<16x1xf32>
    %cst_8 = arith.constant 9.99999996E-13 : f32
    %14 = vector.broadcast %cst_8 : f32 to vector<16x1xf32>
    %15 = arith.addf %13, %14 : vector<16x1xf32>
    %16 = math.rsqrt %15 : vector<16x1xf32>
    %17 = vector.broadcast %16 : vector<16x1xf32> to vector<16x32xf32>
    %18 = arith.mulf %8, %17 : vector<16x32xf32>
    %19 = vector.broadcast %1 : vector<1x32xf32> to vector<16x32xf32>
    %20 = arith.mulf %18, %19 : vector<16x32xf32>
    %21 = vector.broadcast %2 : vector<1x32xf32> to vector<16x32xf32>
    %22 = arith.addf %20, %21 : vector<16x32xf32>
    %c0_9 = arith.constant 0 : index
    %c0_10 = arith.constant 0 : index
    %23 = vector.load %arg4[%c0_9, %c0_10] : memref<32x64xf32, #tpu.memory_space<vmem>>, vector<32x64xf32>
    %cst_11 = arith.constant dense<0.000000e+00> : vector<16x64xf32>
    %24 = tpu.matmul %22, %23, %cst_11 {dimension_numbers = #tpu.dot_dimension_numbers<[1], [0], [0], [1], [0, 0, 1, 1], [], []>} : vector<16x32xf32>, vector<32x64xf32>, vector<16x64xf32> -> vector<16x64xf32>
    %c0_12 = arith.constant 0 : index
    %c0_13 = arith.constant 0 : index
    %25 = vector.load %arg5[%c0_12, %c0_13] : memref<1x64xf32, #tpu.memory_space<vmem>>, vector<1x64xf32>
    %26 = vector.broadcast %25 : vector<1x64xf32> to vector<16x64xf32>
    %27 = arith.addf %24, %26 : vector<16x64xf32>
    %cst_14 = arith.constant 0.000000e+00 : f32
    %28 = vector.broadcast %cst_14 : f32 to vector<16x64xf32>
    %29 = arith.maximumf %27, %28 : vector<16x64xf32>
    %c0_15 = arith.constant 0 : index
    %c0_16 = arith.constant 0 : index
    %30 = vector.load %arg6[%c0_15, %c0_16] : memref<64x32xf32, #tpu.memory_space<vmem>>, vector<64x32xf32>
    %cst_17 = arith.constant dense<0.000000e+00> : vector<16x32xf32>
    %31 = tpu.matmul %29, %30, %cst_17 {dimension_numbers = #tpu.dot_dimension_numbers<[1], [0], [0], [1], [0, 0, 1, 1], [], []>} : vector<16x64xf32>, vector<64x32xf32>, vector<16x32xf32> -> vector<16x32xf32>
    %32 = arith.addf %0, %31 : vector<16x32xf32>
    %c0_18 = arith.constant 0 : index
    %c0_19 = arith.constant 0 : index
    %33 = vector.load %arg7[%c0_18, %c0_19] : memref<1x32xf32, #tpu.memory_space<vmem>>, vector<1x32xf32>
    %34 = vector.broadcast %33 : vector<1x32xf32> to vector<16x32xf32>
    %35 = arith.addf %32, %34 : vector<16x32xf32>
    %c0_20 = arith.constant 0 : index
    %c0_21 = arith.constant 0 : index
    %36 = vector.load %arg8[%c0_20, %c0_21] : memref<16x32xf32, #tpu.memory_space<vmem>>, vector<16x32xf32>
    tpu.vector_store %arg8[%c0_20, %c0_21], %35 {strides = array<i32>} : memref<16x32xf32, #tpu.memory_space<vmem>>, vector<16x32xf32>,
    return
  }
  func.func @transform_0(%arg0: i32) -> (i32, i32) {
    %c0_i32 = arith.constant 0 : i32
    %c0_i32_0 = arith.constant 0 : i32
    return %arg0, %c0_i32 : i32, i32
  }
  func.func @transform_1(%arg0: i32) -> (i32, i32) {
    %c0_i32 = arith.constant 0 : i32
    %c0_i32_0 = arith.constant 0 : i32
    %c0_i32_1 = arith.constant 0 : i32
    return %c0_i32, %c0_i32_0 : i32, i32
  }
  func.func @transform_2(%arg0: i32) -> (i32, i32) {
    %c0_i32 = arith.constant 0 : i32
    %c0_i32_0 = arith.constant 0 : i32
    %c0_i32_1 = arith.constant 0 : i32
    return %c0_i32, %c0_i32_0 : i32, i32
  }
  func.func @transform_3(%arg0: i32) -> (i32, i32) {
    %c0_i32 = arith.constant 0 : i32
    %c0_i32_0 = arith.constant 0 : i32
    %c0_i32_1 = arith.constant 0 : i32
    return %c0_i32, %c0_i32_0 : i32, i32
  }
  func.func @transform_4(%arg0: i32) -> (i32, i32) {
    %c0_i32 = arith.constant 0 : i32
    %c0_i32_0 = arith.constant 0 : i32
    %c0_i32_1 = arith.constant 0 : i32
    return %c0_i32, %c0_i32_0 : i32, i32
  }
  func.func @transform_5(%arg0: i32) -> (i32, i32) {
    %c0_i32 = arith.constant 0 : i32
    %c0_i32_0 = arith.constant 0 : i32
    %c0_i32_1 = arith.constant 0 : i32
    return %c0_i32, %c0_i32_0 : i32, i32
  }
  func.func @transform_6(%arg0: i32) -> (i32, i32) {
    %c0_i32 = arith.constant 0 : i32
    %c0_i32_0 = arith.constant 0 : i32
    %c0_i32_1 = arith.constant 0 : i32
    return %c0_i32, %c0_i32_0 : i32, i32
  }
  func.func @transform_7(%arg0: i32) -> (i32, i32) {
    %c0_i32 = arith.constant 0 : i32
    %c0_i32_0 = arith.constant 0 : i32
    return %arg0, %c0_i32 : i32, i32
  }
}

</mosaic_0001>

<bundles_post_ra>
// kernel: transformer_encoder_forward.10
= control target key start
LH: loop header
LB: loop body
LE: loop exit
PB: predicated region body
PF: predicated region fallthrough
CT: control target
= control target key end

     0   :  { %s839_s12 = smov 0   ;;  %s1038_s0 = inlined_call_operand.vmem [shape: f32[1280,9], index: 0, kind: input, shape index: {}]   ;;  %s1039_s1 = inlined_call_operand.vmem [shape: f32[9,32], index: 1, kind: input, shape index: {}]   ;;  %s1040_s2 = inlined_call_operand.vmem [shape: f32[1,32], index: 2, kind: input, shape index: {}]   ;;  %s1041_s3 = inlined_call_operand.vmem [shape: f32[1280,32], index: 3, kind: output, shape index: {}]  }
   0x1 LB: > { %s662_s13 = sadd.s32 4294967295, %s816_s12   ;;  %p666_p0 = scmp.ge.s32.totalorder %s816_s12, 1  ;;  %s816_s12 = sphi %s839_s12, %s13_s12  }
   0x2   : > { %p138_p1 = scmp.lt.s32.totalorder %s816_s12, 6 }
   0x4   : > { %p139_p2 = pnand %p666_p0, %p138_p1 }
   0x5   : > { %v206_v0 = vld [vmem:[%s1039_s1] sm:$0xff] (!%p139_p2)  ;;  %v207_v1 = vld [vmem:[%s1039_s1 + $0x8] sm:$0x1] (!%p139_p2)  ;;  %vm312_vm0 = vcmask (!%p139_p2), 1040384   ;;  %s667_s18 = sshll.u32 (!%p139_p2), %s662_s13, 5  ;;  %vm818_vm1 = vmmov (!%p139_p2), 1  }
   0x6   : > { %142 = sbr.rel (%p139_p2) target bundleno = 265 (0x109), region = 32  ;;  %v793_v2 = vpack.c.bf16 (!%p139_p2), %v207_v1, %v206_v0  ;;  %vm794_vm2 = vmpackc.low (!%p139_p2), %vm312_vm0, %vm818_vm1  ;;  %p163_p3 = scmp.lt.s32.totalorder (!%p139_p2), %s667_s18, 159  ;;  %vm215_vm3 = vcmask (!%p139_p2), 72704   ;;  %v930_v35 = vld [vmem:[%s1040_s2] ss:$0 sm:$0xff] (!%p139_p2)  ;;  %vm573_vm4 = vcmask (!%p139_p2), 261120  }
   0x8   : > { %795 = vmatprep.subr.msk.bf16.mxu0 (!%p139_p2), %vm794_vm2, %v793_v2  ;;  %799 = vmatprep.subr.msk.bf16.mxu1 (!%p139_p2), %vm794_vm2, %v793_v2 }
   0x9   : > { %798 = vmatpush3.bf16.msk.msra.mxu0 (!%p139_p2), %vm794_vm2, %v793_v2  ;;  %800 = vmatpush3.bf16.msk.msra.mxu1 (!%p139_p2), %vm794_vm2, %v793_v2 }
   0xd   : > { %s1043_s18 = smov (!%p163_p3, %s667_s18), 159 }
   0xe   : > { %s668_s19 = sshll.u32 %s1043_s18, 3 }
   0xf   : > { %s861_s22 = scalar_lea.vmem %s1038_s0, %s668_s19  ;;  %s939_s27 = scalar_lea.vmem %s1041_s3, %s668_s19 }
  0x10   : > { %v174_v3 = vld [vmem:[%s861_s22] sm:$0xff]  ;;  %v175_v5 = vld [vmem:[%s861_s22 + $0x8] sm:$0xff]  ;;  %v176_v7 = vld [vmem:[%s861_s22 + $0x10] sm:$0xff] }
  0x11   : > { %v190_v4 = vld [vmem:[%s861_s22 + $0x80] sm:$0xff]  ;;  %745 = vmatprep.mubr.msk.f32.mxu0 %vm215_vm3, %v174_v3  ;;  %v191_v6 = vld [vmem:[%s861_s22 + $0x88] sm:$0xff]  ;;  %v192_v8 = vld [vmem:[%s861_s22 + $0x90] sm:$0xff] }
  0x12   : > { %769 = vmatprep.mubr.msk.f32.mxu1 %vm215_vm3, %v190_v4  ;;  %746 = vmatmul.mubr.msk.f32.vlgmr.msra.gmra.mrb[0].mxu0 %vm215_vm3, %v175_v5  ;;  %v177_v9 = vld [vmem:[%s861_s22 + $0x18] sm:$0xff]  ;;  %v178_v11 = vld [vmem:[%s861_s22 + $0x20] sm:$0xff]  ;;  %v179_v13 = vld [vmem:[%s861_s22 + $0x28] sm:$0xff] }
  0x13   : > { %770 = vmatmul.mubr.msk.f32.vlgmr.msra.gmra.mrb[0].mxu1 %vm215_vm3, %v191_v6  ;;  %748 = vmatprep.mubr.msk.f32.mxu0 %vm215_vm3, %v176_v7  ;;  %v193_v10 = vld [vmem:[%s861_s22 + $0x98] sm:$0xff]  ;;  %v194_v12 = vld [vmem:[%s861_s22 + $0xa0] sm:$0xff]  ;;  %v195_v14 = vld [vmem:[%s861_s22 + $0xa8] sm:$0xff] }
  0x14   : > { %772 = vmatprep.mubr.msk.f32.mxu1 %vm215_vm3, %v192_v8  ;;  %v180_v15 = vld [vmem:[%s861_s22 + $0x30] sm:$0xff]  ;;  %v181_v17 = vld [vmem:[%s861_s22 + $0x38] sm:$0xff]  ;;  %v182_v19 = vld [vmem:[%s861_s22 + $0x40] sm:$0xff] }
  0x15   : > { %v196_v16 = vld [vmem:[%s861_s22 + $0xb0] sm:$0xff]  ;;  %v197_v18 = vld [vmem:[%s861_s22 + $0xb8] sm:$0xff]  ;;  %v198_v20 = vld [vmem:[%s861_s22 + $0xc0] sm:$0xff] }
  0x16   : > { %749 = vmatmul.mubr.msk.f32.gmra.mrb[2].mxu0 %vm215_vm3, %v177_v9  ;;  %v183_v21 = vld [vmem:[%s861_s22 + $0x48] sm:$0xff]  ;;  %v184_v23 = vld [vmem:[%s861_s22 + $0x50] sm:$0xff]  ;;  %v185_v25 = vld [vmem:[%s861_s22 + $0x58] sm:$0xff] }
  0x17   : > { %773 = vmatmul.mubr.msk.f32.gmra.mrb[2].mxu1 %vm215_vm3, %v193_v10  ;;  %751 = vmatprep.mubr.msk.f32.mxu0 %vm215_vm3, %v178_v11  ;;  %v199_v22 = vld [vmem:[%s861_s22 + $0xc8] sm:$0xff]  ;;  %v200_v24 = vld [vmem:[%s861_s22 + $0xd0] sm:$0xff]  ;;  %v201_v26 = vld [vmem:[%s861_s22 + $0xd8] sm:$0xff] }
  0x18   : > { %775 = vmatprep.mubr.msk.f32.mxu1 %vm215_vm3, %v194_v12  ;;  %v186_v27 = vld [vmem:[%s861_s22 + $0x60] sm:$0xff]  ;;  %v187_v29 = vld [vmem:[%s861_s22 + $0x68] sm:$0xff]  ;;  %v188_v31 = vld [vmem:[%s861_s22 + $0x70] sm:$0xff] }
  0x19   : > { %v202_v28 = vld [vmem:[%s861_s22 + $0xe0] sm:$0xff]  ;;  %v203_v30 = vld [vmem:[%s861_s22 + $0xe8] sm:$0xff]  ;;  %v204_v32 = vld [vmem:[%s861_s22 + $0xf0] sm:$0xff] }
  0x1a   : > { %752 = vmatmul.mubr.msk.f32.gmra.mrb[4].mxu0 %vm215_vm3, %v179_v13  ;;  %v189_v33 = vld [vmem:[%s861_s22 + $0x78] sm:$0xff] }
  0x1b   : > { %776 = vmatmul.mubr.msk.f32.gmra.mrb[4].mxu1 %vm215_vm3, %v195_v14  ;;  %754 = vmatprep.mubr.msk.f32.mxu0 %vm215_vm3, %v180_v15  ;;  %v205_v34 = vld [vmem:[%s861_s22 + $0xf8] sm:$0xff] }
  0x1c   : > { %778 = vmatprep.mubr.msk.f32.mxu1 %vm215_vm3, %v196_v16 }
  0x1e   : > { %755 = vmatmul.mubr.msk.f32.gmra.mrb[6].mxu0 %vm215_vm3, %v181_v17 }
  0x1f   : > { %779 = vmatmul.mubr.msk.f32.gmra.mrb[6].mxu1 %vm215_vm3, %v197_v18  ;;  %757 = vmatprep.mubr.msk.f32.mxu0 %vm215_vm3, %v182_v19 }
  0x20   : > { %781 = vmatprep.mubr.msk.f32.mxu1 %vm215_vm3, %v198_v20 }
  0x22   : > { %758 = vmatmul.mubr.msk.f32.gmra.mrb[8].mxu0 %vm215_vm3, %v183_v21 }
  0x23   : > { %782 = vmatmul.mubr.msk.f32.gmra.mrb[8].mxu1 %vm215_vm3, %v199_v22  ;;  %760 = vmatprep.mubr.msk.f32.mxu0 %vm215_vm3, %v184_v23 }
  0x24   : > { %784 = vmatprep.mubr.msk.f32.mxu1 %vm215_vm3, %v200_v24 }
  0x26   : > { %761 = vmatmul.mubr.msk.f32.gmra.mrb[10].mxu0 %vm215_vm3, %v185_v25 }
  0x27   : > { %785 = vmatmul.mubr.msk.f32.gmra.mrb[10].mxu1 %vm215_vm3, %v201_v26  ;;  %763 = vmatprep.mubr.msk.f32.mxu0 %vm215_vm3, %v186_v27 }
  0x28   : > { %787 = vmatprep.mubr.msk.f32.mxu1 %vm215_vm3, %v202_v28 }
  0x2a   : > { %764 = vmatmul.mubr.msk.f32.gmra.mrb[12].mxu0 %vm215_vm3, %v187_v29 }
  0x2b   : > { %788 = vmatmul.mubr.msk.f32.gmra.mrb[12].mxu1 %vm215_vm3, %v203_v30  ;;  %766 = vmatprep.mubr.msk.f32.mxu0 %vm215_vm3, %v188_v31 }
  0x2c   : > { %790 = vmatprep.mubr.msk.f32.mxu1 %vm215_vm3, %v204_v32 }
  0x2e   : > { %767 = vmatmul.mubr.msk.f32.gmra.mrb[14].mxu0 %vm215_vm3, %v189_v33 }
  0x2f   : > { %791 = vmatmul.mubr.msk.f32.gmra.mrb[14].mxu1 %vm215_vm3, %v205_v34 }
  0xe5   : > { %v747_v36 = vpop.f32.mrb[0].mxu0 }
  0xe6   : > { %v771_v37 = vpop.f32.mrb[0].mxu1  ;;  %v388_v38 = vadd.f32 %v747_v36, %v930_v35  ;;  %v382_v40 = vpop.f32.mrb[1].mxu0 }
  0xe7   : > { %v468_v39 = vadd.f32 %v771_v37, %v930_v35  ;;  %v462_v41 = vpop.f32.mrb[1].mxu1  ;;  %v383_v42 = vadd.f32 %v930_v35, %v382_v40 }
  0xe8   : > { %v463_v43 = vadd.f32 %v930_v35, %v462_v41  ;;  %v542_v44 = vmax.f32 %v388_v38, 0.0 }
  0xe9   : > { %v558_v45 = vmax.f32 %v468_v39, 0.0  ;;  %v541_v46 = vmax.f32 %v383_v42, 0.0  ;;  %v750_v48 = vpop.f32.mrb[2].mxu0 }
  0xea   : > { %v557_v47 = vmax.f32 %v463_v43, 0.0  ;;  %v774_v49 = vpop.f32.mrb[2].mxu1  ;;  %575 = vst.msk [vmem:[%s939_s27 + $0x8] sm:$0xff] %vm573_vm4, %v542_v44  ;;  %v398_v50 = vadd.f32 %v750_v48, %v930_v35  ;;  %v392_v52 = vpop.f32.mrb[3].mxu0 }
  0xeb   : > { %591 = vst.msk [vmem:[%s939_s27 + $0x88] sm:$0xff] %vm573_vm4, %v558_v45  ;;  %v478_v51 = vadd.f32 %v774_v49, %v930_v35  ;;  %v472_v53 = vpop.f32.mrb[3].mxu1  ;;  %574 = vst.msk [vmem:[%s939_s27] sm:$0xff] %vm573_vm4, %v541_v46  ;;  %v393_v54 = vadd.f32 %v930_v35, %v392_v52 }
  0xec   : > { %590 = vst.msk [vmem:[%s939_s27 + $0x80] sm:$0xff] %vm573_vm4, %v557_v47  ;;  %v473_v55 = vadd.f32 %v930_v35, %v472_v53  ;;  %v544_v56 = vmax.f32 %v398_v50, 0.0 }
  0xed   : > { %v560_v57 = vmax.f32 %v478_v51, 0.0  ;;  %v543_v58 = vmax.f32 %v393_v54, 0.0  ;;  %v753_v60 = vpop.f32.mrb[4].mxu0 }
  0xee   : > { %v559_v59 = vmax.f32 %v473_v55, 0.0  ;;  %v777_v61 = vpop.f32.mrb[4].mxu1  ;;  %577 = vst.msk [vmem:[%s939_s27 + $0x18] sm:$0xff] %vm573_vm4, %v544_v56  ;;  %v408_v62 = vadd.f32 %v753_v60, %v930_v35  ;;  %v402_v0 = vpop.f32.mrb[5].mxu0 }
  0xef   : > { %593 = vst.msk [vmem:[%s939_s27 + $0x98] sm:$0xff] %vm573_vm4, %v560_v57  ;;  %v488_v63 = vadd.f32 %v777_v61, %v930_v35  ;;  %v482_v1 = vpop.f32.mrb[5].mxu1  ;;  %576 = vst.msk [vmem:[%s939_s27 + $0x10] sm:$0xff] %vm573_vm4, %v543_v58  ;;  %v403_v2 = vadd.f32 %v930_v35, %v402_v0 }
  0xf0   : > { %592 = vst.msk [vmem:[%s939_s27 + $0x90] sm:$0xff] %vm573_vm4, %v559_v59  ;;  %v483_v3 = vadd.f32 %v930_v35, %v482_v1  ;;  %v546_v4 = vmax.f32 %v408_v62, 0.0 }
  0xf1   : > { %v562_v5 = vmax.f32 %v488_v63, 0.0  ;;  %v545_v6 = vmax.f32 %v403_v2, 0.0  ;;  %v756_v8 = vpop.f32.mrb[6].mxu0 }
  0xf2   : > { %v561_v7 = vmax.f32 %v483_v3, 0.0  ;;  %v780_v9 = vpop.f32.mrb[6].mxu1  ;;  %579 = vst.msk [vmem:[%s939_s27 + $0x28] sm:$0xff] %vm573_vm4, %v546_v4  ;;  %v418_v10 = vadd.f32 %v756_v8, %v930_v35  ;;  %v412_v12 = vpop.f32.mrb[7].mxu0 }
  0xf3   : > { %595 = vst.msk [vmem:[%s939_s27 + $0xa8] sm:$0xff] %vm573_vm4, %v562_v5  ;;  %v498_v11 = vadd.f32 %v780_v9, %v930_v35  ;;  %v492_v13 = vpop.f32.mrb[7].mxu1  ;;  %578 = vst.msk [vmem:[%s939_s27 + $0x20] sm:$0xff] %vm573_vm4, %v545_v6  ;;  %v413_v14 = vadd.f32 %v930_v35, %v412_v12 }
  0xf4   : > { %594 = vst.msk [vmem:[%s939_s27 + $0xa0] sm:$0xff] %vm573_vm4, %v561_v7  ;;  %v493_v15 = vadd.f32 %v930_v35, %v492_v13  ;;  %v548_v16 = vmax.f32 %v418_v10, 0.0 }
  0xf5   : > { %v564_v17 = vmax.f32 %v498_v11, 0.0  ;;  %v547_v18 = vmax.f32 %v413_v14, 0.0  ;;  %v759_v20 = vpop.f32.mrb[8].mxu0 }
  0xf6   : > { %v563_v19 = vmax.f32 %v493_v15, 0.0  ;;  %v783_v21 = vpop.f32.mrb[8].mxu1  ;;  %581 = vst.msk [vmem:[%s939_s27 + $0x38] sm:$0xff] %vm573_vm4, %v548_v16  ;;  %v428_v22 = vadd.f32 %v759_v20, %v930_v35  ;;  %v422_v24 = vpop.f32.mrb[9].mxu0 }
  0xf7   : > { %597 = vst.msk [vmem:[%s939_s27 + $0xb8] sm:$0xff] %vm573_vm4, %v564_v17  ;;  %v508_v23 = vadd.f32 %v783_v21, %v930_v35  ;;  %v502_v25 = vpop.f32.mrb[9].mxu1  ;;  %580 = vst.msk [vmem:[%s939_s27 + $0x30] sm:$0xff] %vm573_vm4, %v547_v18  ;;  %v423_v26 = vadd.f32 %v930_v35, %v422_v24 }
  0xf8   : > { %596 = vst.msk [vmem:[%s939_s27 + $0xb0] sm:$0xff] %vm573_vm4, %v563_v19  ;;  %v503_v27 = vadd.f32 %v930_v35, %v502_v25  ;;  %v550_v28 = vmax.f32 %v428_v22, 0.0 }
  0xf9   : > { %v566_v29 = vmax.f32 %v508_v23, 0.0  ;;  %v549_v30 = vmax.f32 %v423_v26, 0.0  ;;  %v762_v32 = vpop.f32.mrb[10].mxu0 }
  0xfa   : > { %v565_v31 = vmax.f32 %v503_v27, 0.0  ;;  %v786_v33 = vpop.f32.mrb[10].mxu1  ;;  %583 = vst.msk [vmem:[%s939_s27 + $0x48] sm:$0xff] %vm573_vm4, %v550_v28  ;;  %v438_v34 = vadd.f32 %v762_v32, %v930_v35  ;;  %v432_v37 = vpop.f32.mrb[11].mxu0 }
  0xfb   : > { %599 = vst.msk [vmem:[%s939_s27 + $0xc8] sm:$0xff] %vm573_vm4, %v566_v29  ;;  %v518_v36 = vadd.f32 %v786_v33, %v930_v35  ;;  %v512_v38 = vpop.f32.mrb[11].mxu1  ;;  %582 = vst.msk [vmem:[%s939_s27 + $0x40] sm:$0xff] %vm573_vm4, %v549_v30  ;;  %v433_v39 = vadd.f32 %v930_v35, %v432_v37 }
  0xfc   : > { %598 = vst.msk [vmem:[%s939_s27 + $0xc0] sm:$0xff] %vm573_vm4, %v565_v31  ;;  %v513_v40 = vadd.f32 %v930_v35, %v512_v38  ;;  %v552_v41 = vmax.f32 %v438_v34, 0.0 }
  0xfd   : > { %v568_v42 = vmax.f32 %v518_v36, 0.0  ;;  %v551_v43 = vmax.f32 %v433_v39, 0.0  ;;  %v765_v45 = vpop.f32.mrb[12].mxu0 }
  0xfe   : > { %v567_v44 = vmax.f32 %v513_v40, 0.0  ;;  %v789_v46 = vpop.f32.mrb[12].mxu1  ;;  %585 = vst.msk [vmem:[%s939_s27 + $0x58] sm:$0xff] %vm573_vm4, %v552_v41  ;;  %v448_v47 = vadd.f32 %v765_v45, %v930_v35  ;;  %v442_v49 = vpop.f32.mrb[13].mxu0 }
  0xff   : > { %601 = vst.msk [vmem:[%s939_s27 + $0xd8] sm:$0xff] %vm573_vm4, %v568_v42  ;;  %v528_v48 = vadd.f32 %v789_v46, %v930_v35  ;;  %v522_v50 = vpop.f32.mrb[13].mxu1  ;;  %584 = vst.msk [vmem:[%s939_s27 + $0x50] sm:$0xff] %vm573_vm4, %v551_v43  ;;  %v443_v51 = vadd.f32 %v930_v35, %v442_v49 }
 0x100   : > { %600 = vst.msk [vmem:[%s939_s27 + $0xd0] sm:$0xff] %vm573_vm4, %v567_v44  ;;  %v523_v52 = vadd.f32 %v930_v35, %v522_v50  ;;  %v554_v53 = vmax.f32 %v448_v47, 0.0 }
 0x101   : > { %v570_v54 = vmax.f32 %v528_v48, 0.0  ;;  %v553_v55 = vmax.f32 %v443_v51, 0.0  ;;  %v768_v57 = vpop.f32.mrb[14].mxu0 }
 0x102   : > { %v569_v56 = vmax.f32 %v523_v52, 0.0  ;;  %v792_v58 = vpop.f32.mrb[14].mxu1  ;;  %587 = vst.msk [vmem:[%s939_s27 + $0x68] sm:$0xff] %vm573_vm4, %v554_v53  ;;  %v458_v59 = vadd.f32 %v768_v57, %v930_v35  ;;  %v452_v61 = vpop.f32.mrb[15].mxu0 }
 0x103   : > { %603 = vst.msk [vmem:[%s939_s27 + $0xe8] sm:$0xff] %vm573_vm4, %v570_v54  ;;  %v538_v60 = vadd.f32 %v792_v58, %v930_v35  ;;  %v532_v62 = vpop.f32.mrb[15].mxu1  ;;  %586 = vst.msk [vmem:[%s939_s27 + $0x60] sm:$0xff] %vm573_vm4, %v553_v55  ;;  %v453_v63 = vadd.f32 %v930_v35, %v452_v61 }
 0x104   : > { %602 = vst.msk [vmem:[%s939_s27 + $0xe0] sm:$0xff] %vm573_vm4, %v569_v56  ;;  %v533_v0 = vadd.f32 %v930_v35, %v532_v62  ;;  %v556_v1 = vmax.f32 %v458_v59, 0.0 }
 0x105   : > { %v572_v2 = vmax.f32 %v538_v60, 0.0  ;;  %v555_v3 = vmax.f32 %v453_v63, 0.0 }
 0x106   : > { %v571_v4 = vmax.f32 %v533_v0, 0.0  ;;  %589 = vst.msk [vmem:[%s939_s27 + $0x78] sm:$0xff] %vm573_vm4, %v556_v1 }
 0x107   : > { %605 = vst.msk [vmem:[%s939_s27 + $0xf8] sm:$0xff] %vm573_vm4, %v572_v2  ;;  %588 = vst.msk [vmem:[%s939_s27 + $0x70] sm:$0xff] %vm573_vm4, %v555_v3 }
 0x108   : > { %604 = vst.msk [vmem:[%s939_s27 + $0xf0] sm:$0xff] %vm573_vm4, %v571_v4 }
 0x109 PF: > { %s13_s12 = sadd.s32 1, %s816_s12  }
 0x10a   : > { %p10_p4 = scmp.ge.s32.totalorder %s13_s12, 7  }
 0x10c   :  { %12 = sbr.rel (!%p10_p4) target bundleno = 1 (0x1), region = 62 }

// kernel: transformer_encoder_forward.11
= control target key start
LH: loop header
LB: loop body
LE: loop exit
PB: predicated region body
PF: predicated region fallthrough
CT: control target
= control target key end

     0   :  { %v987_v0 = vmov 0.0|0.0   ;;  %vm988_vm0 = vmmov 0   ;;  %v989_v6 = vmov 0.0   ;;  %vm144_vm1 = vcmask 261120   ;;  %s1703_s1 = inlined_call_operand.vmem [shape: f32[288,32], index: 1, kind: input, shape index: {}]   ;;  %s1704_s0 = inlined_call_operand.vmem [shape: f32[232,288], index: 0, kind: input, shape index: {}]   ;;  %s1705_s2 = inlined_call_operand.vmem [shape: f32[1,32], index: 2, kind: input, shape index: {}]   ;;  %s1706_s3 = inlined_call_operand.vmem [shape: f32[232,32], index: 3, kind: output, shape index: {}]  }
   0x1   :  { %872 = vmatprep.subr.bf16.mxu1 %v987_v0  ;;  %v101_v1 = vld [vmem:[%s1703_s1] sm:$0xff]  ;;  %v102_v2 = vld [vmem:[%s1703_s1 + $0x8] sm:$0xff]  ;;  %v103_v3 = vld [vmem:[%s1703_s1 + $0x10] sm:$0xff]  ;;  %920 = vmatprep.subr.bf16.mxu0 %v987_v0 }
   0x2   :  { %v873_v4 = vpack.c.bf16 %v102_v2, %v101_v1  ;;  %v104_v5 = vld [vmem:[%s1703_s1 + $0x18] sm:$0xff]  ;;  %785 = vmatprep.mubr.msk.f32.mxu0 %vm988_vm0, %v989_v6  ;;  %v105_v8 = vld [vmem:[%s1703_s1 + $0x20] sm:$0xff]  ;;  %v106_v9 = vld [vmem:[%s1703_s1 + $0x28] sm:$0xff] }
   0x3   :  { %v876_v7 = vpack.c.bf16 %v104_v5, %v103_v3  ;;  %v879_v10 = vpack.c.bf16 %v106_v9, %v105_v8  ;;  %v107_v11 = vld [vmem:[%s1703_s1 + $0x30] sm:$0xff]  ;;  %v108_v12 = vld [vmem:[%s1703_s1 + $0x38] sm:$0xff]  ;;  %v133_v13 = vld [vmem:[%s1703_s1 + $0x100] sm:$0xff] }
   0x4   :  { %874 = vmatpush1.bf16.msra.mxu1 %v873_v4  ;;  %v134_v14 = vld [vmem:[%s1703_s1 + $0x108] sm:$0xff]  ;;  %v882_v15 = vpack.c.bf16 %v108_v12, %v107_v11  ;;  %v135_v17 = vld [vmem:[%s1703_s1 + $0x110] sm:$0xff]  ;;  %v136_v18 = vld [vmem:[%s1703_s1 + $0x118] sm:$0xff] }
   0x5   :  { %875 = vmatprep.subr.bf16.mxu1 %v987_v0  ;;  %v921_v16 = vpack.c.bf16 %v134_v14, %v133_v13  ;;  %v109_v19 = vld [vmem:[%s1703_s1 + $0x40] sm:$0xff]  ;;  %v110_v20 = vld [vmem:[%s1703_s1 + $0x48] sm:$0xff]  ;;  %v924_v22 = vpack.c.bf16 %v136_v18, %v135_v17  ;;  %v111_v24 = vld [vmem:[%s1703_s1 + $0x50] sm:$0xff] }
   0x6   :  { %v15_v21 = vld [vmem:[%s1704_s0 + $0x8] sm:$0xff]  ;;  %v885_v23 = vpack.c.bf16 %v110_v20, %v109_v19  ;;  %v112_v25 = vld [vmem:[%s1703_s1 + $0x58] sm:$0xff]  ;;  %v16_v26 = vld [vmem:[%s1704_s0 + $0x10] sm:$0xff] }
   0x7   :  { %922 = vmatpush3.bf16.msra.mxu0 %v921_v16  ;;  %296 = vmatprep.mubr.f32.mxu1 %v15_v21  ;;  %v888_v27 = vpack.c.bf16 %v112_v25, %v111_v24  ;;  %v113_v28 = vld [vmem:[%s1703_s1 + $0x60] sm:$0xff]  ;;  %v114_v29 = vld [vmem:[%s1703_s1 + $0x68] sm:$0xff]  ;;  %v115_v32 = vld [vmem:[%s1703_s1 + $0x70] sm:$0xff] }
   0x8   :  { %877 = vmatpush1.bf16.msra.mxu1 %v876_v7  ;;  %923 = vmatprep.subr.bf16.mxu0 %v987_v0  ;;  %v19_v30 = vld [vmem:[%s1704_s0 + $0x28] sm:$0xff]  ;;  %v891_v31 = vpack.c.bf16 %v114_v29, %v113_v28  ;;  %v116_v33 = vld [vmem:[%s1703_s1 + $0x78] sm:$0xff]  ;;  %v22_v34 = vld [vmem:[%s1704_s0 + $0x40] sm:$0xff] }
   0x9   :  { %878 = vmatprep.subr.bf16.mxu1 %v987_v0  ;;  %v894_v35 = vpack.c.bf16 %v116_v33, %v115_v32  ;;  %v117_v36 = vld [vmem:[%s1703_s1 + $0x80] sm:$0xff]  ;;  %v118_v37 = vld [vmem:[%s1703_s1 + $0x88] sm:$0xff]  ;;  %v25_v38 = vld [vmem:[%s1704_s0 + $0x58] sm:$0xff] }
   0xa   :  { %v897_v39 = vpack.c.bf16 %v118_v37, %v117_v36  ;;  %v119_v40 = vld [vmem:[%s1703_s1 + $0x90] sm:$0xff]  ;;  %v120_v41 = vld [vmem:[%s1703_s1 + $0x98] sm:$0xff]  ;;  %v121_v44 = vld [vmem:[%s1703_s1 + $0xa0] sm:$0xff] }
   0xb   :  { %925 = vmatpush3.bf16.msra.mxu0 %v924_v22  ;;  %v28_v42 = vld [vmem:[%s1704_s0 + $0x70] sm:$0xff]  ;;  %v900_v43 = vpack.c.bf16 %v120_v41, %v119_v40  ;;  %v122_v45 = vld [vmem:[%s1703_s1 + $0xa8] sm:$0xff]  ;;  %v124_v49 = vld [vmem:[%s1703_s1 + $0xb8] sm:$0xff] }
   0xc   :  { %880 = vmatpush1.bf16.msra.mxu1 %v879_v10  ;;  %v31_v46 = vld [vmem:[%s1704_s0 + $0x88] sm:$0xff]  ;;  %v903_v47 = vpack.c.bf16 %v122_v45, %v121_v44  ;;  %v123_v48 = vld [vmem:[%s1703_s1 + $0xb0] sm:$0xff]  ;;  %v34_v50 = vld [vmem:[%s1704_s0 + $0xa0] sm:$0xff] }
   0xd   :  { %881 = vmatprep.subr.bf16.mxu1 %v987_v0  ;;  %v906_v51 = vpack.c.bf16 %v124_v49, %v123_v48  ;;  %v125_v52 = vld [vmem:[%s1703_s1 + $0xc0] sm:$0xff]  ;;  %v126_v53 = vld [vmem:[%s1703_s1 + $0xc8] sm:$0xff]  ;;  %v37_v54 = vld [vmem:[%s1704_s0 + $0xb8] sm:$0xff] }
   0xe   :  { %786 = vmatmul.mubr.msk.f32.vlgmr.msra.gmra.mrb[0].mxu0 %vm144_vm1, %v16_v26  ;;  %v909_v55 = vpack.c.bf16 %v126_v53, %v125_v52  ;;  %v127_v56 = vld [vmem:[%s1703_s1 + $0xd0] sm:$0xff]  ;;  %v128_v57 = vld [vmem:[%s1703_s1 + $0xd8] sm:$0xff]  ;;  %v129_v60 = vld [vmem:[%s1703_s1 + $0xe0] sm:$0xff] }
   0xf   :  { %788 = vmatprep.mubr.msk.f32.mxu0 %vm988_vm0, %v989_v6  ;;  %v40_v58 = vld [vmem:[%s1704_s0 + $0xd0] sm:$0xff]  ;;  %v912_v59 = vpack.c.bf16 %v128_v57, %v127_v56  ;;  %v130_v61 = vld [vmem:[%s1703_s1 + $0xe8] sm:$0xff]  ;;  %v132_v2 = vld [vmem:[%s1703_s1 + $0xf8] sm:$0xff] }
  0x10   :  { %883 = vmatpush1.bf16.msra.mxu1 %v882_v15  ;;  %v43_v62 = vld [vmem:[%s1704_s0 + $0xe8] sm:$0xff]  ;;  %v915_v63 = vpack.c.bf16 %v130_v61, %v129_v60  ;;  %v131_v1 = vld [vmem:[%s1703_s1 + $0xf0] sm:$0xff]  ;;  %v46_v3 = vld [vmem:[%s1704_s0 + $0x100] sm:$0xff] }
  0x11   :  { %884 = vmatprep.subr.bf16.mxu1 %v987_v0  ;;  %v918_v4 = vpack.c.bf16 %v132_v2, %v131_v1  ;;  %v49_v5 = vld [vmem:[%s1704_s0 + $0x118] sm:$0xff]  ;;  %v14_v7 = vld [vmem:[%s1704_s0] sm:$0xff]  ;;  %v55_v11 = vld [vmem:[%s1704_s0 + $0x148] sm:$0xff] }
  0x12   :  { %789 = vmatmul.mubr.msk.f32.gmra.mrb[2].mxu0 %vm144_vm1, %v19_v30  ;;  %v18_v8 = vld [vmem:[%s1704_s0 + $0x20] sm:$0xff]  ;;  %v17_v9 = vld [vmem:[%s1704_s0 + $0x18] sm:$0xff]  ;;  %v20_v12 = vld [vmem:[%s1704_s0 + $0x30] sm:$0xff] }
  0x13   :  { %791 = vmatprep.mubr.msk.f32.mxu0 %vm988_vm0, %v989_v6  ;;  %v21_v10 = vld [vmem:[%s1704_s0 + $0x38] sm:$0xff]  ;;  %v24_v13 = vld [vmem:[%s1704_s0 + $0x50] sm:$0xff]  ;;  %v58_v14 = vld [vmem:[%s1704_s0 + $0x160] sm:$0xff] }
  0x14   :  { %886 = vmatpush1.bf16.msra.mxu1 %v885_v23  ;;  %v23_v15 = vld [vmem:[%s1704_s0 + $0x48] sm:$0xff]  ;;  %v61_v17 = vld [vmem:[%s1704_s0 + $0x178] sm:$0xff]  ;;  %v26_v18 = vld [vmem:[%s1704_s0 + $0x60] sm:$0xff] }
  0x15   :  { %887 = vmatprep.subr.bf16.mxu1 %v987_v0  ;;  %v27_v16 = vld [vmem:[%s1704_s0 + $0x68] sm:$0xff]  ;;  %v30_v19 = vld [vmem:[%s1704_s0 + $0x80] sm:$0xff]  ;;  %v64_v20 = vld [vmem:[%s1704_s0 + $0x190] sm:$0xff] }
  0x16   :  { %792 = vmatmul.mubr.msk.f32.gmra.mrb[4].mxu0 %vm144_vm1, %v22_v34  ;;  %v29_v21 = vld [vmem:[%s1704_s0 + $0x78] sm:$0xff]  ;;  %v67_v23 = vld [vmem:[%s1704_s0 + $0x1a8] sm:$0xff]  ;;  %v32_v24 = vld [vmem:[%s1704_s0 + $0x90] sm:$0xff] }
  0x17   :  { %794 = vmatprep.mubr.msk.f32.mxu0 %vm988_vm0, %v989_v6  ;;  %v33_v22 = vld [vmem:[%s1704_s0 + $0x98] sm:$0xff]  ;;  %v36_v25 = vld [vmem:[%s1704_s0 + $0xb0] sm:$0xff]  ;;  %v70_v26 = vld [vmem:[%s1704_s0 + $0x1c0] sm:$0xff] }
  0x18   :  { %889 = vmatpush1.bf16.msra.mxu1 %v888_v27  ;;  %v35_v27 = vld [vmem:[%s1704_s0 + $0xa8] sm:$0xff]  ;;  %v73_v29 = vld [vmem:[%s1704_s0 + $0x1d8] sm:$0xff]  ;;  %v38_v30 = vld [vmem:[%s1704_s0 + $0xc0] sm:$0xff] }
  0x19   :  { %890 = vmatprep.subr.bf16.mxu1 %v987_v0  ;;  %v39_v28 = vld [vmem:[%s1704_s0 + $0xc8] sm:$0xff]  ;;  %v76_v32 = vld [vmem:[%s1704_s0 + $0x1f0] sm:$0xff]  ;;  %v41_v33 = vld [vmem:[%s1704_s0 + $0xd8] sm:$0xff] }
  0x1a   :  { %795 = vmatmul.mubr.msk.f32.gmra.mrb[6].mxu0 %vm144_vm1, %v25_v38  ;;  %v45_v34 = vld [vmem:[%s1704_s0 + $0xf8] sm:$0xff]  ;;  %v44_v36 = vld [vmem:[%s1704_s0 + $0xf0] sm:$0xff]  ;;  %v82_v38 = vld [vmem:[%s1704_s0 + $0x220] sm:$0xff] }
  0x1b   :  { %797 = vmatprep.mubr.msk.f32.mxu0 %vm988_vm0, %v989_v6  ;;  %v48_v37 = vld [vmem:[%s1704_s0 + $0x110] sm:$0xff]  ;;  %v51_v40 = vld [vmem:[%s1704_s0 + $0x128] sm:$0xff]  ;;  %v85_v41 = vld [vmem:[%s1704_s0 + $0x238] sm:$0xff] }
  0x1c   :  { %892 = vmatpush1.bf16.msra.mxu1 %v891_v31  ;;  %v42_v31 = vld [vmem:[%s1704_s0 + $0xe0] sm:$0xff]  ;;  %v88_v44 = vld [vmem:[%s1704_s0 + $0x250] sm:$0xff]  ;;  %v53_v45 = vld [vmem:[%s1704_s0 + $0x138] sm:$0xff] }
  0x1d   :  { %893 = vmatprep.subr.bf16.mxu1 %v987_v0  ;;  %v56_v48 = vld [vmem:[%s1704_s0 + $0x150] sm:$0xff]  ;;  %v63_v52 = vld [vmem:[%s1704_s0 + $0x188] sm:$0xff]  ;;  %v97_v53 = vld [vmem:[%s1704_s0 + $0x298] sm:$0xff] }
  0x1e   :  { %798 = vmatmul.mubr.msk.f32.gmra.mrb[8].mxu0 %vm144_vm1, %v28_v42  ;;  %v50_v42 = vld [vmem:[%s1704_s0 + $0x120] sm:$0xff]  ;;  %v60_v49 = vld [vmem:[%s1704_s0 + $0x170] sm:$0xff]  ;;  %v65_v57 = vld [vmem:[%s1704_s0 + $0x198] sm:$0xff] }
  0x1f   :  { %800 = vmatprep.mubr.msk.f32.mxu0 %vm988_vm0, %v989_v6  ;;  %v100_v56 = vld [vmem:[%s1704_s0 + $0x2b0] sm:$0xff]  ;;  %v71_v60 = vld [vmem:[%s1704_s0 + $0x1c8] sm:$0xff]  ;;  %v77_v1 = vld [vmem:[%s1704_s0 + $0x1f8] sm:$0xff] }
  0x20   :  { %895 = vmatpush1.bf16.msra.mxu1 %v894_v35  ;;  %v79_v35 = vld [vmem:[%s1704_s0 + $0x208] sm:$0xff]  ;;  %v81_v2 = vld [vmem:[%s1704_s0 + $0x218] sm:$0xff] }
  0x21   :  { %896 = vmatprep.subr.bf16.mxu1 %v987_v0  ;;  %v75_v61 = vld [vmem:[%s1704_s0 + $0x1e8] sm:$0xff] }
  0x22   :  { %801 = vmatmul.mubr.msk.f32.gmra.mrb[10].mxu0 %vm144_vm1, %v31_v46  ;;  %v57_v46 = vld [vmem:[%s1704_s0 + $0x158] sm:$0xff] }
  0x23   :  { %803 = vmatprep.mubr.msk.f32.mxu0 %vm988_vm0, %v989_v6 }
  0x24   :  { %898 = vmatpush1.bf16.msra.mxu1 %v897_v39  ;;  %v47_v39 = vld [vmem:[%s1704_s0 + $0x108] sm:$0xff] }
  0x25   :  { %899 = vmatprep.subr.bf16.mxu1 %v987_v0 }
  0x26   :  { %804 = vmatmul.mubr.msk.f32.gmra.mrb[12].mxu0 %vm144_vm1, %v34_v50  ;;  %v94_v50 = vld [vmem:[%s1704_s0 + $0x280] sm:$0xff] }
  0x27   :  { %806 = vmatprep.mubr.msk.f32.mxu0 %vm988_vm0, %v989_v6 }
  0x28   :  { %901 = vmatpush1.bf16.msra.mxu1 %v900_v43  ;;  %v54_v43 = vld [vmem:[%s1704_s0 + $0x140] sm:$0xff] }
  0x29   :  { %902 = vmatprep.subr.bf16.mxu1 %v987_v0 }
  0x2a   :  { %807 = vmatmul.mubr.msk.f32.gmra.mrb[14].mxu0 %vm144_vm1, %v37_v54  ;;  %v62_v54 = vld [vmem:[%s1704_s0 + $0x180] sm:$0xff] }
  0x2b   :  { %809 = vmatprep.mubr.msk.f32.mxu0 %vm988_vm0, %v989_v6 }
  0x2c   :  { %904 = vmatpush1.bf16.msra.mxu1 %v903_v47  ;;  %v91_v47 = vld [vmem:[%s1704_s0 + $0x268] sm:$0xff] }
  0x2d   :  { %905 = vmatprep.subr.bf16.mxu1 %v987_v0 }
  0x2e   :  { %810 = vmatmul.mubr.msk.f32.gmra.mrb[16].mxu0 %vm144_vm1, %v40_v58  ;;  %v69_v58 = vld [vmem:[%s1704_s0 + $0x1b8] sm:$0xff] }
  0x2f   :  { %812 = vmatprep.mubr.msk.f32.mxu0 %vm988_vm0, %v989_v6 }
  0x30   :  { %907 = vmatpush1.bf16.msra.mxu1 %v906_v51  ;;  %v59_v51 = vld [vmem:[%s1704_s0 + $0x168] sm:$0xff] }
  0x31   :  { %908 = vmatprep.subr.bf16.mxu1 %v987_v0 }
  0x32   :  { %813 = vmatmul.mubr.msk.f32.gmra.mrb[18].mxu0 %vm144_vm1, %v43_v62  ;;  %v74_v62 = vld [vmem:[%s1704_s0 + $0x1e0] sm:$0xff] }
  0x33   :  { %815 = vmatprep.mubr.msk.f32.mxu0 %vm988_vm0, %v989_v6 }
  0x34   :  { %910 = vmatpush1.bf16.msra.mxu1 %v909_v55  ;;  %v66_v55 = vld [vmem:[%s1704_s0 + $0x1a0] sm:$0xff] }
  0x35   :  { %911 = vmatprep.subr.bf16.mxu1 %v987_v0 }
  0x36   :  { %816 = vmatmul.mubr.msk.f32.gmra.mrb[20].mxu0 %vm144_vm1, %v46_v3  ;;  %v80_v3 = vld [vmem:[%s1704_s0 + $0x210] sm:$0xff] }
  0x37   :  { %818 = vmatprep.mubr.msk.f32.mxu0 %vm988_vm0, %v989_v6 }
  0x38   :  { %913 = vmatpush1.bf16.msra.mxu1 %v912_v59  ;;  %v72_v59 = vld [vmem:[%s1704_s0 + $0x1d0] sm:$0xff] }
  0x39   :  { %914 = vmatprep.subr.bf16.mxu1 %v987_v0 }
  0x3a   :  { %819 = vmatmul.mubr.msk.f32.gmra.mrb[22].mxu0 %vm144_vm1, %v49_v5  ;;  %v83_v5 = vld [vmem:[%s1704_s0 + $0x228] sm:$0xff] }
  0x3b   :  { %821 = vmatprep.mubr.msk.f32.mxu0 %vm988_vm0, %v989_v6 }
  0x3c   :  { %916 = vmatpush1.bf16.msra.mxu1 %v915_v63  ;;  %v78_v63 = vld [vmem:[%s1704_s0 + $0x200] sm:$0xff] }
  0x3d   :  { %917 = vmatprep.subr.bf16.mxu1 %v987_v0  ;;  %v52_v0 = vld [vmem:[%s1704_s0 + $0x130] sm:$0xff] }
  0x3e   :  { %822 = vmatmul.mubr.msk.f32.gmra.mrb[24].mxu0 %vm144_vm1, %v52_v0  ;;  %v90_v0 = vld [vmem:[%s1704_s0 + $0x260] sm:$0xff] }
  0x3f   :  { %824 = vmatprep.mubr.msk.f32.mxu0 %vm988_vm0, %v989_v6 }
  0x40   :  { %919 = vmatpush1.bf16.msra.mxu1 %v918_v4  ;;  %v84_v4 = vld [vmem:[%s1704_s0 + $0x230] sm:$0xff] }
  0x42   :  { %825 = vmatmul.mubr.msk.f32.gmra.mrb[26].mxu0 %vm144_vm1, %v55_v11  ;;  %v92_v11 = vld [vmem:[%s1704_s0 + $0x270] sm:$0xff] }
  0x43   :  { %297 = vmatmul.mubr.f32.vlgmr.msra.gmra.mrb[0].mxu1 %v14_v7  ;;  %827 = vmatprep.mubr.msk.f32.mxu0 %vm988_vm0, %v989_v6  ;;  %v87_v7 = vld [vmem:[%s1704_s0 + $0x248] sm:$0xff] }
  0x44   :  { %301 = vmatprep.mubr.f32.mxu1 %v18_v8  ;;  %v86_v8 = vld [vmem:[%s1704_s0 + $0x240] sm:$0xff] }
  0x46   :  { %828 = vmatmul.mubr.msk.f32.gmra.mrb[28].mxu0 %vm144_vm1, %v58_v14  ;;  %v99_v14 = vld [vmem:[%s1704_s0 + $0x2a8] sm:$0xff] }
  0x47   :  { %302 = vmatmul.mubr.f32.gmra.mrb[2].mxu1 %v17_v9  ;;  %830 = vmatprep.mubr.msk.f32.mxu0 %vm988_vm0, %v989_v6  ;;  %v89_v9 = vld [vmem:[%s1704_s0 + $0x258] sm:$0xff] }
  0x48   :  { %306 = vmatprep.mubr.f32.mxu1 %v21_v10  ;;  %v93_v10 = vld [vmem:[%s1704_s0 + $0x278] sm:$0xff] }
  0x4a   :  { %831 = vmatmul.mubr.msk.f32.gmra.mrb[30].mxu0 %vm144_vm1, %v61_v17 }
  0x4b   :  { %307 = vmatmul.mubr.f32.gmra.mrb[4].mxu1 %v20_v12  ;;  %833 = vmatprep.mubr.msk.f32.mxu0 %vm988_vm0, %v989_v6  ;;  %v96_v12 = vld [vmem:[%s1704_s0 + $0x290] sm:$0xff] }
  0x4c   :  { %311 = vmatprep.mubr.f32.mxu1 %v24_v13  ;;  %v95_v13 = vld [vmem:[%s1704_s0 + $0x288] sm:$0xff] }
  0x4e   :  { %834 = vmatmul.mubr.msk.f32.gmra.mrb[32].mxu0 %vm144_vm1, %v64_v20 }
  0x4f   :  { %312 = vmatmul.mubr.f32.gmra.mrb[6].mxu1 %v23_v15  ;;  %836 = vmatprep.mubr.msk.f32.mxu0 %vm988_vm0, %v989_v6  ;;  %v98_v15 = vld [vmem:[%s1704_s0 + $0x2a0] sm:$0xff] }
  0x50   :  { %316 = vmatprep.mubr.f32.mxu1 %v27_v16 }
  0x52   :  { %837 = vmatmul.mubr.msk.f32.gmra.mrb[34].mxu0 %vm144_vm1, %v67_v23 }
  0x53   :  { %317 = vmatmul.mubr.f32.gmra.mrb[8].mxu1 %v26_v18  ;;  %839 = vmatprep.mubr.msk.f32.mxu0 %vm988_vm0, %v989_v6 }
  0x54   :  { %321 = vmatprep.mubr.f32.mxu1 %v30_v19 }
  0x56   :  { %840 = vmatmul.mubr.msk.f32.gmra.mrb[36].mxu0 %vm144_vm1, %v70_v26 }
  0x57   :  { %322 = vmatmul.mubr.f32.gmra.mrb[10].mxu1 %v29_v21  ;;  %842 = vmatprep.mubr.msk.f32.mxu0 %vm988_vm0, %v989_v6 }
  0x58   :  { %326 = vmatprep.mubr.f32.mxu1 %v33_v22 }
  0x5a   :  { %843 = vmatmul.mubr.msk.f32.gmra.mrb[38].mxu0 %vm144_vm1, %v73_v29 }
  0x5b   :  { %327 = vmatmul.mubr.f32.gmra.mrb[12].mxu1 %v32_v24  ;;  %845 = vmatprep.mubr.msk.f32.mxu0 %vm988_vm0, %v989_v6 }
  0x5c   :  { %331 = vmatprep.mubr.f32.mxu1 %v36_v25 }
  0x5e   :  { %846 = vmatmul.mubr.msk.f32.gmra.mrb[40].mxu0 %vm144_vm1, %v76_v32 }
  0x5f   :  { %332 = vmatmul.mubr.f32.gmra.mrb[14].mxu1 %v35_v27  ;;  %848 = vmatprep.mubr.msk.f32.mxu0 %vm988_vm0, %v989_v6 }
  0x60   :  { %336 = vmatprep.mubr.f32.mxu1 %v39_v28 }
  0x62   :  { %849 = vmatmul.mubr.msk.f32.gmra.mrb[42].mxu0 %vm144_vm1, %v79_v35 }
  0x63   :  { %337 = vmatmul.mubr.f32.gmra.mrb[16].mxu1 %v38_v30  ;;  %851 = vmatprep.mubr.msk.f32.mxu0 %vm988_vm0, %v989_v6 }
  0x64   :  { %341 = vmatprep.mubr.f32.mxu1 %v42_v31 }
  0x66   :  { %852 = vmatmul.mubr.msk.f32.gmra.mrb[44].mxu0 %vm144_vm1, %v82_v38  ;;  %v1497_v38 = vld [vmem:[%s1705_s2] ss:$0 sm:$0xff] }
  0x67   :  { %342 = vmatmul.mubr.f32.gmra.mrb[18].mxu1 %v41_v33  ;;  %854 = vmatprep.mubr.msk.f32.mxu0 %vm988_vm0, %v989_v6 }
  0x68   :  { %346 = vmatprep.mubr.f32.mxu1 %v45_v34 }
  0x6a   :  { %855 = vmatmul.mubr.msk.f32.gmra.mrb[46].mxu0 %vm144_vm1, %v85_v41 }
  0x6b   :  { %347 = vmatmul.mubr.f32.gmra.mrb[20].mxu1 %v44_v36  ;;  %857 = vmatprep.mubr.msk.f32.mxu0 %vm988_vm0, %v989_v6 }
  0x6c   :  { %351 = vmatprep.mubr.f32.mxu1 %v48_v37 }
  0x6e   :  { %858 = vmatmul.mubr.msk.f32.gmra.mrb[48].mxu0 %vm144_vm1, %v88_v44 }
  0x6f   :  { %352 = vmatmul.mubr.f32.gmra.mrb[22].mxu1 %v47_v39  ;;  %860 = vmatprep.mubr.msk.f32.mxu0 %vm988_vm0, %v989_v6 }
  0x70   :  { %356 = vmatprep.mubr.f32.mxu1 %v51_v40 }
  0x72   :  { %861 = vmatmul.mubr.msk.f32.gmra.mrb[50].mxu0 %vm144_vm1, %v91_v47 }
  0x73   :  { %357 = vmatmul.mubr.f32.gmra.mrb[24].mxu1 %v50_v42  ;;  %863 = vmatprep.mubr.msk.f32.mxu0 %vm988_vm0, %v989_v6 }
  0x74   :  { %361 = vmatprep.mubr.f32.mxu1 %v54_v43 }
  0x76   :  { %864 = vmatmul.mubr.msk.f32.gmra.mrb[52].mxu0 %vm144_vm1, %v94_v50 }
  0x77   :  { %362 = vmatmul.mubr.f32.gmra.mrb[26].mxu1 %v53_v45  ;;  %866 = vmatprep.mubr.msk.f32.mxu0 %vm988_vm0, %v989_v6 }
  0x78   :  { %366 = vmatprep.mubr.f32.mxu1 %v57_v46 }
  0x7a   :  { %867 = vmatmul.mubr.msk.f32.gmra.mrb[54].mxu0 %vm144_vm1, %v97_v53 }
  0x7b   :  { %367 = vmatmul.mubr.f32.gmra.mrb[28].mxu1 %v56_v48  ;;  %869 = vmatprep.mubr.msk.f32.mxu0 %vm988_vm0, %v989_v6  ;;  %v68_v6 = vld [vmem:[%s1704_s0 + $0x1b0] sm:$0xff] }
  0x7c   :  { %371 = vmatprep.mubr.f32.mxu1 %v60_v49 }
  0x7e   :  { %870 = vmatmul.mubr.msk.f32.gmra.mrb[56].mxu0 %vm144_vm1, %v100_v56 }
  0x7f   :  { %372 = vmatmul.mubr.f32.gmra.mrb[30].mxu1 %v59_v51 }
  0x80   :  { %376 = vmatprep.mubr.f32.mxu1 %v63_v52 }
  0x83   :  { %377 = vmatmul.mubr.f32.gmra.mrb[32].mxu1 %v62_v54 }
  0x84   :  { %381 = vmatprep.mubr.f32.mxu1 %v66_v55 }
  0x87   :  { %382 = vmatmul.mubr.f32.gmra.mrb[34].mxu1 %v65_v57 }
  0x88   :  { %386 = vmatprep.mubr.f32.mxu1 %v69_v58 }
  0x8b   :  { %387 = vmatmul.mubr.f32.gmra.mrb[36].mxu1 %v68_v6 }
  0x8c   :  { %391 = vmatprep.mubr.f32.mxu1 %v72_v59 }
  0x8f   :  { %392 = vmatmul.mubr.f32.gmra.mrb[38].mxu1 %v71_v60 }
  0x90   :  { %396 = vmatprep.mubr.f32.mxu1 %v75_v61 }
  0x93   :  { %397 = vmatmul.mubr.f32.gmra.mrb[40].mxu1 %v74_v62 }
  0x94   :  { %401 = vmatprep.mubr.f32.mxu1 %v78_v63 }
  0x97   :  { %402 = vmatmul.mubr.f32.gmra.mrb[42].mxu1 %v77_v1 }
  0x98   :  { %406 = vmatprep.mubr.f32.mxu1 %v81_v2 }
  0x9b   :  { %407 = vmatmul.mubr.f32.gmra.mrb[44].mxu1 %v80_v3 }
  0x9c   :  { %411 = vmatprep.mubr.f32.mxu1 %v84_v4 }
  0x9f   :  { %412 = vmatmul.mubr.f32.gmra.mrb[46].mxu1 %v83_v5 }
  0xa0   :  { %416 = vmatprep.mubr.f32.mxu1 %v87_v7 }
  0xa3   :  { %417 = vmatmul.mubr.f32.gmra.mrb[48].mxu1 %v86_v8 }
  0xa4   :  { %421 = vmatprep.mubr.f32.mxu1 %v90_v0 }
  0xa7   :  { %422 = vmatmul.mubr.f32.gmra.mrb[50].mxu1 %v89_v9 }
  0xa8   :  { %426 = vmatprep.mubr.f32.mxu1 %v93_v10 }
  0xab   :  { %427 = vmatmul.mubr.f32.gmra.mrb[52].mxu1 %v92_v11 }
  0xac   :  { %431 = vmatprep.mubr.f32.mxu1 %v96_v12 }
  0xaf   :  { %432 = vmatmul.mubr.f32.gmra.mrb[54].mxu1 %v95_v13 }
  0xb0   :  { %436 = vmatprep.mubr.f32.mxu1 %v99_v14 }
  0xb3   :  { %437 = vmatmul.mubr.f32.gmra.mrb[56].mxu1 %v98_v15 }
  0xe1   :  { %v508_v16 = vpop.f32.mrb[0].mxu0 }
  0xe2   :  { %v787_v17 = vpop.f32.mrb[1].mxu0 }
  0xe5   :  { %v513_v18 = vpop.f32.mrb[2].mxu0 }
  0xe6   :  { %v790_v19 = vpop.f32.mrb[3].mxu0 }
  0xe9   :  { %v518_v20 = vpop.f32.mrb[4].mxu0 }
  0xea   :  { %v793_v21 = vpop.f32.mrb[5].mxu0 }
  0xed   :  { %v523_v22 = vpop.f32.mrb[6].mxu0 }
  0xee   :  { %v796_v23 = vpop.f32.mrb[7].mxu0 }
  0xf1   :  { %v528_v24 = vpop.f32.mrb[8].mxu0 }
  0xf2   :  { %v799_v25 = vpop.f32.mrb[9].mxu0 }
  0xf5   :  { %v533_v26 = vpop.f32.mrb[10].mxu0 }
  0xf6   :  { %v802_v27 = vpop.f32.mrb[11].mxu0 }
  0xf9   :  { %v1484_v28 = vpop.f32.mrb[12].mxu0 }
  0xfa   :  { %v805_v29 = vpop.f32.mrb[13].mxu0 }
  0xfd   :  { %v1486_v30 = vpop.f32.mrb[14].mxu0 }
  0xfe   :  { %v808_v31 = vpop.f32.mrb[15].mxu0 }
 0x101   :  { %v1488_v32 = vpop.f32.mrb[16].mxu0 }
 0x102   :  { %v811_v33 = vpop.f32.mrb[17].mxu0 }
 0x105   :  { %v1490_v34 = vpop.f32.mrb[18].mxu0 }
 0x106   :  { %v814_v35 = vpop.f32.mrb[19].mxu0 }
 0x109   :  { %v1492_v36 = vpop.f32.mrb[20].mxu0 }
 0x10a   :  { %v817_v37 = vpop.f32.mrb[21].mxu0 }
 0x10d   :  { %v1499_v39 = vpop.f32.mrb[22].mxu0 }
 0x10e   :  { %v820_v40 = vpop.f32.mrb[23].mxu0 }
 0x111   :  { %v1502_v44 = vpop.f32.mrb[24].mxu0 }
 0x112   :  { %v823_v46 = vpop.f32.mrb[25].mxu0 }
 0x115   :  { %v1505_v51 = vpop.f32.mrb[26].mxu0 }
 0x116   :  { %v298_v41 = vpop.f32.mrb[0].mxu1  ;;  %v826_v53 = vpop.f32.mrb[27].mxu0 }
 0x117   :  { %v299_v42 = vadd.f32 %v1497_v38, %v298_v41  ;;  %v300_v43 = vpop.f32.mrb[1].mxu1 }
 0x119   :  { %v509_v45 = vadd.f32 %v508_v16, %v299_v42  ;;  %v1512_v58 = vpop.f32.mrb[28].mxu0 }
 0x11a   :  { %v303_v47 = vpop.f32.mrb[2].mxu1  ;;  %v829_v59 = vpop.f32.mrb[29].mxu0 }
 0x11b   :  { %v652_v48 = vmax.f32 %v509_v45, 0.0  ;;  %v304_v49 = vadd.f32 %v1497_v38, %v303_v47  ;;  %v305_v50 = vpop.f32.mrb[3].mxu1 }
 0x11d   :  { %681 = vst.msk [vmem:[%s1706_s3] sm:$0xff] %vm144_vm1, %v652_v48  ;;  %v514_v52 = vadd.f32 %v513_v18, %v304_v49  ;;  %v1519_v1 = vpop.f32.mrb[30].mxu0 }
 0x11e   :  { %v308_v54 = vpop.f32.mrb[4].mxu1  ;;  %v832_v3 = vpop.f32.mrb[31].mxu0 }
 0x11f   :  { %v653_v55 = vmax.f32 %v514_v52, 0.0  ;;  %v309_v56 = vadd.f32 %v1497_v38, %v308_v54  ;;  %v310_v57 = vpop.f32.mrb[5].mxu1 }
 0x121   :  { %682 = vst.msk [vmem:[%s1706_s3 + $0x8] sm:$0xff] %vm144_vm1, %v653_v55  ;;  %v519_v6 = vadd.f32 %v518_v20, %v309_v56  ;;  %v1526_v0 = vpop.f32.mrb[32].mxu0 }
 0x122   :  { %v313_v60 = vpop.f32.mrb[6].mxu1  ;;  %v835_v10 = vpop.f32.mrb[33].mxu0 }
 0x123   :  { %v654_v61 = vmax.f32 %v519_v6, 0.0  ;;  %v314_v62 = vadd.f32 %v1497_v38, %v313_v60  ;;  %v315_v63 = vpop.f32.mrb[7].mxu1 }
 0x125   :  { %683 = vst.msk [vmem:[%s1706_s3 + $0x10] sm:$0xff] %vm144_vm1, %v654_v61  ;;  %v524_v2 = vadd.f32 %v523_v22, %v314_v62  ;;  %v1533_v15 = vpop.f32.mrb[34].mxu0 }
 0x126   :  { %v318_v4 = vpop.f32.mrb[8].mxu1  ;;  %v838_v17 = vpop.f32.mrb[35].mxu0 }
 0x127   :  { %v655_v5 = vmax.f32 %v524_v2, 0.0  ;;  %v319_v7 = vadd.f32 %v1497_v38, %v318_v4  ;;  %v320_v8 = vpop.f32.mrb[9].mxu1 }
 0x129   :  { %684 = vst.msk [vmem:[%s1706_s3 + $0x18] sm:$0xff] %vm144_vm1, %v655_v5  ;;  %v529_v9 = vadd.f32 %v528_v24, %v319_v7  ;;  %v1540_v22 = vpop.f32.mrb[36].mxu0 }
 0x12a   :  { %v323_v11 = vpop.f32.mrb[10].mxu1  ;;  %v841_v24 = vpop.f32.mrb[37].mxu0 }
 0x12b   :  { %v656_v12 = vmax.f32 %v529_v9, 0.0  ;;  %v324_v13 = vadd.f32 %v1497_v38, %v323_v11  ;;  %v325_v14 = vpop.f32.mrb[11].mxu1 }
 0x12d   :  { %685 = vst.msk [vmem:[%s1706_s3 + $0x20] sm:$0xff] %vm144_vm1, %v656_v12  ;;  %v534_v16 = vadd.f32 %v533_v26, %v324_v13  ;;  %v1548_v31 = vpop.f32.mrb[38].mxu0 }
 0x12e   :  { %v328_v18 = vpop.f32.mrb[12].mxu1  ;;  %v844_v35 = vpop.f32.mrb[39].mxu0 }
 0x12f   :  { %v657_v19 = vmax.f32 %v534_v16, 0.0  ;;  %v329_v20 = vadd.f32 %v1497_v38, %v328_v18  ;;  %v330_v21 = vpop.f32.mrb[13].mxu1 }
 0x131   :  { %686 = vst.msk [vmem:[%s1706_s3 + $0x28] sm:$0xff] %vm144_vm1, %v657_v19  ;;  %v539_v23 = vadd.f32 %v1484_v28, %v329_v20  ;;  %v1556_v42 = vpop.f32.mrb[40].mxu0 }
 0x132   :  { %v333_v25 = vpop.f32.mrb[14].mxu1  ;;  %v847_v45 = vpop.f32.mrb[41].mxu0 }
 0x133   :  { %v658_v27 = vmax.f32 %v539_v23, 0.0  ;;  %v334_v26 = vadd.f32 %v1497_v38, %v333_v25  ;;  %v335_v29 = vpop.f32.mrb[15].mxu1 }
 0x135   :  { %687 = vst.msk [vmem:[%s1706_s3 + $0x30] sm:$0xff] %vm144_vm1, %v658_v27  ;;  %v544_v33 = vadd.f32 %v1486_v30, %v334_v26  ;;  %v1564_v49 = vpop.f32.mrb[42].mxu0 }
 0x136   :  { %v338_v37 = vpop.f32.mrb[16].mxu1  ;;  %v850_v52 = vpop.f32.mrb[43].mxu0 }
 0x137   :  { %v659_v40 = vmax.f32 %v544_v33, 0.0  ;;  %v339_v28 = vadd.f32 %v1497_v38, %v338_v37  ;;  %v340_v41 = vpop.f32.mrb[17].mxu1 }
 0x139   :  { %688 = vst.msk [vmem:[%s1706_s3 + $0x38] sm:$0xff] %vm144_vm1, %v659_v40  ;;  %v549_v43 = vadd.f32 %v1488_v32, %v339_v28  ;;  %v1572_v56 = vpop.f32.mrb[44].mxu0 }
 0x13a   :  { %v343_v46 = vpop.f32.mrb[18].mxu1  ;;  %v853_v6 = vpop.f32.mrb[45].mxu0 }
 0x13b   :  { %v660_v47 = vmax.f32 %v549_v43, 0.0  ;;  %v344_v30 = vadd.f32 %v1497_v38, %v343_v46  ;;  %v345_v48 = vpop.f32.mrb[19].mxu1 }
 0x13d   :  { %689 = vst.msk [vmem:[%s1706_s3 + $0x40] sm:$0xff] %vm144_vm1, %v660_v47  ;;  %v554_v50 = vadd.f32 %v1490_v34, %v344_v30  ;;  %v1580_v62 = vpop.f32.mrb[46].mxu0 }
 0x13e   :  { %v348_v53 = vpop.f32.mrb[20].mxu1  ;;  %v856_v2 = vpop.f32.mrb[47].mxu0 }
 0x13f   :  { %v661_v54 = vmax.f32 %v554_v50, 0.0  ;;  %v349_v32 = vadd.f32 %v1497_v38, %v348_v53  ;;  %v350_v55 = vpop.f32.mrb[21].mxu1 }
 0x141   :  { %690 = vst.msk [vmem:[%s1706_s3 + $0x48] sm:$0xff] %vm144_vm1, %v661_v54  ;;  %v559_v57 = vadd.f32 %v1492_v36, %v349_v32  ;;  %v1588_v7 = vpop.f32.mrb[48].mxu0 }
 0x142   :  { %v353_v59 = vpop.f32.mrb[22].mxu1  ;;  %v859_v9 = vpop.f32.mrb[49].mxu0 }
 0x143   :  { %v662_v60 = vmax.f32 %v559_v57, 0.0  ;;  %v354_v34 = vadd.f32 %v1497_v38, %v353_v59  ;;  %v355_v61 = vpop.f32.mrb[23].mxu1 }
 0x145   :  { %691 = vst.msk [vmem:[%s1706_s3 + $0x50] sm:$0xff] %vm144_vm1, %v662_v60  ;;  %v564_v63 = vadd.f32 %v1499_v39, %v354_v34  ;;  %v1596_v13 = vpop.f32.mrb[50].mxu0 }
 0x146   :  { %v358_v3 = vpop.f32.mrb[24].mxu1  ;;  %v862_v16 = vpop.f32.mrb[51].mxu0 }
 0x147   :  { %v663_v4 = vmax.f32 %v564_v63, 0.0  ;;  %v359_v36 = vadd.f32 %v1497_v38, %v358_v3  ;;  %v360_v5 = vpop.f32.mrb[25].mxu1 }
 0x149   :  { %692 = vst.msk [vmem:[%s1706_s3 + $0x58] sm:$0xff] %vm144_vm1, %v663_v4  ;;  %v569_v8 = vadd.f32 %v1502_v44, %v359_v36  ;;  %v1604_v20 = vpop.f32.mrb[52].mxu0 }
 0x14a   :  { %v363_v10 = vpop.f32.mrb[26].mxu1  ;;  %v865_v23 = vpop.f32.mrb[53].mxu0 }
 0x14b   :  { %v664_v11 = vmax.f32 %v569_v8, 0.0  ;;  %v364_v39 = vadd.f32 %v1497_v38, %v363_v10  ;;  %v365_v12 = vpop.f32.mrb[27].mxu1 }
 0x14d   :  { %693 = vst.msk [vmem:[%s1706_s3 + $0x60] sm:$0xff] %vm144_vm1, %v664_v11  ;;  %v574_v14 = vadd.f32 %v1505_v51, %v364_v39  ;;  %v1612_v26 = vpop.f32.mrb[54].mxu0 }
 0x14e   :  { %v368_v17 = vpop.f32.mrb[28].mxu1  ;;  %v868_v33 = vpop.f32.mrb[55].mxu0 }
 0x14f   :  { %v665_v18 = vmax.f32 %v574_v14, 0.0  ;;  %v369_v44 = vadd.f32 %v1497_v38, %v368_v17  ;;  %v370_v19 = vpop.f32.mrb[29].mxu1 }
 0x151   :  { %694 = vst.msk [vmem:[%s1706_s3 + $0x68] sm:$0xff] %vm144_vm1, %v665_v18  ;;  %v579_v21 = vadd.f32 %v1512_v58, %v369_v44  ;;  %v1620_v28 = vpop.f32.mrb[56].mxu0 }
 0x152   :  { %v373_v24 = vpop.f32.mrb[30].mxu1  ;;  %v871_v43 = vpop.f32.mrb[57].mxu0 }
 0x153   :  { %v666_v25 = vmax.f32 %v579_v21, 0.0  ;;  %v374_v51 = vadd.f32 %v1497_v38, %v373_v24  ;;  %v375_v27 = vpop.f32.mrb[31].mxu1 }
 0x155   :  { %695 = vst.msk [vmem:[%s1706_s3 + $0x70] sm:$0xff] %vm144_vm1, %v666_v25  ;;  %v584_v29 = vadd.f32 %v1519_v1, %v374_v51 }
 0x156   :  { %v378_v35 = vpop.f32.mrb[32].mxu1 }
 0x157   :  { %v667_v37 = vmax.f32 %v584_v29, 0.0  ;;  %v379_v58 = vadd.f32 %v1497_v38, %v378_v35  ;;  %v380_v40 = vpop.f32.mrb[33].mxu1 }
 0x159   :  { %696 = vst.msk [vmem:[%s1706_s3 + $0x78] sm:$0xff] %vm144_vm1, %v667_v37  ;;  %v589_v41 = vadd.f32 %v1526_v0, %v379_v58 }
 0x15a   :  { %v383_v45 = vpop.f32.mrb[34].mxu1 }
 0x15b   :  { %v668_v46 = vmax.f32 %v589_v41, 0.0  ;;  %v384_v1 = vadd.f32 %v1497_v38, %v383_v45  ;;  %v385_v47 = vpop.f32.mrb[35].mxu1 }
 0x15d   :  { %697 = vst.msk [vmem:[%s1706_s3 + $0x80] sm:$0xff] %vm144_vm1, %v668_v46  ;;  %v594_v30 = vadd.f32 %v1533_v15, %v384_v1 }
 0x15e   :  { %v388_v48 = vpop.f32.mrb[36].mxu1 }
 0x15f   :  { %v669_v50 = vmax.f32 %v594_v30, 0.0  ;;  %v389_v52 = vadd.f32 %v1497_v38, %v388_v48  ;;  %v390_v53 = vpop.f32.mrb[37].mxu1 }
 0x161   :  { %698 = vst.msk [vmem:[%s1706_s3 + $0x88] sm:$0xff] %vm144_vm1, %v669_v50  ;;  %v599_v0 = vadd.f32 %v1540_v22, %v389_v52 }
 0x162   :  { %v393_v54 = vpop.f32.mrb[38].mxu1 }
 0x163   :  { %v670_v32 = vmax.f32 %v599_v0, 0.0  ;;  %v394_v55 = vadd.f32 %v1497_v38, %v393_v54  ;;  %v395_v57 = vpop.f32.mrb[39].mxu1 }
 0x165   :  { %699 = vst.msk [vmem:[%s1706_s3 + $0x90] sm:$0xff] %vm144_vm1, %v670_v32  ;;  %v604_v15 = vadd.f32 %v1548_v31, %v394_v55 }
 0x166   :  { %v398_v6 = vpop.f32.mrb[40].mxu1 }
 0x167   :  { %v671_v59 = vmax.f32 %v604_v15, 0.0  ;;  %v399_v60 = vadd.f32 %v1497_v38, %v398_v6  ;;  %v400_v34 = vpop.f32.mrb[41].mxu1 }
 0x169   :  { %700 = vst.msk [vmem:[%s1706_s3 + $0x98] sm:$0xff] %vm144_vm1, %v671_v59  ;;  %v609_v22 = vadd.f32 %v1556_v42, %v399_v60 }
 0x16a   :  { %v403_v61 = vpop.f32.mrb[42].mxu1 }
 0x16b   :  { %v672_v63 = vmax.f32 %v609_v22, 0.0  ;;  %v404_v2 = vadd.f32 %v1497_v38, %v403_v61  ;;  %v405_v3 = vpop.f32.mrb[43].mxu1 }
 0x16d   :  { %701 = vst.msk [vmem:[%s1706_s3 + $0xa0] sm:$0xff] %vm144_vm1, %v672_v63  ;;  %v614_v31 = vadd.f32 %v1564_v49, %v404_v2 }
 0x16e   :  { %v408_v4 = vpop.f32.mrb[44].mxu1 }
 0x16f   :  { %v673_v36 = vmax.f32 %v614_v31, 0.0  ;;  %v409_v5 = vadd.f32 %v1497_v38, %v408_v4  ;;  %v410_v8 = vpop.f32.mrb[45].mxu1 }
 0x171   :  { %702 = vst.msk [vmem:[%s1706_s3 + $0xa8] sm:$0xff] %vm144_vm1, %v673_v36  ;;  %v619_v42 = vadd.f32 %v1572_v56, %v409_v5 }
 0x172   :  { %v413_v9 = vpop.f32.mrb[46].mxu1 }
 0x173   :  { %v674_v10 = vmax.f32 %v619_v42, 0.0  ;;  %v414_v11 = vadd.f32 %v1497_v38, %v413_v9  ;;  %v415_v39 = vpop.f32.mrb[47].mxu1 }
 0x175   :  { %703 = vst.msk [vmem:[%s1706_s3 + $0xb0] sm:$0xff] %vm144_vm1, %v674_v10  ;;  %v624_v49 = vadd.f32 %v1580_v62, %v414_v11 }
 0x176   :  { %v418_v12 = vpop.f32.mrb[48].mxu1 }
 0x177   :  { %v675_v14 = vmax.f32 %v624_v49, 0.0  ;;  %v419_v16 = vadd.f32 %v1497_v38, %v418_v12  ;;  %v420_v17 = vpop.f32.mrb[49].mxu1 }
 0x179   :  { %704 = vst.msk [vmem:[%s1706_s3 + $0xb8] sm:$0xff] %vm144_vm1, %v675_v14  ;;  %v629_v56 = vadd.f32 %v1588_v7, %v419_v16 }
 0x17a   :  { %v423_v18 = vpop.f32.mrb[50].mxu1 }
 0x17b   :  { %v676_v44 = vmax.f32 %v629_v56, 0.0  ;;  %v424_v19 = vadd.f32 %v1497_v38, %v423_v18  ;;  %v425_v21 = vpop.f32.mrb[51].mxu1 }
 0x17d   :  { %705 = vst.msk [vmem:[%s1706_s3 + $0xc0] sm:$0xff] %vm144_vm1, %v676_v44  ;;  %v634_v62 = vadd.f32 %v1596_v13, %v424_v19 }
 0x17e   :  { %v428_v23 = vpop.f32.mrb[52].mxu1 }
 0x17f   :  { %v677_v24 = vmax.f32 %v634_v62, 0.0  ;;  %v429_v25 = vadd.f32 %v1497_v38, %v428_v23  ;;  %v430_v51 = vpop.f32.mrb[53].mxu1 }
 0x181   :  { %706 = vst.msk [vmem:[%s1706_s3 + $0xc8] sm:$0xff] %vm144_vm1, %v677_v24  ;;  %v639_v7 = vadd.f32 %v1604_v20, %v429_v25 }
 0x182   :  { %v433_v27 = vpop.f32.mrb[54].mxu1 }
 0x183   :  { %v678_v29 = vmax.f32 %v639_v7, 0.0  ;;  %v434_v33 = vadd.f32 %v1497_v38, %v433_v27  ;;  %v435_v35 = vpop.f32.mrb[55].mxu1 }
 0x185   :  { %707 = vst.msk [vmem:[%s1706_s3 + $0xd0] sm:$0xff] %vm144_vm1, %v678_v29  ;;  %v644_v13 = vadd.f32 %v1612_v26, %v434_v33 }
 0x186   :  { %v438_v37 = vpop.f32.mrb[56].mxu1 }
 0x187   :  { %v679_v58 = vmax.f32 %v644_v13, 0.0  ;;  %v439_v40 = vadd.f32 %v1497_v38, %v438_v37  ;;  %v440_v41 = vpop.f32.mrb[57].mxu1 }
 0x189   :  { %708 = vst.msk [vmem:[%s1706_s3 + $0xd8] sm:$0xff] %vm144_vm1, %v679_v58  ;;  %v649_v20 = vadd.f32 %v1620_v28, %v439_v40 }
 0x18b   :  { %v680_v43 = vmax.f32 %v649_v20, 0.0 }
 0x18d   :  { %709 = vst.msk [vmem:[%s1706_s3 + $0xe0] sm:$0xff] %vm144_vm1, %v680_v43 }

// kernel: transformer_encoder_forward.12
= control target key start
LH: loop header
LB: loop body
LE: loop exit
PB: predicated region body
PF: predicated region fallthrough
CT: control target
= control target key end

     0   :  { %s807_s15 = smov 0   ;;  %s1079_s0 = inlined_call_operand.vmem [shape: f32[2,8,608], index: 0, kind: input, shape index: {}]   ;;  %s1080_s1 = inlined_call_operand.vmem [shape: f32[608,32], index: 1, kind: input, shape index: {}]   ;;  %s1081_s2 = inlined_call_operand.vmem [shape: f32[1,32], index: 2, kind: input, shape index: {}]   ;;  %s1082_s3 = inlined_call_operand.vmem [shape: f32[1,8,32], index: 3, kind: input, shape index: {}]   ;;  %s1083_s4 = inlined_call_operand.vmem [shape: f32[2,8,32], index: 4, kind: output, shape index: {}]  }
   0x1 LB: > { %s556_s16 = sadd.s32 4294967295, %s777_s15   ;;  %p560_p0 = scmp.ge.s32.totalorder %s777_s15, 1  ;;  %s777_s15 = sphi %s807_s15, %s14_s15  }
   0x2   : > { %p162_p1 = scmp.lt.s32.totalorder %s777_s15, 3 }
   0x4   : > { %p163_p2 = pnand %p560_p0, %p162_p1 }
   0x5   : > { %v217_v0 = vld [vmem:[%s1080_s1 + $0x80] sm:$0xff] (!%p163_p2)  ;;  %v218_v1 = vld [vmem:[%s1080_s1 + $0x88] sm:$0xff] (!%p163_p2)  ;;  %v219_v11 = vld [vmem:[%s1080_s1 + $0x90] sm:$0xff] (!%p163_p2)  ;;  %p871_p3 = scmp.lt.s32.totalorder (!%p163_p2), %s556_s16, 1  ;;  %vm780_vm0 = vmmov (!%p163_p2), 0   ;;  %vm284_vm1 = vcmask (!%p163_p2), 785408  }
   0x6   : > { %166 = sbr.rel (%p163_p2) target bundleno = 283 (0x11b), region = 36  ;;  %v201_v2 = vld [vmem:[%s1080_s1] sm:$0xff] (!%p163_p2)  ;;  %v677_v3 = vpack.c.bf16 (!%p163_p2), %v218_v1, %v217_v0  ;;  %v202_v4 = vld [vmem:[%s1080_s1 + $0x8] sm:$0xff] (!%p163_p2)  ;;  %v220_v13 = vld [vmem:[%s1080_s1 + $0x98] sm:$0xff] (!%p163_p2)  ;;  %vm501_vm2 = vcmask (!%p163_p2), 261120  }
   0x7   : > { %v249_v5 = vld [vmem:[%s1080_s1 + $0x180] sm:$0xff] (!%p163_p2)  ;;  %v250_v6 = vld [vmem:[%s1080_s1 + $0x188] sm:$0xff] (!%p163_p2)  ;;  %v679_v7 = vpack.c.bf16 (!%p163_p2), %v202_v4, %v201_v2  ;;  %v203_v14 = vld [vmem:[%s1080_s1 + $0x10] sm:$0xff] (!%p163_p2)  ;;  %v681_v16 = vpack.c.bf16 (!%p163_p2), %v220_v13, %v219_v11 }
   0x8   : > { %v709_v8 = vpack.c.bf16 (!%p163_p2), %v250_v6, %v249_v5  ;;  %v233_v9 = vld [vmem:[%s1080_s1 + $0x100] sm:$0xff] (!%p163_p2)  ;;  %v234_v10 = vld [vmem:[%s1080_s1 + $0x108] sm:$0xff] (!%p163_p2)  ;;  %678 = vmatprep.subr.bf16.mxu0 (!%p163_p2), %v677_v3  ;;  %v204_v15 = vld [vmem:[%s1080_s1 + $0x18] sm:$0xff] (!%p163_p2) }
   0x9   : > { %v711_v12 = vpack.c.bf16 (!%p163_p2), %v234_v10, %v233_v9  ;;  %680 = vmatpush3.bf16.msra.mxu0 (!%p163_p2), %v679_v7  ;;  %v683_v17 = vpack.c.bf16 (!%p163_p2), %v204_v15, %v203_v14  ;;  %v251_v18 = vld [vmem:[%s1080_s1 + $0x190] sm:$0xff] (!%p163_p2)  ;;  %v252_v19 = vld [vmem:[%s1080_s1 + $0x198] sm:$0xff] (!%p163_p2)  ;;  %v221_v23 = vld [vmem:[%s1080_s1 + $0xa0] sm:$0xff] (!%p163_p2) }
   0xa   : > { %710 = vmatprep.subr.bf16.mxu1 (!%p163_p2), %v709_v8  ;;  %v235_v20 = vld [vmem:[%s1080_s1 + $0x110] sm:$0xff] (!%p163_p2)  ;;  %v713_v21 = vpack.c.bf16 (!%p163_p2), %v252_v19, %v251_v18  ;;  %v236_v22 = vld [vmem:[%s1080_s1 + $0x118] sm:$0xff] (!%p163_p2)  ;;  %v222_v24 = vld [vmem:[%s1080_s1 + $0xa8] sm:$0xff] (!%p163_p2)  ;;  %682 = vmatprep.subr.bf16.mxu0 (!%p163_p2), %v681_v16 }
   0xb   : > { %712 = vmatpush3.bf16.msra.mxu1 (!%p163_p2), %v711_v12  ;;  %v715_v25 = vpack.c.bf16 (!%p163_p2), %v236_v22, %v235_v20  ;;  %v685_v26 = vpack.c.bf16 (!%p163_p2), %v222_v24, %v221_v23  ;;  %v205_v27 = vld [vmem:[%s1080_s1 + $0x20] sm:$0xff] (!%p163_p2)  ;;  %v206_v28 = vld [vmem:[%s1080_s1 + $0x28] sm:$0xff] (!%p163_p2)  ;;  %v223_v35 = vld [vmem:[%s1080_s1 + $0xb0] sm:$0xff] (!%p163_p2) }
   0xc   : > { %v253_v29 = vld [vmem:[%s1080_s1 + $0x1a0] sm:$0xff] (!%p163_p2)  ;;  %714 = vmatprep.subr.bf16.mxu1 (!%p163_p2), %v713_v21  ;;  %v254_v30 = vld [vmem:[%s1080_s1 + $0x1a8] sm:$0xff] (!%p163_p2)  ;;  %v687_v33 = vpack.c.bf16 (!%p163_p2), %v206_v28, %v205_v27  ;;  %v224_v36 = vld [vmem:[%s1080_s1 + $0xb8] sm:$0xff] (!%p163_p2) }
   0xd   : > { %v237_v31 = vld [vmem:[%s1080_s1 + $0x120] sm:$0xff]  ;;  %v238_v32 = vld [vmem:[%s1080_s1 + $0x128] sm:$0xff]  ;;  %684 = vmatpush3.bf16.msra.mxu0 %v683_v17  ;;  %v717_v34 = vpack.c.bf16 %v254_v30, %v253_v29  ;;  %v207_v37 = vld [vmem:[%s1080_s1 + $0x30] sm:$0xff]  ;;  %v689_v39 = vpack.c.bf16 %v224_v36, %v223_v35  ;;  %s1086_s16 = smov (!%p871_p3, %s556_s16), 1 }
   0xe   : > { %686 = vmatprep.subr.bf16.mxu0 %v685_v26  ;;  %v719_v38 = vpack.c.bf16 %v238_v32, %v237_v31  ;;  %v208_v40 = vld [vmem:[%s1080_s1 + $0x38] sm:$0xff]  ;;  %v255_v41 = vld [vmem:[%s1080_s1 + $0x1b0] sm:$0xff]  ;;  %v225_v46 = vld [vmem:[%s1080_s1 + $0xc0] sm:$0xff]  ;;  %s759_s24 = smul.u32 40, %s1086_s16  ;;  %s562_s9 = sshll.u32 %s1086_s16, 3 }
   0xf   : > { %716 = vmatpush3.bf16.msra.mxu1 %v715_v25  ;;  %v256_v42 = vld [vmem:[%s1080_s1 + $0x1b8] sm:$0xff]  ;;  %v239_v44 = vld [vmem:[%s1080_s1 + $0x130] sm:$0xff]  ;;  %v226_v47 = vld [vmem:[%s1080_s1 + $0xc8] sm:$0xff]  ;;  %v691_v48 = vpack.c.bf16 %v208_v40, %v207_v37  ;;  %s195_s29 = scalar_lea.vmem %s1083_s4, %s562_s9 }
  0x10   : > { %718 = vmatprep.subr.bf16.mxu1 %v717_v34  ;;  %v721_v43 = vpack.c.bf16 %v256_v42, %v255_v41  ;;  %v240_v45 = vld [vmem:[%s1080_s1 + $0x138] sm:$0xff]  ;;  %v257_v49 = vld [vmem:[%s1080_s1 + $0x1c0] sm:$0xff]  ;;  %v258_v50 = vld [vmem:[%s1080_s1 + $0x1c8] sm:$0xff]  ;;  %v693_v52 = vpack.c.bf16 %v226_v47, %v225_v46  ;;  %s972_s19 = scalar_lea.vmem %s1079_s0, %s759_s24 }
  0x11   : > { %688 = vmatpush3.bf16.msra.mxu0 %v687_v33  ;;  %v723_v51 = vpack.c.bf16 %v240_v45, %v239_v44  ;;  %v209_v53 = vld [vmem:[%s1080_s1 + $0x40] sm:$0xff]  ;;  %v210_v54 = vld [vmem:[%s1080_s1 + $0x48] sm:$0xff]  ;;  %v725_v56 = vpack.c.bf16 %v258_v50, %v257_v49  ;;  %v227_v58 = vld [vmem:[%s1080_s1 + $0xd0] sm:$0xff]  ;;  %v781_v45 = vmov 0.0  }
  0x12   : > { %690 = vmatprep.subr.bf16.mxu0 %v689_v39  ;;  %v241_v55 = vld [vmem:[%s1080_s1 + $0x140] sm:$0xff]  ;;  %v242_v57 = vld [vmem:[%s1080_s1 + $0x148] sm:$0xff]  ;;  %v228_v59 = vld [vmem:[%s1080_s1 + $0xd8] sm:$0xff]  ;;  %v695_v62 = vpack.c.bf16 %v210_v54, %v209_v53 }
  0x13   : > { %720 = vmatpush3.bf16.msra.mxu1 %v719_v38  ;;  %v259_v60 = vld [vmem:[%s1080_s1 + $0x1d0] sm:$0xff]  ;;  %v260_v61 = vld [vmem:[%s1080_s1 + $0x1d8] sm:$0xff]  ;;  %v727_v63 = vpack.c.bf16 %v242_v57, %v241_v55  ;;  %v697_v0 = vpack.c.bf16 %v228_v59, %v227_v58  ;;  %v229_v6 = vld [vmem:[%s1080_s1 + $0xe0] sm:$0xff]  ;;  %v779_v38 = vmov 0.0|0.0  }
  0x14   : > { %722 = vmatprep.subr.bf16.mxu1 %v721_v43  ;;  %v211_v1 = vld [vmem:[%s1080_s1 + $0x50] sm:$0xff]  ;;  %v212_v2 = vld [vmem:[%s1080_s1 + $0x58] sm:$0xff]  ;;  %v729_v4 = vpack.c.bf16 %v260_v61, %v259_v60  ;;  %v230_v7 = vld [vmem:[%s1080_s1 + $0xe8] sm:$0xff] }
  0x15   : > { %692 = vmatpush3.bf16.msra.mxu0 %v691_v48  ;;  %v243_v3 = vld [vmem:[%s1080_s1 + $0x150] sm:$0xff]  ;;  %v244_v5 = vld [vmem:[%s1080_s1 + $0x158] sm:$0xff]  ;;  %v261_v8 = vld [vmem:[%s1080_s1 + $0x1e0] sm:$0xff]  ;;  %v699_v10 = vpack.c.bf16 %v212_v2, %v211_v1  ;;  %v701_v14 = vpack.c.bf16 %v230_v7, %v229_v6 }
  0x16   : > { %694 = vmatprep.subr.bf16.mxu0 %v693_v52  ;;  %v262_v9 = vld [vmem:[%s1080_s1 + $0x1e8] sm:$0xff]  ;;  %v213_v11 = vld [vmem:[%s1080_s1 + $0x60] sm:$0xff]  ;;  %v731_v13 = vpack.c.bf16 %v244_v5, %v243_v3  ;;  %v231_v19 = vld [vmem:[%s1080_s1 + $0xf0] sm:$0xff] }
  0x17   : > { %724 = vmatpush3.bf16.msra.mxu1 %v723_v51  ;;  %v197_v12 = vld [vmem:[%s972_s19 + $0x8] sm:$0xff]  ;;  %v245_v16 = vld [vmem:[%s1080_s1 + $0x160] sm:$0xff]  ;;  %v733_v18 = vpack.c.bf16 %v262_v9, %v261_v8  ;;  %v232_v20 = vld [vmem:[%s1080_s1 + $0xf8] sm:$0xff] }
  0x18   : > { %726 = vmatprep.subr.bf16.mxu1 %v725_v56  ;;  %v214_v15 = vld [vmem:[%s1080_s1 + $0x68] sm:$0xff]  ;;  %352 = vmatprep.mubr.f32.mxu0 %v197_v12  ;;  %v199_v21 = vld [vmem:[%s972_s19 + $0x18] sm:$0xff]  ;;  %v263_v22 = vld [vmem:[%s1080_s1 + $0x1f0] sm:$0xff]  ;;  %v705_v26 = vpack.c.bf16 %v232_v20, %v231_v19 }
  0x19   : > { %696 = vmatpush3.bf16.msra.mxu0 %v695_v62  ;;  %v246_v17 = vld [vmem:[%s1080_s1 + $0x168] sm:$0xff]  ;;  %v264_v23 = vld [vmem:[%s1080_s1 + $0x1f8] sm:$0xff]  ;;  %422 = vmatprep.mubr.f32.mxu1 %v199_v21  ;;  %v703_v24 = vpack.c.bf16 %v214_v15, %v213_v11  ;;  %v215_v27 = vld [vmem:[%s1080_s1 + $0x70] sm:$0xff] }
  0x1a   : > { %698 = vmatprep.subr.bf16.mxu0 %v697_v0  ;;  %v735_v25 = vpack.c.bf16 %v246_v17, %v245_v16  ;;  %v216_v28 = vld [vmem:[%s1080_s1 + $0x78] sm:$0xff]  ;;  %v737_v29 = vpack.c.bf16 %v264_v23, %v263_v22  ;;  %v247_v30 = vld [vmem:[%s1080_s1 + $0x170] sm:$0xff]  ;;  %v265_v34 = vld [vmem:[%s1080_s1 + $0x200] sm:$0xff] }
  0x1b   : > { %728 = vmatpush3.bf16.msra.mxu1 %v727_v63  ;;  %v248_v31 = vld [vmem:[%s1080_s1 + $0x178] sm:$0xff]  ;;  %v707_v32 = vpack.c.bf16 %v216_v28, %v215_v27  ;;  %v266_v35 = vld [vmem:[%s1080_s1 + $0x208] sm:$0xff]  ;;  %v196_v36 = vld [vmem:[%s972_s19] sm:$0xff] }
  0x1c   : > { %730 = vmatprep.subr.bf16.mxu1 %v729_v4  ;;  %v739_v33 = vpack.c.bf16 %v248_v31, %v247_v30  ;;  %v742_v37 = vpack.c.bf16 %v266_v35, %v265_v34  ;;  %v198_v39 = vld [vmem:[%s972_s19 + $0x10] sm:$0xff]  ;;  %v268_v41 = vld [vmem:[%s1080_s1 + $0x218] sm:$0xff]  ;;  %v269_v43 = vld [vmem:[%s1080_s1 + $0x220] sm:$0xff] }
  0x1d   : > { %700 = vmatpush3.bf16.msra.mxu0 %v699_v10  ;;  %v267_v40 = vld [vmem:[%s1080_s1 + $0x210] sm:$0xff]  ;;  %v270_v44 = vld [vmem:[%s1080_s1 + $0x228] sm:$0xff]  ;;  %v272_v48 = vld [vmem:[%s1080_s1 + $0x238] sm:$0xff] }
  0x1e   : > { %702 = vmatprep.subr.bf16.mxu0 %v701_v14  ;;  %v745_v42 = vpack.c.bf16 %v268_v41, %v267_v40  ;;  %v748_v46 = vpack.c.bf16 %v270_v44, %v269_v43  ;;  %v271_v47 = vld [vmem:[%s1080_s1 + $0x230] sm:$0xff]  ;;  %v273_v50 = vld [vmem:[%s1080_s1 + $0x240] sm:$0xff]  ;;  %v274_v51 = vld [vmem:[%s1080_s1 + $0x248] sm:$0xff] }
  0x1f   : > { %732 = vmatpush3.bf16.msra.mxu1 %v731_v13  ;;  %v751_v49 = vpack.c.bf16 %v272_v48, %v271_v47  ;;  %v754_v52 = vpack.c.bf16 %v274_v51, %v273_v50  ;;  %v275_v53 = vld [vmem:[%s1080_s1 + $0x250] sm:$0xff]  ;;  %v276_v54 = vld [vmem:[%s1080_s1 + $0x258] sm:$0xff]  ;;  %v200_v56 = vld [vmem:[%s972_s19 + $0x20] sm:$0xff] }
  0x20   : > { %734 = vmatprep.subr.bf16.mxu1 %v733_v18  ;;  %v757_v55 = vpack.c.bf16 %v276_v54, %v275_v53  ;;  %v563_v58 = vld [vmem:[%s1081_s2] ss:$0 sm:$0xff] }
  0x21   : > { %704 = vmatpush3.bf16.msra.mxu0 %v703_v24  ;;  %v499_v5 = vld [vmem:[%s1082_s3] sm:$0xff] }
  0x22   : > { %706 = vmatprep.subr.bf16.mxu0 %v705_v26 }
  0x23   : > { %736 = vmatpush3.bf16.msra.mxu1 %v735_v25 }
  0x24   : > { %738 = vmatprep.subr.bf16.mxu1 %v737_v29 }
  0x25   : > { %708 = vmatpush3.bf16.msra.mxu0 %v707_v32 }
  0x26   : > { %741 = vmatprep.subr.bf16.mxu0 %v779_v38 }
  0x27   : > { %740 = vmatpush3.bf16.msra.mxu1 %v739_v33 }
  0x28   : > { %353 = vmatmul.mubr.f32.vlgmr.msra.gmra.mrb[0].mxu0 %v196_v36 }
  0x29   : > { %743 = vmatpush3.bf16.msra.mxu0 %v742_v37  ;;  %674 = vmatprep.mubr.msk.f32.mxu0 %vm780_vm0, %v781_v45 }
  0x2a   : > { %423 = vmatmul.mubr.f32.vlgmr.msra.gmra.mrb[0].mxu1 %v198_v39  ;;  %744 = vmatprep.subr.bf16.mxu0 %v779_v38 }
  0x2d   : > { %746 = vmatpush3.bf16.msra.mxu0 %v745_v42 }
  0x2e   : > { %747 = vmatprep.subr.bf16.mxu0 %v779_v38 }
  0x31   : > { %749 = vmatpush3.bf16.msra.mxu0 %v748_v46 }
  0x32   : > { %750 = vmatprep.subr.bf16.mxu0 %v779_v38 }
  0x35   : > { %752 = vmatpush3.bf16.msra.mxu0 %v751_v49 }
  0x36   : > { %753 = vmatprep.subr.bf16.mxu0 %v779_v38 }
  0x39   : > { %755 = vmatpush3.bf16.msra.mxu0 %v754_v52 }
  0x3a   : > { %756 = vmatprep.subr.bf16.mxu0 %v779_v38 }
  0x3d   : > { %758 = vmatpush3.bf16.msra.mxu0 %v757_v55 }
  0x40   : > { %675 = vmatmul.mubr.msk.f32.vlgmr.msra.gmra.mrb[2].mxu0 %vm284_vm1, %v200_v56 }
  0xfb   : > { %v599_v57 = vpop.f32.mrb[0].mxu0 }
  0xfc   : > { %v600_v59 = vpop.f32.mrb[1].mxu0 }
  0xfd   : > { %v634_v60 = vpop.f32.mrb[0].mxu1  ;;  %v601_v61 = vadd.f32 %v600_v59, %v599_v57 }
  0xfe   : > { %v635_v62 = vpop.f32.mrb[1].mxu1 }
  0xff   : > { %v636_v63 = vadd.f32 %v635_v62, %v634_v60  ;;  %v355_v0 = vadd.f32 %v601_v61, %v563_v58 }
 0x101   : > { %v425_v1 = vadd.f32 %v636_v63, %v355_v0 }
 0x113   : > { %v494_v2 = vpop.f32.mrb[2].mxu0 }
 0x114   : > { %v495_v3 = vadd.f32 %v494_v2, %v425_v1  ;;  %v676_v4 = vpop.f32.mrb[3].mxu0 }
 0x116   : > { %v498_v6 = vmul.f32 5.656854, %v495_v3 }
 0x118   : > { %v500_v7 = vadd.f32 %v499_v5, %v498_v6 }
 0x11a   : > { %502 = vst.msk [vmem:[%s195_s29] sm:$0xff] %vm501_vm2, %v500_v7 }
 0x11b PF: > { %s14_s15 = sadd.s32 1, %s777_s15  }
 0x11c   : > { %p11_p4 = scmp.ge.s32.totalorder %s14_s15, 4  }
 0x11e   :  { %13 = sbr.rel (!%p11_p4) target bundleno = 1 (0x1), region = 66 }

// kernel: transformer_encoder_forward.13
= control target key start
LH: loop header
LB: loop body
LE: loop exit
PB: predicated region body
PF: predicated region fallthrough
CT: control target
= control target key end

     0   :  { %vm24_vm0 = vcmask 261120   ;;  %vm160_vm1 = vcmask 785408   ;;  %s270_s0 = inlined_call_operand.vmem [shape: f32[16,32], index: 0, kind: input, shape index: {}]   ;;  %s271_s3 = inlined_call_operand.vmem [shape: f32[32,96], index: 3, kind: input, shape index: {}]   ;;  %s272_s1 = inlined_call_operand.vmem [shape: f32[1,32], index: 1, kind: input, shape index: {}]   ;;  %s273_s2 = inlined_call_operand.vmem [shape: f32[1,32], index: 2, kind: input, shape index: {}]   ;;  %s274_s4 = inlined_call_operand.vmem [shape: f32[1,96], index: 4, kind: input, shape index: {}]   ;;  %s275_s5 = inlined_call_operand.vmem [shape: f32[16,96], index: 5, kind: output, shape index: {}]  }
   0x1   :  { %v20_v0 = vld [vmem:[%s270_s0] sm:$0xff]  ;;  %v21_v1 = vld [vmem:[%s270_s0 + $0x8] sm:$0xff]  ;;  %v70_v16 = vld [vmem:[%s271_s3 + $0x10] sm:$0xff] }
   0x2   :  { %v25_v2 = vsel %vm24_vm0, %v20_v0, 0.0  ;;  %v28_v3 = vsel %vm24_vm0, %v21_v1, 0.0  ;;  %v68_v14 = vld [vmem:[%s271_s3] sm:$0xff]  ;;  %v69_v15 = vld [vmem:[%s271_s3 + $0x8] sm:$0xff]  ;;  %v71_v18 = vld [vmem:[%s271_s3 + $0x18] sm:$0xff] }
   0x3   :  { %26 = vadd.xlane.f32.xlu0 %v25_v2  ;;  %v189_v17 = vpack.c.bf16 %v69_v15, %v68_v14  ;;  %v193_v19 = vpack.c.bf16 %v71_v18, %v70_v16  ;;  %v167_v27 = vld [vmem:[%s272_s1] ss:$0 sm:$0xff] }
   0x4   :  { %v168_v29 = vld [vmem:[%s273_s2] ss:$0 sm:$0xff] }
   0x5   :  { %190 = vmatprep.subr.bf16.mxu0 %v189_v17  ;;  %v169_v36 = vld [vmem:[%s274_s4] ss:$0 sm:$0xff] }
   0x6   :  { %192 = vmatpush3.bf16.msra.mxu0 %v189_v17 }
   0x7   :  { %29 = vadd.xlane.f32.xlu0 %v28_v3  ;;  %194 = vmatprep.subr.bf16.mxu0 %v193_v19 }
   0xa   :  { %196 = vmatpush3.bf16.msra.mxu0 %v193_v19 }
  0x90   :  { %v27_v4 = vpop.xlane.xlu0 %26 }
  0x91   :  { %v32_v5 = vmul.f32 0.03125, %v27_v4 }
  0x93   :  { %v34_v6 = vsub.f32 %v20_v0, %v32_v5 }
  0x94   :  { %v30_v7 = vpop.xlane.xlu0 %29 }
  0x95   :  { %v33_v8 = vmul.f32 0.03125, %v30_v7  ;;  %v36_v9 = vmul.f32 %v34_v6, %v34_v6 }
  0x97   :  { %v35_v10 = vsub.f32 %v21_v1, %v33_v8  ;;  %v38_v11 = vsel %vm24_vm0, %v36_v9, 0.0 }
  0x98   :  { %39 = vadd.xlane.f32.xlu1 %v38_v11 }
  0x99   :  { %v37_v12 = vmul.f32 %v35_v10, %v35_v10 }
  0x9b   :  { %v41_v13 = vsel %vm24_vm0, %v37_v12, 0.0 }
  0x9c   :  { %42 = vadd.xlane.f32.xlu1 %v41_v13 }
 0x125   :  { %v40_v20 = vpop.xlane.xlu1 %39 }
 0x126   :  { %v44_v21 = vmul.f32 0.03125, %v40_v20 }
 0x128   :  { %v46_v22 = vadd.f32 1e-12, %v44_v21 }
 0x129   :  { %v43_v23 = vpop.xlane.xlu1 %42 }
 0x12a   :  { %197 = vrsqrt.f32 %v46_v22  ;;  %v45_v24 = vmul.f32 0.03125, %v43_v23 }
 0x12c   :  { %v47_v25 = vadd.f32 1e-12, %v45_v24 }
 0x12e   :  { %199 = vrsqrt.f32 %v47_v25 }
 0x134   :  { %v198_v26 = vpop.eup %197 }
 0x135   :  { %v50_v28 = vmul.f32 %v198_v26, %v34_v6 }
 0x137   :  { %v58_v30 = vmul.f32 %v167_v27, %v50_v28 }
 0x138   :  { %v200_v31 = vpop.eup %199 }
 0x139   :  { %v51_v32 = vmul.f32 %v200_v31, %v35_v10  ;;  %v66_v33 = vadd.f32 %v168_v29, %v58_v30 }
 0x13b   :  { %v59_v34 = vmul.f32 %v167_v27, %v51_v32  ;;  %186 = vmatprep.mubr.msk.f32.mxu0 %vm24_vm0, %v66_v33 }
 0x13d   :  { %v67_v35 = vadd.f32 %v168_v29, %v59_v34 }
 0x13f   :  { %187 = vmatmul.mubr.msk.f32.vlgmr.msra.gmra.mrb[0].mxu0 %vm24_vm0, %v67_v35 }
 0x212   :  { %v188_v37 = vpop.f32.mrb[0].mxu0 }
 0x213   :  { %v157_v38 = vadd.f32 %v188_v37, %v169_v36  ;;  %v151_v39 = vpop.f32.mrb[1].mxu0 }
 0x214   :  { %v152_v40 = vadd.f32 %v169_v36, %v151_v39 }
 0x215   :  { %162 = vst.msk [vmem:[%s275_s5 + $0x8] sm:$0xff] %vm160_vm1, %v157_v38 }
 0x216   :  { %161 = vst.msk [vmem:[%s275_s5] sm:$0xff] %vm160_vm1, %v152_v40 }

// kernel: transformer_encoder_forward.19
= control target key start
LH: loop header
LB: loop body
LE: loop exit
PB: predicated region body
PF: predicated region fallthrough
CT: control target
= control target key end

     0   :  { %vm18_vm0 = vcmask 261120   ;;  %s118_s0 = inlined_call_operand.vmem [shape: f32[16,32], index: 0, kind: input, shape index: {}]   ;;  %s119_s1 = inlined_call_operand.vmem [shape: f32[1,32], index: 1, kind: input, shape index: {}]   ;;  %s120_s2 = inlined_call_operand.vmem [shape: f32[1,32], index: 2, kind: input, shape index: {}]   ;;  %s121_s3 = inlined_call_operand.vmem [shape: f32[16,32], index: 3, kind: output, shape index: {}]  }
   0x1   :  { %v14_v0 = vld [vmem:[%s118_s0] sm:$0xff]  ;;  %v15_v1 = vld [vmem:[%s118_s0 + $0x8] sm:$0xff] }
   0x2   :  { %v19_v2 = vsel %vm18_vm0, %v14_v0, 0.0  ;;  %v22_v3 = vsel %vm18_vm0, %v15_v1, 0.0  ;;  %v68_v21 = vld [vmem:[%s119_s1] ss:$0 sm:$0xff] }
   0x3   :  { %20 = vadd.xlane.f32.xlu0 %v19_v2  ;;  %v69_v23 = vld [vmem:[%s120_s2] ss:$0 sm:$0xff] }
   0x7   :  { %23 = vadd.xlane.f32.xlu0 %v22_v3 }
  0x90   :  { %v21_v4 = vpop.xlane.xlu0 %20 }
  0x91   :  { %v26_v5 = vmul.f32 0.03125, %v21_v4 }
  0x93   :  { %v28_v6 = vsub.f32 %v14_v0, %v26_v5 }
  0x94   :  { %v24_v7 = vpop.xlane.xlu0 %23 }
  0x95   :  { %v27_v8 = vmul.f32 0.03125, %v24_v7  ;;  %v30_v9 = vmul.f32 %v28_v6, %v28_v6 }
  0x97   :  { %v29_v10 = vsub.f32 %v15_v1, %v27_v8  ;;  %v32_v11 = vsel %vm18_vm0, %v30_v9, 0.0 }
  0x98   :  { %33 = vadd.xlane.f32.xlu1 %v32_v11 }
  0x99   :  { %v31_v12 = vmul.f32 %v29_v10, %v29_v10 }
  0x9b   :  { %v35_v13 = vsel %vm18_vm0, %v31_v12, 0.0 }
  0x9c   :  { %36 = vadd.xlane.f32.xlu1 %v35_v13 }
 0x125   :  { %v34_v14 = vpop.xlane.xlu1 %33 }
 0x126   :  { %v38_v15 = vmul.f32 0.03125, %v34_v14 }
 0x128   :  { %v40_v16 = vadd.f32 1e-12, %v38_v15 }
 0x129   :  { %v37_v17 = vpop.xlane.xlu1 %36 }
 0x12a   :  { %70 = vrsqrt.f32 %v40_v16  ;;  %v39_v18 = vmul.f32 0.03125, %v37_v17 }
 0x12c   :  { %v41_v19 = vadd.f32 1e-12, %v39_v18 }
 0x12e   :  { %72 = vrsqrt.f32 %v41_v19 }
 0x134   :  { %v71_v20 = vpop.eup %70 }
 0x135   :  { %v44_v22 = vmul.f32 %v71_v20, %v28_v6 }
 0x137   :  { %v52_v24 = vmul.f32 %v68_v21, %v44_v22 }
 0x138   :  { %v73_v25 = vpop.eup %72 }
 0x139   :  { %v60_v26 = vadd.f32 %v69_v23, %v52_v24  ;;  %v45_v27 = vmul.f32 %v73_v25, %v29_v10 }
 0x13b   :  { %62 = vst.msk [vmem:[%s121_s3] sm:$0xff] %vm18_vm0, %v60_v26  ;;  %v53_v28 = vmul.f32 %v68_v21, %v45_v27 }
 0x13d   :  { %v61_v29 = vadd.f32 %v69_v23, %v53_v28 }
 0x13f   :  { %63 = vst.msk [vmem:[%s121_s3 + $0x8] sm:$0xff] %vm18_vm0, %v61_v29 }

// kernel: transformer_encoder_forward.14
= control target key start
LH: loop header
LB: loop body
LE: loop exit
PB: predicated region body
PF: predicated region fallthrough
CT: control target
= control target key end

     0   :  { %s1300_s18 = smov 0   ;;  %s1405_s0 = inlined_call_operand.vmem [shape: f32[2,8,96], index: 0, kind: input, shape index: {}]   ;;  %s1406_s1 = inlined_call_operand.vmem [shape: f32[2,1,8], index: 1, kind: input, shape index: {}]   ;;  %s1407_s2 = inlined_call_operand.vmem [shape: f32[32,32], index: 2, kind: input, shape index: {}]   ;;  %s1408_s3 = inlined_call_operand.vmem [shape: f32[1,32], index: 3, kind: input, shape index: {}]   ;;  %s1409_s4 = inlined_call_operand.vmem [shape: f32[2,8,32], index: 4, kind: input, shape index: {}, may-alias: {4,5}]   ;;  %s1410_s5 = inlined_call_operand.vmem [shape: f32[2,8,32], index: 5, kind: output, shape index: {}, may-alias: {4,5}]  }
   0x1 LB: > { %s1101_s19 = sadd.s32 4294967295, %s1251_s18   ;;  %p1105_p0 = scmp.ge.s32.totalorder %s1251_s18, 1  ;;  %s1251_s18 = sphi %s1300_s18, %s15_s18  }
   0x2   : > { %p203_p1 = scmp.lt.s32.totalorder %s1251_s18, 3 }
   0x4   : > { %p204_p2 = pnand %p1105_p0, %p203_p1 }
   0x5   : > { %p236_p3 = scmp.lt.s32.totalorder (!%p204_p2), %s1101_s19, 1  ;;  %v1253_v0 = vmov (!%p204_p2), 0.0   ;;  %vm1254_vm0 = vmmov (!%p204_p2), 0   ;;  %s1255_s24 = smov (!%p204_p2), 96   ;;  %vm263_vm1 = vcmask (!%p204_p2), 64512   ;;  %v939_v63 = vld [vmem:[%s1407_s2] sm:$0xff] (!%p204_p2) }
   0x6   : > { %207 = sbr.rel (%p204_p2) target bundleno = 1265 (0x4f1), region = 40  ;;  %1147 = vmatprep.subr.mxu0 (!%p204_p2), %v1253_v0  ;;  %1149 = vmatprep.mubr.msk.f32.mxu0 (!%p204_p2), %vm1254_vm0, %v1253_v0  ;;  %s1256_s25 = smov (!%p204_p2), 120   ;;  %vm934_vm2 = vcmask (!%p204_p2), 130048   ;;  %vm936_vm3 = vcmask (!%p204_p2), 195584   ;;  %vm943_vm4 = vcmask (!%p204_p2), 261120  }
   0x7   : > { %1157 = vmatprep.subr.mxu1 (!%p204_p2), %v1253_v0  ;;  %1159 = vmatprep.mubr.msk.f32.mxu1 (!%p204_p2), %vm1254_vm0, %v1253_v0  ;;  %s1257_s26 = smov (!%p204_p2), 88   ;;  %s1258_s27 = smov (!%p204_p2), 80  }
   0x8   : > { %s1259_s28 = smov (!%p204_p2), 112   ;;  %s1260_s29 = smov (!%p204_p2), 72  }
   0x9   : > { %s1261_s30 = smov (!%p204_p2), 104   ;;  %s1262_s9 = smov (!%p204_p2), 56  }
   0xa   : > { %s1263_s10 = smov (!%p204_p2), 64   ;;  %s1264_s11 = smov (!%p204_p2), 48  }
   0xb   : > { %s1265_s12 = smov (!%p204_p2), 40   ;;  %s1267_s17 = smov (!%p204_p2), 8  }
   0xd   : > { %s1412_s19 = smov (!%p236_p3, %s1101_s19), 1 }
   0xe   : > { %s1317_s20 = sshll.u32 %s1412_s19, 3  ;;  %s242_s8 = scalar_lea.vmem %s1406_s1, %s1412_s19 }
   0xf   : > { %s239_s23 = scalar_lea.vmem %s1405_s0, %s1317_s20  ;;  %v1109_v10 = vld [vmem:[%s242_s8] ss:$0 sm:$0xff]  ;;  %s250_s8 = scalar_lea.vmem %s1410_s5, %s1317_s20 }
  0x10   : > { %v1323_v1 = vld [vmem:[%s239_s23] sm:$0xff] }
  0x11   : > { %261 = vrot.lane.b32.xlu0 %v1323_v1, %s1255_s24  ;;  %v253_v2 = vmul.f32 0.35355338, %v1323_v1  ;;  %s1268_s24 = smov 16  }
  0x13   : > { %426 = vrot.lane.b32.xlu1 %v253_v2, %s1256_s25  ;;  %s1269_s25 = smov 24  }
  0x15   : > { %428 = vrot.lane.b32.xlu0 %v1323_v1, %s1257_s26 }
  0x17   : > { %593 = vrot.lane.b32.xlu1 %v1323_v1, %s1258_s27 }
  0x19   : > { %591 = vrot.lane.b32.xlu0 %v253_v2, %s1259_s28  ;;  %s246_s28 = scalar_lea.vmem %s1409_s4, %s1317_s20 }
  0x1b   : > { %758 = vrot.lane.b32.xlu1 %v1323_v1, %s1260_s29 }
  0x1d   : > { %756 = vrot.lane.b32.xlu0 %v253_v2, %s1261_s30 }
  0x83   : > { %v262_v3 = vpop.permute.xlu0 %261 }
  0x84   : > { %1148 = vmatpush3.xpose.msk.msra.mxu0 %vm263_vm1, %v262_v3 }
  0x85   : > { %v427_v4 = vpop.permute.xlu1 %426  ;;  %1152 = vmatprep.subr.mxu0 %v1253_v0 }
  0x87   : > { %v429_v5 = vpop.permute.xlu0 %428  ;;  %1150 = vmatmul.mubr.msk.f32.vlgmr.msra.gmra.mrb[0].mxu0 %vm263_vm1, %v253_v2  ;;  %v1266_v2 = vmov 0.0|0.0  }
  0x88   : > { %1158 = vmatpush3.xpose.msk.msra.mxu1 %vm263_vm1, %v429_v5  ;;  %1154 = vmatprep.mubr.msk.f32.mxu0 %vm1254_vm0, %v1253_v0 }
  0x89   : > { %1167 = vmatprep.subr.mxu1 %v1253_v0  ;;  %v594_v6 = vpop.permute.xlu1 %593 }
  0x8b   : > { %1160 = vmatmul.mubr.msk.f32.vlgmr.msra.gmra.mrb[0].mxu1 %vm263_vm1, %v427_v4  ;;  %v592_v7 = vpop.permute.xlu0 %591 }
  0x8c   : > { %1168 = vmatpush3.xpose.msk.msra.mxu1 %vm263_vm1, %v594_v6  ;;  %1169 = vmatprep.mubr.msk.f32.mxu1 %vm1254_vm0, %v1253_v0 }
  0x8d   : > { %1177 = vmatprep.subr.mxu1 %v1253_v0  ;;  %v759_v8 = vpop.permute.xlu1 %758 }
  0x8f   : > { %1170 = vmatmul.mubr.msk.f32.vlgmr.msra.gmra.mrb[2].mxu1 %vm263_vm1, %v592_v7  ;;  %v757_v9 = vpop.permute.xlu0 %756  ;;  %v941_v7 = vld [vmem:[%s1407_s2 + $0x10] sm:$0xff] }
  0x90   : > { %1178 = vmatpush3.xpose.msk.msra.mxu1 %vm263_vm1, %v759_v8  ;;  %1179 = vmatprep.mubr.msk.f32.mxu1 %vm1254_vm0, %v1253_v0  ;;  %v942_v8 = vld [vmem:[%s1407_s2 + $0x18] sm:$0xff] }
  0x91   : > { %1198 = vmatprep.subr.bf16.mxu1 %v1266_v2 }
  0x93   : > { %1180 = vmatmul.mubr.msk.f32.vlgmr.msra.gmra.mrb[4].mxu1 %vm263_vm1, %v757_v9  ;;  %v1202_v9 = vpack.c.bf16 %v942_v8, %v941_v7 }
  0x94   : > { %1195 = vmatprep.mubr.msk.f32.mxu1 %vm1254_vm0, %v1253_v0 }
 0x15a   : > { %v335_v11 = vpop.f32.mrb[0].mxu0 }
 0x15b   : > { %v336_v12 = vadd.f32 %v1109_v10, %v335_v11  ;;  %v1151_v13 = vpop.f32.mrb[1].mxu0 }
 0x15d   : > { %v339_v14 = vsel %vm263_vm1, %v336_v12, -inf }
 0x15e   : > { %v500_v15 = vpop.f32.mrb[0].mxu1  ;;  %340 = vmax.xlane.f32.xlu1 %v339_v14 }
 0x15f   : > { %v501_v16 = vadd.f32 %v1109_v10, %v500_v15  ;;  %v1161_v17 = vpop.f32.mrb[1].mxu1 }
 0x161   : > { %v504_v18 = vsel %vm263_vm1, %v501_v16, -inf }
 0x162   : > { %505 = vmax.xlane.f32.xlu0 %v504_v18  ;;  %v665_v19 = vpop.f32.mrb[2].mxu1 }
 0x163   : > { %v666_v20 = vadd.f32 %v1109_v10, %v665_v19  ;;  %v1171_v21 = vpop.f32.mrb[3].mxu1 }
 0x165   : > { %v669_v22 = vsel %vm263_vm1, %v666_v20, -inf }
 0x166   : > { %670 = vmax.xlane.f32.xlu0 %v669_v22  ;;  %v830_v23 = vpop.f32.mrb[4].mxu1  ;;  %v1123_v22 = vld [vmem:[%s1408_s3] ss:$0 sm:$0xff] }
 0x167   : > { %v831_v24 = vadd.f32 %v1109_v10, %v830_v23  ;;  %v1181_v25 = vpop.f32.mrb[5].mxu1 }
 0x169   : > { %v834_v26 = vsel %vm263_vm1, %v831_v24, -inf }
 0x16a   : > { %835 = vmax.xlane.f32.xlu1 %v834_v26 }
 0x17b   : > { %515 = vrot.lane.b32.xlu1 %v1323_v1, %s1262_s9 }
 0x1eb   : > { %v341_v27 = vpop.xlane.xlu1 %340 }
 0x1ec   : > { %v342_v28 = vsub.f32 %v336_v12, %v341_v27 }
 0x1ee   : > { %v343_v29 = vmul.f32 1.442695, %v342_v28 }
 0x1ef   : > { %v506_v30 = vpop.xlane.xlu0 %505 }
 0x1f0   : > { %1229 = vpow2.f32 %v343_v29  ;;  %v507_v31 = vsub.f32 %v501_v16, %v506_v30 }
 0x1f2   : > { %v508_v32 = vmul.f32 1.442695, %v507_v31 }
 0x1f3   : > { %v671_v42 = vpop.xlane.xlu0 %670 }
 0x1f4   : > { %1231 = vpow2.f32 %v508_v32  ;;  %v672_v43 = vsub.f32 %v666_v20, %v671_v42  ;;  %v938_v20 = vld [vmem:[%s246_s28] sm:$0xff] }
 0x1f6   : > { %v673_v44 = vmul.f32 1.442695, %v672_v43 }
 0x1f7   : > { %v836_v33 = vpop.xlane.xlu1 %835 }
 0x1f8   : > { %v837_v34 = vsub.f32 %v831_v24, %v836_v33 }
 0x1fa   : > { %v1230_v35 = vpop.eup %1229  ;;  %v838_v36 = vmul.f32 1.442695, %v837_v34 }
 0x1fb   : > { %v345_v37 = vsel %vm263_vm1, %v1230_v35, 0.0  ;;  %v516_v47 = vpop.permute.xlu1 %515 }
 0x1fc   : > { %1233 = vpow2.f32 %v838_v36  ;;  %346 = vadd.xlane.f32.xlu0 %v345_v37 }
 0x1fd   : > { %1235 = vpow2.f32 %v673_v44 }
 0x1fe   : > { %v1232_v38 = vpop.eup %1231 }
 0x1ff   : > { %v510_v39 = vsel %vm263_vm1, %v1232_v38, 0.0 }
 0x200   : > { %511 = vadd.xlane.f32.xlu1 %v510_v39 }
 0x206   : > { %v1234_v40 = vpop.eup %1233 }
 0x207   : > { %v840_v41 = vsel %vm263_vm1, %v1234_v40, 0.0  ;;  %v1236_v45 = vpop.eup %1235 }
 0x208   : > { %841 = vadd.xlane.f32.xlu1 %v840_v41  ;;  %v675_v46 = vsel %vm263_vm1, %v1236_v45, 0.0 }
 0x212   : > { %350 = vrot.lane.b32.xlu0 %v1323_v1, %s1263_s10 }
 0x219   : > { %680 = vrot.lane.b32.xlu1 %v1323_v1, %s1264_s11 }
 0x231   : > { %676 = vadd.xlane.f32.xlu0 %v675_v46 }
 0x247   : > { %845 = vrot.lane.b32.xlu0 %v1323_v1, %s1265_s12  ;;  %v940_v1 = vld [vmem:[%s1407_s2 + $0x8] sm:$0xff] }
 0x248   : > { %v1199_v3 = vpack.c.bf16 %v940_v1, %v939_v63 }
 0x24a   : > { %1200 = vmatpush3.bf16.msra.mxu1 %v1199_v3 }
 0x24b   : > { %1201 = vmatprep.subr.bf16.mxu1 %v1266_v2 }
 0x24e   : > { %1203 = vmatpush3.bf16.msra.mxu1 %v1202_v9 }
 0x289   : > { %v347_v48 = vpop.xlane.xlu0 %346 }
 0x28a   : > { %1237 = vrcp.f32 %v347_v48 }
 0x28d   : > { %v351_v49 = vpop.permute.xlu0 %350  ;;  %v512_v50 = vpop.xlane.xlu1 %511 }
 0x28e   : > { %1239 = vrcp.f32 %v512_v50  ;;  %1153 = vmatpush3.msra.mxu0 %v351_v49 }
 0x28f   : > { %1162 = vmatprep.subr.mxu0 %v1253_v0 }
 0x294   : > { %v1238_v51 = vpop.eup %1237 }
 0x295   : > { %v349_v52 = vmul.f32 %v1238_v51, %v1230_v35  ;;  %v842_v53 = vpop.xlane.xlu1 %841 }
 0x297   : > { %1155 = vmatmul.mubr.msk.f32.vlgmr.msra.gmra.mrb[2].mxu0 %vm263_vm1, %v349_v52 }
 0x298   : > { %v1240_v54 = vpop.eup %1239  ;;  %1163 = vmatpush3.msra.mxu0 %v516_v47  ;;  %1164 = vmatprep.mubr.msk.f32.mxu0 %vm1254_vm0, %v1253_v0 }
 0x299   : > { %v514_v55 = vmul.f32 %v1240_v54, %v1232_v38  ;;  %1172 = vmatprep.subr.mxu0 %v1253_v0  ;;  %v681_v56 = vpop.permute.xlu1 %680 }
 0x29b   : > { %1165 = vmatmul.mubr.msk.f32.vlgmr.msra.gmra.mrb[4].mxu0 %vm263_vm1, %v514_v55 }
 0x29c   : > { %1173 = vmatpush3.msra.mxu0 %v681_v56  ;;  %1174 = vmatprep.mubr.msk.f32.mxu0 %vm1254_vm0, %v1253_v0 }
 0x29d   : > { %1182 = vmatprep.subr.mxu0 %v1253_v0 }
 0x2be   : > { %v677_v57 = vpop.xlane.xlu0 %676 }
 0x2bf   : > { %1241 = vrcp.f32 %v677_v57 }
 0x2c0   : > { %1243 = vrcp.f32 %v842_v53 }
 0x2c2   : > { %v846_v60 = vpop.permute.xlu0 %845 }
 0x2c9   : > { %v1242_v58 = vpop.eup %1241 }
 0x2ca   : > { %v679_v59 = vmul.f32 %v1242_v58, %v1236_v45  ;;  %v1244_v61 = vpop.eup %1243 }
 0x2cb   : > { %v844_v62 = vmul.f32 %v1244_v61, %v1234_v40 }
 0x2cc   : > { %1175 = vmatmul.mubr.msk.f32.vlgmr.msra.gmra.mrb[6].mxu0 %vm263_vm1, %v679_v59 }
 0x2cd   : > { %1183 = vmatpush3.msra.mxu0 %v846_v60  ;;  %1184 = vmatprep.mubr.msk.f32.mxu0 %vm1254_vm0, %v1253_v0 }
 0x2d0   : > { %1185 = vmatmul.mubr.msk.f32.vlgmr.msra.gmra.mrb[8].mxu0 %vm263_vm1, %v844_v62 }
 0x36a   : > { %v422_v4 = vpop.f32.mrb[2].mxu0 }
 0x36b   : > { %v1156_v5 = vpop.f32.mrb[3].mxu0 }
 0x36e   : > { %v587_v6 = vpop.f32.mrb[4].mxu0 }
 0x36f   : > { %922 = vrot.lane.b32.xlu1 %v587_v6, %s1267_s17  ;;  %v1166_v0 = vpop.f32.mrb[5].mxu0 }
 0x39f   : > { %v752_v10 = vpop.f32.mrb[6].mxu0 }
 0x3a0   : > { %926 = vrot.lane.b32.xlu0 %v752_v10, %s1268_s24  ;;  %v1176_v11 = vpop.f32.mrb[7].mxu0 }
 0x3a3   : > { %v917_v12 = vpop.f32.mrb[8].mxu0 }
 0x3a4   : > { %930 = vrot.lane.b32.xlu1 %v917_v12, %s1269_s25  ;;  %v1186_v13 = vpop.f32.mrb[9].mxu0 }
 0x3e1   : > { %v923_v14 = vpop.permute.xlu1 %922 }
 0x3e2   : > { %v933_v16 = vsel %vm263_vm1, %v422_v4, %v923_v14 }
 0x412   : > { %v927_v15 = vpop.permute.xlu0 %926 }
 0x413   : > { %v935_v17 = vsel %vm934_vm2, %v933_v16, %v927_v15 }
 0x416   : > { %v931_v18 = vpop.permute.xlu1 %930 }
 0x417   : > { %v937_v19 = vsel %vm936_vm3, %v935_v17, %v931_v18 }
 0x418   : > { %1196 = vmatmul.mubr.msk.f32.vlgmr.msra.gmra.mrb[6].mxu1 %vm943_vm4, %v937_v19 }
 0x4eb   : > { %v1013_v21 = vpop.f32.mrb[6].mxu1 }
 0x4ec   : > { %v1017_v23 = vadd.f32 %v1013_v21, %v938_v20  ;;  %v1197_v24 = vpop.f32.mrb[7].mxu1 }
 0x4ee   : > { %v1025_v25 = vadd.f32 %v1123_v22, %v1017_v23 }
 0x4f0   : > { %1026 = vst.msk [vmem:[%s250_s8] sm:$0xff] %vm943_vm4, %v1025_v25 }
 0x4f1 PF: > { %s15_s18 = sadd.s32 1, %s1251_s18  }
 0x4f2   : > { %p12_p4 = scmp.ge.s32.totalorder %s15_s18, 4  }
 0x4f4   :  { %14 = sbr.rel (!%p12_p4) target bundleno = 1 (0x1), region = 76 }

// kernel: transformer_encoder_forward.15
= control target key start
LH: loop header
LB: loop body
LE: loop exit
PB: predicated region body
PF: predicated region fallthrough
CT: control target
= control target key end

     0   :  { %vm30_vm0 = vcmask 261120   ;;  %vm176_vm1 = vcmask 523264   ;;  %s475_s0 = inlined_call_operand.vmem [shape: f32[16,32], index: 0, kind: input, shape index: {}, may-alias: {0,7}]   ;;  %s476_s3 = inlined_call_operand.vmem [shape: f32[32,64], index: 3, kind: input, shape index: {}]   ;;  %s477_s5 = inlined_call_operand.vmem [shape: f32[64,32], index: 5, kind: input, shape index: {}]   ;;  %s478_s1 = inlined_call_operand.vmem [shape: f32[1,32], index: 1, kind: input, shape index: {}]   ;;  %s479_s2 = inlined_call_operand.vmem [shape: f32[1,32], index: 2, kind: input, shape index: {}]   ;;  %s480_s4 = inlined_call_operand.vmem [shape: f32[1,64], index: 4, kind: input, shape index: {}]   ;;  %s481_s6 = inlined_call_operand.vmem [shape: f32[1,32], index: 6, kind: input, shape index: {}]   ;;  %s482_s7 = inlined_call_operand.vmem [shape: f32[16,32], index: 7, kind: output, shape index: {}, may-alias: {0,7}]  }
   0x1   :  { %v400_v0 = vld [vmem:[%s475_s0] sm:$0xff]  ;;  %v405_v1 = vld [vmem:[%s475_s0 + $0x8] sm:$0xff]  ;;  %v76_v16 = vld [vmem:[%s476_s3 + $0x10] sm:$0xff] }
   0x2   :  { %v31_v2 = vsel %vm30_vm0, %v400_v0, 0.0  ;;  %v34_v3 = vsel %vm30_vm0, %v405_v1, 0.0  ;;  %v74_v14 = vld [vmem:[%s476_s3] sm:$0xff]  ;;  %v75_v15 = vld [vmem:[%s476_s3 + $0x8] sm:$0xff]  ;;  %v77_v18 = vld [vmem:[%s476_s3 + $0x18] sm:$0xff] }
   0x3   :  { %32 = vadd.xlane.f32.xlu0 %v31_v2  ;;  %v329_v17 = vpack.c.bf16 %v75_v15, %v74_v14  ;;  %v333_v19 = vpack.c.bf16 %v77_v18, %v76_v16  ;;  %v168_v20 = vld [vmem:[%s477_s5] sm:$0xff]  ;;  %v169_v21 = vld [vmem:[%s477_s5 + $0x8] sm:$0xff]  ;;  %v170_v22 = vld [vmem:[%s477_s5 + $0x10] sm:$0xff] }
   0x4   :  { %v337_v23 = vpack.c.bf16 %v169_v21, %v168_v20  ;;  %v171_v24 = vld [vmem:[%s477_s5 + $0x18] sm:$0xff]  ;;  %v172_v26 = vld [vmem:[%s477_s5 + $0x20] sm:$0xff]  ;;  %v173_v27 = vld [vmem:[%s477_s5 + $0x28] sm:$0xff] }
   0x5   :  { %330 = vmatprep.subr.bf16.mxu0 %v329_v17  ;;  %v341_v25 = vpack.c.bf16 %v171_v24, %v170_v22  ;;  %v345_v28 = vpack.c.bf16 %v173_v27, %v172_v26  ;;  %v275_v36 = vld [vmem:[%s478_s1] ss:$0 sm:$0xff]  ;;  %v174_v45 = vld [vmem:[%s477_s5 + $0x30] sm:$0xff]  ;;  %v175_v46 = vld [vmem:[%s477_s5 + $0x38] sm:$0xff] }
   0x6   :  { %332 = vmatpush3.bf16.msra.mxu0 %v329_v17  ;;  %338 = vmatprep.subr.bf16.mxu1 %v337_v23  ;;  %v276_v38 = vld [vmem:[%s479_s2] ss:$0 sm:$0xff]  ;;  %v349_v47 = vpack.c.bf16 %v175_v46, %v174_v45 }
   0x7   :  { %35 = vadd.xlane.f32.xlu0 %v34_v3  ;;  %334 = vmatprep.subr.bf16.mxu0 %v333_v19  ;;  %v277_v48 = vld [vmem:[%s480_s4] ss:$0 sm:$0xff] }
   0x8   :  { %340 = vmatpush3.bf16.msra.mxu1 %v337_v23  ;;  %v282_v56 = vld [vmem:[%s481_s6] ss:$0 sm:$0xff] }
   0x9   :  { %342 = vmatprep.subr.bf16.mxu1 %v341_v25 }
   0xa   :  { %336 = vmatpush3.bf16.msra.mxu0 %v333_v19 }
   0xc   :  { %344 = vmatpush3.bf16.msra.mxu1 %v341_v25 }
   0xd   :  { %346 = vmatprep.subr.bf16.mxu1 %v345_v28 }
  0x10   :  { %348 = vmatpush3.bf16.msra.mxu1 %v345_v28 }
  0x11   :  { %350 = vmatprep.subr.bf16.mxu1 %v349_v47 }
  0x14   :  { %352 = vmatpush3.bf16.msra.mxu1 %v349_v47 }
  0x90   :  { %v33_v4 = vpop.xlane.xlu0 %32 }
  0x91   :  { %v38_v5 = vmul.f32 0.03125, %v33_v4 }
  0x93   :  { %v40_v6 = vsub.f32 %v400_v0, %v38_v5 }
  0x94   :  { %v36_v7 = vpop.xlane.xlu0 %35 }
  0x95   :  { %v39_v8 = vmul.f32 0.03125, %v36_v7  ;;  %v42_v9 = vmul.f32 %v40_v6, %v40_v6 }
  0x97   :  { %v41_v10 = vsub.f32 %v405_v1, %v39_v8  ;;  %v44_v11 = vsel %vm30_vm0, %v42_v9, 0.0 }
  0x98   :  { %45 = vadd.xlane.f32.xlu1 %v44_v11 }
  0x99   :  { %v43_v12 = vmul.f32 %v41_v10, %v41_v10 }
  0x9b   :  { %v47_v13 = vsel %vm30_vm0, %v43_v12, 0.0 }
  0x9c   :  { %48 = vadd.xlane.f32.xlu1 %v47_v13 }
 0x125   :  { %v46_v29 = vpop.xlane.xlu1 %45 }
 0x126   :  { %v50_v30 = vmul.f32 0.03125, %v46_v29 }
 0x128   :  { %v52_v31 = vadd.f32 1e-12, %v50_v30 }
 0x129   :  { %v49_v32 = vpop.xlane.xlu1 %48 }
 0x12a   :  { %353 = vrsqrt.f32 %v52_v31  ;;  %v51_v33 = vmul.f32 0.03125, %v49_v32 }
 0x12c   :  { %v53_v34 = vadd.f32 1e-12, %v51_v33 }
 0x12e   :  { %355 = vrsqrt.f32 %v53_v34 }
 0x134   :  { %v354_v35 = vpop.eup %353 }
 0x135   :  { %v56_v37 = vmul.f32 %v354_v35, %v40_v6 }
 0x137   :  { %v64_v39 = vmul.f32 %v275_v36, %v56_v37 }
 0x138   :  { %v356_v40 = vpop.eup %355 }
 0x139   :  { %v57_v41 = vmul.f32 %v356_v40, %v41_v10  ;;  %v72_v42 = vadd.f32 %v276_v38, %v64_v39 }
 0x13b   :  { %v65_v43 = vmul.f32 %v275_v36, %v57_v41  ;;  %307 = vmatprep.mubr.msk.f32.mxu0 %vm30_vm0, %v72_v42 }
 0x13d   :  { %v73_v44 = vadd.f32 %v276_v38, %v65_v43 }
 0x13f   :  { %308 = vmatmul.mubr.msk.f32.vlgmr.msra.gmra.mrb[0].mxu0 %vm30_vm0, %v73_v44 }
 0x212   :  { %v309_v49 = vpop.f32.mrb[0].mxu0 }
 0x213   :  { %v163_v50 = vadd.f32 %v309_v49, %v277_v48  ;;  %v157_v51 = vpop.f32.mrb[1].mxu0 }
 0x214   :  { %v158_v52 = vadd.f32 %v277_v48, %v157_v51 }
 0x215   :  { %v167_v54 = vmax.f32 %v163_v50, 0.0 }
 0x216   :  { %v166_v53 = vmax.f32 %v158_v52, 0.0 }
 0x218   :  { %326 = vmatprep.mubr.msk.f32.mxu1 %vm176_vm1, %v166_v53 }
 0x219   :  { %327 = vmatmul.mubr.msk.f32.vlgmr.msra.gmra.mrb[0].mxu1 %vm176_vm1, %v167_v54 }
 0x2ec   :  { %v328_v55 = vpop.f32.mrb[0].mxu1 }
 0x2ed   :  { %v259_v57 = vadd.f32 %v328_v55, %v405_v1  ;;  %v249_v58 = vpop.f32.mrb[1].mxu1 }
 0x2ee   :  { %v258_v59 = vadd.f32 %v249_v58, %v400_v0 }
 0x2ef   :  { %v268_v60 = vadd.f32 %v282_v56, %v259_v57 }
 0x2f0   :  { %v267_v61 = vadd.f32 %v282_v56, %v258_v59 }
 0x2f1   :  { %270 = vst.msk [vmem:[%s482_s7 + $0x8] sm:$0xff] %vm30_vm0, %v268_v60 }
 0x2f2   :  { %269 = vst.msk [vmem:[%s482_s7] sm:$0xff] %vm30_vm0, %v267_v61 }

</bundles_post_ra>
